<compile_context>
chip_gen: v7x
topology: tpu7x:2x2x1
jax: 0.10.0
libtpu: 0.0.40
codegen_flags: <defaults>
</compile_context>

<pallas_src>
import math

import jax
import jax.numpy as jnp
from jax.experimental import pallas as pl
from jax.experimental.pallas import tpu as pltpu

# ----------------------------- small synthetic config -----------------------
HIDDEN = 32            # config.hidden_size
HEADS = 4              # config.num_attention_heads
HEAD_DIM = HIDDEN // HEADS
LAYERS = 2             # config.num_hidden_layers
INTER = 64             # config.intermediate_size
CONV_K = 16            # config.num_conv_pos_embeddings (even -> SamePad drops last)
CONV_GROUPS = 4        # config.num_conv_pos_embedding_groups
CONV_CG = HIDDEN // CONV_GROUPS
NUM_BUCKETS = 8        # config.num_buckets
MAX_DIST = 16          # config.max_bucket_distance
LN_EPS = 1e-5          # config.layer_norm_eps
ADAPTER_HIDDEN = 8     # os_kdft_adapter_hidden
B, T = 2, 8            # batch, sequence length

GRU_OUT = 8                              # WavLM gru_rel_pos_linear output dim
NPACK = 3 * HIDDEN + HEADS * GRU_OUT     # packed input-proj width (= 128 here)
FFPACK = INTER + ADAPTER_HIDDEN          # packed ffn/adapter hidden width (= 72)


# ----------------------------- in-kernel helpers -----------------------------
def _erf(x):
    # Abramowitz & Stegun 7.1.26 rational approximation, |err| <= 1.5e-7.
    # Used instead of lax.erf so only ops guaranteed to lower in Mosaic appear.
    t = 1.0 / (1.0 + 0.3275911 * jnp.abs(x))
    poly = ((((1.061405429 * t - 1.453152027) * t + 1.421413741) * t
             - 0.284496736) * t + 0.254829592) * t
    y = 1.0 - poly * jnp.exp(-x * x)
    return jnp.where(x >= 0, y, -y)


def _gelu(x):
    # erf-exact GELU (PyTorch nn.GELU default), via the erf approximation above.
    return 0.5 * x * (1.0 + _erf(x * (1.0 / math.sqrt(2.0))))


def _elu(x):
    # Clamp so the discarded where() branch cannot overflow.
    # TODO(synk): jnp.expm1 would be marginally more precise near 0 if Mosaic lowers it.
    return jnp.where(x > 0, x, jnp.exp(jnp.minimum(x, 0.0)) - 1.0)


def _layernorm(x, gb):
    # gb: (2, C) = [gamma; beta]
    mean = jnp.mean(x, axis=-1, keepdims=True)
    var = jnp.mean((x - mean) ** 2, axis=-1, keepdims=True)
    return (x - mean) * jax.lax.rsqrt(var + LN_EPS) * gb[0:1, :] + gb[1:2, :]


# ----------------------------- the fused encoder kernel ----------------------
def _encoder_kernel(x_ref, cols_ref, wpc_ref, bpc_ref, encln_ref, posbias_ref,
                    w_in_ref, b_in_ref, gconst_ref, w_o_ref, b_o_ref, ln1_ref,
                    w1_ref, b1_ref, w2_ref, b2_ref, ln2_ref, o_ref):
    C, H, HD = HIDDEN, HEADS, HEAD_DIM
    x = x_ref[0]                                        # (T, C)
    cols = cols_ref[0]                                  # (G, T, K*cg) im2col per group

    # ---- WavLMPositionalConvEmbedding: grouped conv as per-group (T,128)x(128,8)
    parts = []
    for g in range(CONV_GROUPS):
        parts.append(jnp.dot(cols[g], wpc_ref[g], preferred_element_type=jnp.float32))
    pos = jnp.concatenate(parts, axis=-1) + bpc_ref[...]     # (T, C)
    hidden = x + _gelu(pos)                                  # SamePad(drop last) + GELU + residual
    hidden = _layernorm(hidden, encln_ref[...])              # encoder layer_norm (dropout = id)

    bias_all = posbias_ref[...]                              # (H, T, T) ungated rel-pos bias
    scale = float(HD) ** -0.5

    for l in range(LAYERS):                                  # static unroll; weights VMEM-resident
        # -------- packed input projection: [q | k | v | per-head gru-gate proj]
        y = jnp.dot(hidden, w_in_ref[l], preferred_element_type=jnp.float32) + b_in_ref[l]
        q = y[:, 0:C]
        k = y[:, C:2 * C]
        v = y[:, 2 * C:3 * C]
        gp = y[:, 3 * C:3 * C + H * GRU_OUT]
        gconst = gconst_ref[l]                               # (1, H)

        ctx_parts = []
        for h in range(H):                                   # heads unrolled in-register
            qh = q[:, h * HD:(h + 1) * HD] * scale
            kh = k[:, h * HD:(h + 1) * HD]
            vh = v[:, h * HD:(h + 1) * HD]
            s = jax.lax.dot_general(qh, kh, (((1,), (1,)), ((), ())),
                                    preferred_element_type=jnp.float32)   # (T, T)
            # gated relative-position bias (WavLM gru_rel_pos) fused in-kernel
            gph = gp[:, h * GRU_OUT:(h + 1) * GRU_OUT]
            gate_a = jax.nn.sigmoid(jnp.sum(gph[:, 0:4], axis=-1, keepdims=True))
            gate_b = jax.nn.sigmoid(jnp.sum(gph[:, 4:8], axis=-1, keepdims=True))
            gate = gate_a * (gate_b * gconst[:, h:h + 1] - 1.0) + 2.0      # (T, 1)
            s = s + gate * bias_all[h]
            # softmax (denominator on EUP via approx reciprocal)
            s = s - jnp.max(s, axis=-1, keepdims=True)
            p = jnp.exp(s)
            p = p * pl.reciprocal(jnp.sum(p, axis=-1, keepdims=True), approx=True)
            ctx_parts.append(jnp.dot(p, vh, preferred_element_type=jnp.float32))
        ctx = jnp.concatenate(ctx_parts, axis=-1)            # (T, C) head merge in-register

        # -------- out-proj + residual + LayerNorm fused
        attn = jnp.dot(ctx, w_o_ref[l], preferred_element_type=jnp.float32) + b_o_ref[l]
        hidden = _layernorm(hidden + attn, ln1_ref[l])

        # -------- packed FFN + OS-KDFT adapter: [ff_i | ad_down], [ff_o ; ad_up]
        h1 = jnp.dot(hidden, w1_ref[l], preferred_element_type=jnp.float32) + b1_ref[l]
        a = _gelu(h1[:, 0:INTER])                            # WavLMFeedForward intermediate act
        d = _elu(h1[:, INTER:INTER + ADAPTER_HIDDEN])        # adapter ELU (eval: no noise)
        h2 = jnp.dot(jnp.concatenate([a, d], axis=-1), w2_ref[l],
                     preferred_element_type=jnp.float32) + b2_ref[l]
        hidden = _layernorm(hidden + h2, ln2_ref[l])         # residual + final LayerNorm fused

    o_ref[0] = hidden.astype(o_ref.dtype)


# ----------------------------- plain-JAX glue ---------------------------------
def compute_rel_position_bias(Tq, rel_embed):
    """WavLMAttention.compute_bias -> (H, T, T).  (Sign convention: rel = mem - ctx,
    +num_buckets//2 offset on rel > 0 — matches HF WavLM _relative_positions_bucket.)"""
    ctx = jnp.arange(Tq)[:, None]
    mem = jnp.arange(Tq)[None, :]
    rel = mem - ctx
    nb = NUM_BUCKETS // 2
    buckets = (rel > 0).astype(jnp.int32) * nb
    rel_abs = jnp.abs(rel)
    max_exact = nb // 2
    is_small = rel_abs < max_exact
    rel_f = jnp.maximum(rel_abs.astype(jnp.float32), 1e-20)   # avoid log(0); masked anyway
    large = jnp.log(rel_f / max_exact) / math.log(MAX_DIST / max_exact) * (nb - max_exact)
    large = (max_exact + large).astype(jnp.int32)
    large = jnp.minimum(large, nb - 1)
    buckets = buckets + jnp.where(is_small, rel_abs, large)
    values = rel_embed[buckets]                               # (T, T, H)
    return jnp.transpose(values, (2, 0, 1))                   # (H, T, T)


def custom_wavlm_encoder(packed, hidden_states):
    """CustomWavLMEncoder.forward (eval mode).  hidden_states: (B, T, HIDDEN)."""
    Bz, Tq, C = hidden_states.shape
    K, G, cg = CONV_K, CONV_GROUPS, CONV_CG
    pad = K // 2

    # im2col for the grouped positional conv (layout glue only).
    x_pad = jnp.pad(hidden_states, ((0, 0), (pad, pad), (0, 0)))
    idx = jnp.arange(Tq)[:, None] + jnp.arange(K)[None, :]                   # (T, K)
    cols = x_pad[:, idx, :]                                                  # (B, T, K, C)
    cols = cols.reshape(Bz, Tq, K, G, cg).transpose(0, 3, 1, 2, 4).reshape(Bz, G, Tq, K * cg)

    # Ungated relative-position bias (layer 0's embedding; shared by all layers).
    pos_bias = compute_rel_position_bias(Tq, packed["rel_attn_embed"])       # (H, T, T)

    weights = (packed["wpc"], packed["bpc"], packed["encln"], pos_bias,
               packed["w_in"], packed["b_in"], packed["gconst"],
               packed["w_o"], packed["b_o"], packed["ln1"],
               packed["w1"], packed["b1"], packed["w2"], packed["b2"], packed["ln2"])

    def full(a):
        return pl.BlockSpec(a.shape, lambda b, n=a.ndim: (0,) * n)

    in_specs = [pl.BlockSpec((1, Tq, C), lambda b: (b, 0, 0)),
                pl.BlockSpec((1, G, Tq, K * cg), lambda b: (b, 0, 0, 0))]
    in_specs += [full(w) for w in weights]

    return pl.pallas_call(
        _encoder_kernel,
        out_shape=jax.ShapeDtypeStruct((Bz, Tq, C), jnp.float32),
        grid=(Bz,),
        in_specs=in_specs,
        out_specs=pl.BlockSpec((1, Tq, C), lambda b: (b, 0, 0)),
        compiler_params=pltpu.CompilerParams(dimension_semantics=("parallel",)),
    )(hidden_states, cols, *weights)


# ----------------------------- one-time weight packing ------------------------
def pack_params(params):
    """Repack PyTorch-layout params once into kernel-ready, pre-transposed and
    concatenated matrices (no per-forward transposes, no zero block-diag conv)."""
    C, H, HD = HIDDEN, HEADS, HEAD_DIM
    G, cg, K = CONV_GROUPS, CONV_CG, CONV_K

    # grouped conv weight (C_out, C_in/G, K) -> per-group im2col weight (G, K*cg, cg)
    w = params["pos_conv_w"].reshape(G, cg, cg, K)             # [g, oc, ci, k]
    wpc = jnp.transpose(w, (0, 3, 2, 1)).reshape(G, K * cg, cg)

    w_in, b_in, gconst, w_o, b_o, ln1, w1, b1, w2, b2, ln2 = ([] for _ in range(11))
    for lp in params["layers"]:
        # per-head gru-gate projection folded into the q/k/v matmul (block structure)
        gru_full = jnp.zeros((C, H * GRU_OUT), jnp.float32)
        for h in range(H):
            gru_full = gru_full.at[h * HD:(h + 1) * HD,
                                   h * GRU_OUT:(h + 1) * GRU_OUT].set(lp["gru_w"].T)
        w_in.append(jnp.concatenate([lp["q_w"].T, lp["k_w"].T, lp["v_w"].T, gru_full], axis=1))
        b_in.append(jnp.concatenate([lp["q_b"], lp["k_b"], lp["v_b"],
                                     jnp.tile(lp["gru_b"], H)])[None, :])
        gconst.append(lp["gru_const"].reshape(1, H))
        w_o.append(lp["o_w"].T)
        b_o.append(lp["o_b"][None, :])
        ln1.append(jnp.stack([lp["ln_g"], lp["ln_b"]]))
        w1.append(jnp.concatenate([lp["ff_i_w"].T, lp["ad_down_w"].T], axis=1))
        b1.append(jnp.concatenate([lp["ff_i_b"], lp["ad_down_b"]])[None, :])
        w2.append(jnp.concatenate([lp["ff_o_w"].T, lp["ad_up_w"].T], axis=0))
        b2.append((lp["ff_o_b"] + lp["ad_up_b"])[None, :])     # both branches add to hidden
        ln2.append(jnp.stack([lp["fln_g"], lp["fln_b"]]))

    return {
        "wpc": wpc,                                            # (G, K*cg, cg)
        "bpc": params["pos_conv_b"][None, :],                  # (1, C)
        "encln": jnp.stack([params["enc_ln_g"], params["enc_ln_b"]]),  # (2, C)
        "rel_attn_embed": params["rel_attn_embed"],            # (NUM_BUCKETS, H)
        "w_in": jnp.stack(w_in),   "b_in": jnp.stack(b_in),    # (L, C, 128), (L, 1, 128)
        "gconst": jnp.stack(gconst),                           # (L, 1, H)
        "w_o": jnp.stack(w_o),     "b_o": jnp.stack(b_o),      # (L, C, C), (L, 1, C)
        "ln1": jnp.stack(ln1),                                 # (L, 2, C)
        "w1": jnp.stack(w1),       "b1": jnp.stack(b1),        # (L, C, 72), (L, 1, 72)
        "w2": jnp.stack(w2),       "b2": jnp.stack(b2),        # (L, 72, C), (L, 1, C)
        "ln2": jnp.stack(ln2),                                 # (L, 2, C)
    }


# ----------------------------- deterministic params ---------------------------
def init_params(key):
    keys = jax.random.split(key, 256)
    counter = [0]

    def nrm(shape, scale=0.05):
        k = keys[counter[0]]
        counter[0] += 1
        return (scale * jax.random.normal(k, shape)).astype(jnp.float32)

    params = {
        # weight_norm on the conv is a reparameterization; init the effective weight.
        "pos_conv_w": nrm((HIDDEN, HIDDEN // CONV_GROUPS, CONV_K)),
        "pos_conv_b": nrm((HIDDEN,)),
        "enc_ln_g": jnp.ones((HIDDEN,), jnp.float32),
        "enc_ln_b": jnp.zeros((HIDDEN,), jnp.float32),
        "rel_attn_embed": nrm((NUM_BUCKETS, HEADS)),   # only layer 0 has the rel-bias embed
        "layers": [],
    }
    for _ in range(LAYERS):
        lp = {
            "q_w": nrm((HIDDEN, HIDDEN)), "q_b": nrm((HIDDEN,)),
            "k_w": nrm((HIDDEN, HIDDEN)), "k_b": nrm((HIDDEN,)),
            "v_w": nrm((HIDDEN, HIDDEN)), "v_b": nrm((HIDDEN,)),
            "o_w": nrm((HIDDEN, HIDDEN)), "o_b": nrm((HIDDEN,)),
            "gru_w": nrm((GRU_OUT, HEAD_DIM)), "gru_b": nrm((GRU_OUT,)),
            "gru_const": jnp.ones((1, HEADS, 1, 1), jnp.float32),
            "ln_g": jnp.ones((HIDDEN,), jnp.float32),
            "ln_b": jnp.zeros((HIDDEN,), jnp.float32),
            "ff_i_w": nrm((INTER, HIDDEN)), "ff_i_b": nrm((INTER,)),
            "ff_o_w": nrm((HIDDEN, INTER)), "ff_o_b": nrm((HIDDEN,)),
            "fln_g": jnp.ones((HIDDEN,), jnp.float32),
            "fln_b": jnp.zeros((HIDDEN,), jnp.float32),
            "ad_down_w": nrm((ADAPTER_HIDDEN, HIDDEN)), "ad_down_b": nrm((ADAPTER_HIDDEN,)),
            "ad_up_w": nrm((HIDDEN, ADAPTER_HIDDEN)), "ad_up_b": nrm((HIDDEN,)),
        }
        params["layers"].append(lp)
    return params


# ----------------------------- main -------------------------------------------
if __name__ == "__main__":
    root = jax.random.PRNGKey(0)
    pkey, xkey = jax.random.split(root)
    params = init_params(pkey)
    packed = pack_params(params)          # one-time packing; no per-forward transposes
    x = jax.random.normal(xkey, (B, T, HIDDEN), dtype=jnp.float32)

    fwd = jax.jit(custom_wavlm_encoder)
    out = jax.block_until_ready(fwd(packed, x))

    assert out.shape == (B, T, HIDDEN), out.shape
    assert bool(jnp.isfinite(out).all())
    print("KERNEL_OK")
</pallas_src>

<mosaic_0001>
module attributes {stable_mosaic.version = 11 : i64} {
  func.func @_encoder_kernel(%arg0: i32, %arg1: memref<1x8x32xf32, #tpu.memory_space<vmem>>, %arg2: memref<1x4x8x128xf32, #tpu.memory_space<vmem>>, %arg3: memref<4x128x8xf32, #tpu.memory_space<vmem>>, %arg4: memref<1x32xf32, #tpu.memory_space<vmem>>, %arg5: memref<2x32xf32, #tpu.memory_space<vmem>>, %arg6: memref<4x8x8xf32, #tpu.memory_space<vmem>>, %arg7: memref<2x32x128xf32, #tpu.memory_space<vmem>>, %arg8: memref<2x1x128xf32, #tpu.memory_space<vmem>>, %arg9: memref<2x1x4xf32, #tpu.memory_space<vmem>>, %arg10: memref<2x32x32xf32, #tpu.memory_space<vmem>>, %arg11: memref<2x1x32xf32, #tpu.memory_space<vmem>>, %arg12: memref<2x2x32xf32, #tpu.memory_space<vmem>>, %arg13: memref<2x32x72xf32, #tpu.memory_space<vmem>>, %arg14: memref<2x1x72xf32, #tpu.memory_space<vmem>>, %arg15: memref<2x72x32xf32, #tpu.memory_space<vmem>>, %arg16: memref<2x1x32xf32, #tpu.memory_space<vmem>>, %arg17: memref<2x2x32xf32, #tpu.memory_space<vmem>>, %arg18: memref<1x8x32xf32, #tpu.memory_space<vmem>>) attributes {dimension_semantics = [#tpu.dimension_semantics<parallel>], iteration_bounds = array<i64: 2>, scalar_prefetch = 0 : i64, scratch_operands = 0 : i64, tpu.core_type = #tpu.core_type<tc>, window_params = [{transform_indices = @transform_0, window_bounds = array<i64: 1, 8, 32>}, {transform_indices = @transform_1, window_bounds = array<i64: 1, 4, 8, 128>}, {pipeline_mode = #tpu.pipeline_mode<synchronous>, transform_indices = @transform_2, window_bounds = array<i64: 4, 128, 8>}, {pipeline_mode = #tpu.pipeline_mode<synchronous>, transform_indices = @transform_3, window_bounds = array<i64: 1, 32>}, {pipeline_mode = #tpu.pipeline_mode<synchronous>, transform_indices = @transform_4, window_bounds = array<i64: 2, 32>}, {pipeline_mode = #tpu.pipeline_mode<synchronous>, transform_indices = @transform_5, window_bounds = array<i64: 4, 8, 8>}, {pipeline_mode = #tpu.pipeline_mode<synchronous>, transform_indices = @transform_6, window_bounds = array<i64: 2, 32, 128>}, {pipeline_mode = #tpu.pipeline_mode<synchronous>, transform_indices = @transform_7, window_bounds = array<i64: 2, 1, 128>}, {pipeline_mode = #tpu.pipeline_mode<synchronous>, transform_indices = @transform_8, window_bounds = array<i64: 2, 1, 4>}, {pipeline_mode = #tpu.pipeline_mode<synchronous>, transform_indices = @transform_9, window_bounds = array<i64: 2, 32, 32>}, {pipeline_mode = #tpu.pipeline_mode<synchronous>, transform_indices = @transform_10, window_bounds = array<i64: 2, 1, 32>}, {pipeline_mode = #tpu.pipeline_mode<synchronous>, transform_indices = @transform_11, window_bounds = array<i64: 2, 2, 32>}, {pipeline_mode = #tpu.pipeline_mode<synchronous>, transform_indices = @transform_12, window_bounds = array<i64: 2, 32, 72>}, {pipeline_mode = #tpu.pipeline_mode<synchronous>, transform_indices = @transform_13, window_bounds = array<i64: 2, 1, 72>}, {pipeline_mode = #tpu.pipeline_mode<synchronous>, transform_indices = @transform_14, window_bounds = array<i64: 2, 72, 32>}, {pipeline_mode = #tpu.pipeline_mode<synchronous>, transform_indices = @transform_15, window_bounds = array<i64: 2, 1, 32>}, {pipeline_mode = #tpu.pipeline_mode<synchronous>, transform_indices = @transform_16, window_bounds = array<i64: 2, 2, 32>}, {transform_indices = @transform_17, window_bounds = array<i64: 1, 8, 32>}]} {
    %c0 = arith.constant 0 : index
    %c0_0 = arith.constant 0 : index
    %c0_1 = arith.constant 0 : index
    %0 = vector.load %arg1[%c0, %c0_0, %c0_1] : memref<1x8x32xf32, #tpu.memory_space<vmem>>, vector<1x8x32xf32>
    %1 = vector.shape_cast %0 : vector<1x8x32xf32> to vector<8x32xf32>
    %c0_2 = arith.constant 0 : index
    %c0_3 = arith.constant 0 : index
    %c0_4 = arith.constant 0 : index
    %c0_5 = arith.constant 0 : index
    %2 = vector.load %arg2[%c0_2, %c0_3, %c0_4, %c0_5] : memref<1x4x8x128xf32, #tpu.memory_space<vmem>>, vector<1x4x8x128xf32>
    %3 = vector.shape_cast %2 : vector<1x4x8x128xf32> to vector<4x8x128xf32>
    %4 = vector.extract_strided_slice %3 {offsets = [0, 0, 0], sizes = [1, 8, 128], strides = [1, 1, 1]} : vector<4x8x128xf32> to vector<1x8x128xf32>
    %5 = vector.shape_cast %4 : vector<1x8x128xf32> to vector<8x128xf32>
    %c0_6 = arith.constant 0 : index
    %c0_7 = arith.constant 0 : index
    %c0_8 = arith.constant 0 : index
    %6 = vector.load %arg3[%c0_6, %c0_7, %c0_8] : memref<4x128x8xf32, #tpu.memory_space<vmem>>, vector<1x128x8xf32>
    %7 = vector.shape_cast %6 : vector<1x128x8xf32> to vector<128x8xf32>
    %cst = arith.constant dense<0.000000e+00> : vector<8x8xf32>
    %8 = tpu.matmul %5, %7, %cst {dimension_numbers = #tpu.dot_dimension_numbers<[1], [0], [0], [1], [0, 0, 1, 1], [], []>} : vector<8x128xf32>, vector<128x8xf32>, vector<8x8xf32> -> vector<8x8xf32>
    %9 = vector.extract_strided_slice %3 {offsets = [1, 0, 0], sizes = [1, 8, 128], strides = [1, 1, 1]} : vector<4x8x128xf32> to vector<1x8x128xf32>
    %10 = vector.shape_cast %9 : vector<1x8x128xf32> to vector<8x128xf32>
    %c1 = arith.constant 1 : index
    %c0_9 = arith.constant 0 : index
    %c0_10 = arith.constant 0 : index
    %11 = vector.load %arg3[%c1, %c0_9, %c0_10] : memref<4x128x8xf32, #tpu.memory_space<vmem>>, vector<1x128x8xf32>
    %12 = vector.shape_cast %11 : vector<1x128x8xf32> to vector<128x8xf32>
    %cst_11 = arith.constant dense<0.000000e+00> : vector<8x8xf32>
    %13 = tpu.matmul %10, %12, %cst_11 {dimension_numbers = #tpu.dot_dimension_numbers<[1], [0], [0], [1], [0, 0, 1, 1], [], []>} : vector<8x128xf32>, vector<128x8xf32>, vector<8x8xf32> -> vector<8x8xf32>
    %14 = vector.extract_strided_slice %3 {offsets = [2, 0, 0], sizes = [1, 8, 128], strides = [1, 1, 1]} : vector<4x8x128xf32> to vector<1x8x128xf32>
    %15 = vector.shape_cast %14 : vector<1x8x128xf32> to vector<8x128xf32>
    %c2 = arith.constant 2 : index
    %c0_12 = arith.constant 0 : index
    %c0_13 = arith.constant 0 : index
    %16 = vector.load %arg3[%c2, %c0_12, %c0_13] : memref<4x128x8xf32, #tpu.memory_space<vmem>>, vector<1x128x8xf32>
    %17 = vector.shape_cast %16 : vector<1x128x8xf32> to vector<128x8xf32>
    %cst_14 = arith.constant dense<0.000000e+00> : vector<8x8xf32>
    %18 = tpu.matmul %15, %17, %cst_14 {dimension_numbers = #tpu.dot_dimension_numbers<[1], [0], [0], [1], [0, 0, 1, 1], [], []>} : vector<8x128xf32>, vector<128x8xf32>, vector<8x8xf32> -> vector<8x8xf32>
    %19 = vector.extract_strided_slice %3 {offsets = [3, 0, 0], sizes = [1, 8, 128], strides = [1, 1, 1]} : vector<4x8x128xf32> to vector<1x8x128xf32>
    %20 = vector.shape_cast %19 : vector<1x8x128xf32> to vector<8x128xf32>
    %c3 = arith.constant 3 : index
    %c0_15 = arith.constant 0 : index
    %c0_16 = arith.constant 0 : index
    %21 = vector.load %arg3[%c3, %c0_15, %c0_16] : memref<4x128x8xf32, #tpu.memory_space<vmem>>, vector<1x128x8xf32>
    %22 = vector.shape_cast %21 : vector<1x128x8xf32> to vector<128x8xf32>
    %cst_17 = arith.constant dense<0.000000e+00> : vector<8x8xf32>
    %23 = tpu.matmul %20, %22, %cst_17 {dimension_numbers = #tpu.dot_dimension_numbers<[1], [0], [0], [1], [0, 0, 1, 1], [], []>} : vector<8x128xf32>, vector<128x8xf32>, vector<8x8xf32> -> vector<8x8xf32>
    %24 = tpu.concatenate %8, %13, %18, %23 in 1 : vector<8x8xf32>, vector<8x8xf32>, vector<8x8xf32>, vector<8x8xf32> -> vector<8x32xf32>
    %c0_18 = arith.constant 0 : index
    %c0_19 = arith.constant 0 : index
    %25 = vector.load %arg4[%c0_18, %c0_19] : memref<1x32xf32, #tpu.memory_space<vmem>>, vector<1x32xf32>
    %26 = vector.broadcast %25 : vector<1x32xf32> to vector<8x32xf32>
    %27 = arith.addf %24, %26 : vector<8x32xf32>
    %cst_20 = arith.constant 5.000000e-01 : f32
    %28 = vector.broadcast %cst_20 : f32 to vector<8x32xf32>
    %29 = arith.mulf %28, %27 : vector<8x32xf32>
    %cst_21 = arith.constant 0.707106769 : f32
    %30 = vector.broadcast %cst_21 : f32 to vector<8x32xf32>
    %31 = arith.mulf %27, %30 : vector<8x32xf32>
    %32 = math.absf %31 : vector<8x32xf32>
    %cst_22 = arith.constant 0.327591091 : f32
    %33 = vector.broadcast %cst_22 : f32 to vector<8x32xf32>
    %34 = arith.mulf %33, %32 : vector<8x32xf32>
    %cst_23 = arith.constant 1.000000e+00 : f32
    %35 = vector.broadcast %cst_23 : f32 to vector<8x32xf32>
    %36 = arith.addf %35, %34 : vector<8x32xf32>
    %cst_24 = arith.constant 1.000000e+00 : f32
    %37 = vector.broadcast %cst_24 : f32 to vector<8x32xf32>
    %38 = arith.divf %37, %36 : vector<8x32xf32>
    %cst_25 = arith.constant 1.06140542 : f32
    %39 = vector.broadcast %cst_25 : f32 to vector<8x32xf32>
    %40 = arith.mulf %39, %38 : vector<8x32xf32>
    %cst_26 = arith.constant 1.45315206 : f32
    %41 = vector.broadcast %cst_26 : f32 to vector<8x32xf32>
    %42 = arith.subf %40, %41 : vector<8x32xf32>
    %43 = arith.mulf %42, %38 : vector<8x32xf32>
    %cst_27 = arith.constant 1.42141378 : f32
    %44 = vector.broadcast %cst_27 : f32 to vector<8x32xf32>
    %45 = arith.addf %43, %44 : vector<8x32xf32>
    %46 = arith.mulf %45, %38 : vector<8x32xf32>
    %cst_28 = arith.constant 0.284496725 : f32
    %47 = vector.broadcast %cst_28 : f32 to vector<8x32xf32>
    %48 = arith.subf %46, %47 : vector<8x32xf32>
    %49 = arith.mulf %48, %38 : vector<8x32xf32>
    %cst_29 = arith.constant 0.254829586 : f32
    %50 = vector.broadcast %cst_29 : f32 to vector<8x32xf32>
    %51 = arith.addf %49, %50 : vector<8x32xf32>
    %52 = arith.mulf %51, %38 : vector<8x32xf32>
    %cst_30 = arith.constant 0.000000e+00 : f32
    %53 = vector.broadcast %cst_30 : f32 to vector<8x32xf32>
    %54 = arith.subf %53, %31 : vector<8x32xf32>
    %55 = arith.mulf %54, %31 : vector<8x32xf32>
    %56 = math.exp %55 : vector<8x32xf32>
    %57 = arith.mulf %52, %56 : vector<8x32xf32>
    %cst_31 = arith.constant 1.000000e+00 : f32
    %58 = vector.broadcast %cst_31 : f32 to vector<8x32xf32>
    %59 = arith.subf %58, %57 : vector<8x32xf32>
    %cst_32 = arith.constant 0.000000e+00 : f32
    %60 = vector.broadcast %cst_32 : f32 to vector<8x32xf32>
    %61 = arith.cmpf oge, %31, %60 : vector<8x32xf32>
    %cst_33 = arith.constant 0.000000e+00 : f32
    %62 = vector.broadcast %cst_33 : f32 to vector<8x32xf32>
    %63 = arith.subf %62, %59 : vector<8x32xf32>
    %64 = arith.select %61, %59, %63 : vector<8x32xi1>, vector<8x32xf32>
    %cst_34 = arith.constant 1.000000e+00 : f32
    %65 = vector.broadcast %cst_34 : f32 to vector<8x32xf32>
    %66 = arith.addf %65, %64 : vector<8x32xf32>
    %67 = arith.mulf %29, %66 : vector<8x32xf32>
    %68 = arith.addf %1, %67 : vector<8x32xf32>
    %c0_35 = arith.constant 0 : index
    %c0_36 = arith.constant 0 : index
    %69 = vector.load %arg5[%c0_35, %c0_36] : memref<2x32xf32, #tpu.memory_space<vmem>>, vector<2x32xf32>
    %cst_37 = arith.constant dense<0.000000e+00> : vector<8xf32>
    %70 = vector.multi_reduction <add>, %68, %cst_37 [1] : vector<8x32xf32> to vector<8xf32>
    %71 = vector.shape_cast %70 : vector<8xf32> to vector<8x1xf32>
    %cst_38 = arith.constant 3.200000e+01 : f32
    %72 = vector.broadcast %cst_38 : f32 to vector<8x1xf32>
    %73 = arith.divf %71, %72 : vector<8x1xf32>
    %74 = vector.broadcast %73 : vector<8x1xf32> to vector<8x32xf32>
    %75 = arith.subf %68, %74 : vector<8x32xf32>
    %76 = arith.mulf %75, %75 : vector<8x32xf32>
    %cst_39 = arith.constant dense<0.000000e+00> : vector<8xf32>
    %77 = vector.multi_reduction <add>, %76, %cst_39 [1] : vector<8x32xf32> to vector<8xf32>
    %78 = vector.shape_cast %77 : vector<8xf32> to vector<8x1xf32>
    %cst_40 = arith.constant 3.200000e+01 : f32
    %79 = vector.broadcast %cst_40 : f32 to vector<8x1xf32>
    %80 = arith.divf %78, %79 : vector<8x1xf32>
    %81 = vector.broadcast %73 : vector<8x1xf32> to vector<8x32xf32>
    %82 = arith.subf %68, %81 : vector<8x32xf32>
    %cst_41 = arith.constant 9.99999974E-6 : f32
    %83 = vector.broadcast %cst_41 : f32 to vector<8x1xf32>
    %84 = arith.addf %80, %83 : vector<8x1xf32>
    %85 = math.rsqrt %84 : vector<8x1xf32>
    %86 = vector.broadcast %85 : vector<8x1xf32> to vector<8x32xf32>
    %87 = arith.mulf %82, %86 : vector<8x32xf32>
    %88 = vector.extract_strided_slice %69 {offsets = [0, 0], sizes = [1, 32], strides = [1, 1]} : vector<2x32xf32> to vector<1x32xf32>
    %89 = vector.broadcast %88 : vector<1x32xf32> to vector<8x32xf32>
    %90 = arith.mulf %87, %89 : vector<8x32xf32>
    %91 = vector.extract_strided_slice %69 {offsets = [1, 0], sizes = [1, 32], strides = [1, 1]} : vector<2x32xf32> to vector<1x32xf32>
    %92 = vector.broadcast %91 : vector<1x32xf32> to vector<8x32xf32>
    %93 = arith.addf %90, %92 : vector<8x32xf32>
    %c0_42 = arith.constant 0 : index
    %c0_43 = arith.constant 0 : index
    %c0_44 = arith.constant 0 : index
    %94 = vector.load %arg6[%c0_42, %c0_43, %c0_44] : memref<4x8x8xf32, #tpu.memory_space<vmem>>, vector<4x8x8xf32>
    %c0_45 = arith.constant 0 : index
    %c0_46 = arith.constant 0 : index
    %c0_47 = arith.constant 0 : index
    %95 = vector.load %arg7[%c0_45, %c0_46, %c0_47] : memref<2x32x128xf32, #tpu.memory_space<vmem>>, vector<1x32x128xf32>
    %96 = vector.shape_cast %95 : vector<1x32x128xf32> to vector<32x128xf32>
    %cst_48 = arith.constant dense<0.000000e+00> : vector<8x128xf32>
    %97 = tpu.matmul %93, %96, %cst_48 {dimension_numbers = #tpu.dot_dimension_numbers<[1], [0], [0], [1], [0, 0, 1, 1], [], []>} : vector<8x32xf32>, vector<32x128xf32>, vector<8x128xf32> -> vector<8x128xf32>
    %c0_49 = arith.constant 0 : index
    %c0_50 = arith.constant 0 : index
    %c0_51 = arith.constant 0 : index
    %98 = vector.load %arg8[%c0_49, %c0_50, %c0_51] : memref<2x1x128xf32, #tpu.memory_space<vmem>>, vector<1x1x128xf32>
    %99 = vector.shape_cast %98 : vector<1x1x128xf32> to vector<1x128xf32>
    %100 = vector.broadcast %99 : vector<1x128xf32> to vector<8x128xf32>
    %101 = arith.addf %97, %100 : vector<8x128xf32>
    %102 = vector.extract_strided_slice %101 {offsets = [0, 0], sizes = [8, 32], strides = [1, 1]} : vector<8x128xf32> to vector<8x32xf32>
    %103 = vector.extract_strided_slice %101 {offsets = [0, 32], sizes = [8, 32], strides = [1, 1]} : vector<8x128xf32> to vector<8x32xf32>
    %104 = vector.extract_strided_slice %101 {offsets = [0, 64], sizes = [8, 32], strides = [1, 1]} : vector<8x128xf32> to vector<8x32xf32>
    %105 = vector.extract_strided_slice %101 {offsets = [0, 96], sizes = [8, 32], strides = [1, 1]} : vector<8x128xf32> to vector<8x32xf32>
    %c0_52 = arith.constant 0 : index
    %c0_53 = arith.constant 0 : index
    %c0_54 = arith.constant 0 : index
    %106 = vector.load %arg9[%c0_52, %c0_53, %c0_54] : memref<2x1x4xf32, #tpu.memory_space<vmem>>, vector<1x1x4xf32>
    %107 = vector.shape_cast %106 : vector<1x1x4xf32> to vector<1x4xf32>
    %108 = vector.extract_strided_slice %102 {offsets = [0, 0], sizes = [8, 8], strides = [1, 1]} : vector<8x32xf32> to vector<8x8xf32>
    %cst_55 = arith.constant 0.353553385 : f32
    %109 = vector.broadcast %cst_55 : f32 to vector<8x8xf32>
    %110 = arith.mulf %108, %109 : vector<8x8xf32>
    %111 = vector.extract_strided_slice %103 {offsets = [0, 0], sizes = [8, 8], strides = [1, 1]} : vector<8x32xf32> to vector<8x8xf32>
    %112 = vector.extract_strided_slice %104 {offsets = [0, 0], sizes = [8, 8], strides = [1, 1]} : vector<8x32xf32> to vector<8x8xf32>
    %cst_56 = arith.constant dense<0.000000e+00> : vector<8x8xf32>
    %113 = tpu.matmul %110, %111, %cst_56 {dimension_numbers = #tpu.dot_dimension_numbers<[1], [1], [0], [0], [0, 0, 1, 0], [], []>} : vector<8x8xf32>, vector<8x8xf32>, vector<8x8xf32> -> vector<8x8xf32>
    %114 = vector.extract_strided_slice %105 {offsets = [0, 0], sizes = [8, 8], strides = [1, 1]} : vector<8x32xf32> to vector<8x8xf32>
    %115 = vector.extract_strided_slice %114 {offsets = [0, 0], sizes = [8, 4], strides = [1, 1]} : vector<8x8xf32> to vector<8x4xf32>
    %cst_57 = arith.constant dense<0.000000e+00> : vector<8xf32>
    %116 = vector.multi_reduction <add>, %115, %cst_57 [1] : vector<8x4xf32> to vector<8xf32>
    %117 = vector.shape_cast %116 : vector<8xf32> to vector<8x1xf32>
    %118 = arith.negf %117 : vector<8x1xf32>
    %119 = math.exp %118 : vector<8x1xf32>
    %cst_58 = arith.constant 1.000000e+00 : f32
    %120 = vector.broadcast %cst_58 : f32 to vector<8x1xf32>
    %121 = arith.addf %120, %119 : vector<8x1xf32>
    %122 = arith.divf %120, %121 : vector<8x1xf32>
    %123 = vector.extract_strided_slice %114 {offsets = [0, 4], sizes = [8, 4], strides = [1, 1]} : vector<8x8xf32> to vector<8x4xf32>
    %cst_59 = arith.constant dense<0.000000e+00> : vector<8xf32>
    %124 = vector.multi_reduction <add>, %123, %cst_59 [1] : vector<8x4xf32> to vector<8xf32>
    %125 = vector.shape_cast %124 : vector<8xf32> to vector<8x1xf32>
    %126 = arith.negf %125 : vector<8x1xf32>
    %127 = math.exp %126 : vector<8x1xf32>
    %cst_60 = arith.constant 1.000000e+00 : f32
    %128 = vector.broadcast %cst_60 : f32 to vector<8x1xf32>
    %129 = arith.addf %128, %127 : vector<8x1xf32>
    %130 = arith.divf %128, %129 : vector<8x1xf32>
    %131 = vector.extract_strided_slice %107 {offsets = [0, 0], sizes = [1, 1], strides = [1, 1]} : vector<1x4xf32> to vector<1x1xf32>
    %132 = vector.broadcast %131 : vector<1x1xf32> to vector<8x1xf32>
    %133 = arith.mulf %130, %132 : vector<8x1xf32>
    %cst_61 = arith.constant 1.000000e+00 : f32
    %134 = vector.broadcast %cst_61 : f32 to vector<8x1xf32>
    %135 = arith.subf %133, %134 : vector<8x1xf32>
    %136 = arith.mulf %122, %135 : vector<8x1xf32>
    %cst_62 = arith.constant 2.000000e+00 : f32
    %137 = vector.broadcast %cst_62 : f32 to vector<8x1xf32>
    %138 = arith.addf %136, %137 : vector<8x1xf32>
    %139 = vector.extract_strided_slice %94 {offsets = [0, 0, 0], sizes = [1, 8, 8], strides = [1, 1, 1]} : vector<4x8x8xf32> to vector<1x8x8xf32>
    %140 = vector.shape_cast %139 : vector<1x8x8xf32> to vector<8x8xf32>
    %141 = vector.broadcast %138 : vector<8x1xf32> to vector<8x8xf32>
    %142 = arith.mulf %141, %140 : vector<8x8xf32>
    %143 = arith.addf %113, %142 : vector<8x8xf32>
    %cst_63 = arith.constant dense<0xFF800000> : vector<8xf32>
    %144 = vector.multi_reduction <maximumf>, %143, %cst_63 [1] : vector<8x8xf32> to vector<8xf32>
    %145 = vector.shape_cast %144 : vector<8xf32> to vector<8x1xf32>
    %146 = vector.broadcast %145 : vector<8x1xf32> to vector<8x8xf32>
    %147 = arith.subf %143, %146 : vector<8x8xf32>
    %148 = math.exp %147 : vector<8x8xf32>
    %cst_64 = arith.constant dense<0.000000e+00> : vector<8xf32>
    %149 = vector.multi_reduction <add>, %148, %cst_64 [1] : vector<8x8xf32> to vector<8xf32>
    %150 = vector.shape_cast %149 : vector<8xf32> to vector<8x1xf32>
    %151 = tpu.reciprocal %150 {approx = true} : vector<8x1xf32> -> vector<8x1xf32>
    %152 = vector.broadcast %151 : vector<8x1xf32> to vector<8x8xf32>
    %153 = arith.mulf %148, %152 : vector<8x8xf32>
    %cst_65 = arith.constant dense<0.000000e+00> : vector<8x8xf32>
    %154 = tpu.matmul %153, %112, %cst_65 {dimension_numbers = #tpu.dot_dimension_numbers<[1], [0], [0], [1], [0, 0, 1, 1], [], []>} : vector<8x8xf32>, vector<8x8xf32>, vector<8x8xf32> -> vector<8x8xf32>
    %155 = vector.extract_strided_slice %102 {offsets = [0, 8], sizes = [8, 8], strides = [1, 1]} : vector<8x32xf32> to vector<8x8xf32>
    %cst_66 = arith.constant 0.353553385 : f32
    %156 = vector.broadcast %cst_66 : f32 to vector<8x8xf32>
    %157 = arith.mulf %155, %156 : vector<8x8xf32>
    %158 = vector.extract_strided_slice %103 {offsets = [0, 8], sizes = [8, 8], strides = [1, 1]} : vector<8x32xf32> to vector<8x8xf32>
    %159 = vector.extract_strided_slice %104 {offsets = [0, 8], sizes = [8, 8], strides = [1, 1]} : vector<8x32xf32> to vector<8x8xf32>
    %cst_67 = arith.constant dense<0.000000e+00> : vector<8x8xf32>
    %160 = tpu.matmul %157, %158, %cst_67 {dimension_numbers = #tpu.dot_dimension_numbers<[1], [1], [0], [0], [0, 0, 1, 0], [], []>} : vector<8x8xf32>, vector<8x8xf32>, vector<8x8xf32> -> vector<8x8xf32>
    %161 = vector.extract_strided_slice %105 {offsets = [0, 8], sizes = [8, 8], strides = [1, 1]} : vector<8x32xf32> to vector<8x8xf32>
    %162 = vector.extract_strided_slice %161 {offsets = [0, 0], sizes = [8, 4], strides = [1, 1]} : vector<8x8xf32> to vector<8x4xf32>
    %cst_68 = arith.constant dense<0.000000e+00> : vector<8xf32>
    %163 = vector.multi_reduction <add>, %162, %cst_68 [1] : vector<8x4xf32> to vector<8xf32>
    %164 = vector.shape_cast %163 : vector<8xf32> to vector<8x1xf32>
    %165 = arith.negf %164 : vector<8x1xf32>
    %166 = math.exp %165 : vector<8x1xf32>
    %cst_69 = arith.constant 1.000000e+00 : f32
    %167 = vector.broadcast %cst_69 : f32 to vector<8x1xf32>
    %168 = arith.addf %167, %166 : vector<8x1xf32>
    %169 = arith.divf %167, %168 : vector<8x1xf32>
    %170 = vector.extract_strided_slice %161 {offsets = [0, 4], sizes = [8, 4], strides = [1, 1]} : vector<8x8xf32> to vector<8x4xf32>
    %cst_70 = arith.constant dense<0.000000e+00> : vector<8xf32>
    %171 = vector.multi_reduction <add>, %170, %cst_70 [1] : vector<8x4xf32> to vector<8xf32>
    %172 = vector.shape_cast %171 : vector<8xf32> to vector<8x1xf32>
    %173 = arith.negf %172 : vector<8x1xf32>
    %174 = math.exp %173 : vector<8x1xf32>
    %cst_71 = arith.constant 1.000000e+00 : f32
    %175 = vector.broadcast %cst_71 : f32 to vector<8x1xf32>
    %176 = arith.addf %175, %174 : vector<8x1xf32>
    %177 = arith.divf %175, %176 : vector<8x1xf32>
    %178 = vector.extract_strided_slice %107 {offsets = [0, 1], sizes = [1, 1], strides = [1, 1]} : vector<1x4xf32> to vector<1x1xf32>
    %179 = vector.broadcast %178 : vector<1x1xf32> to vector<8x1xf32>
    %180 = arith.mulf %177, %179 : vector<8x1xf32>
    %cst_72 = arith.constant 1.000000e+00 : f32
    %181 = vector.broadcast %cst_72 : f32 to vector<8x1xf32>
    %182 = arith.subf %180, %181 : vector<8x1xf32>
    %183 = arith.mulf %169, %182 : vector<8x1xf32>
    %cst_73 = arith.constant 2.000000e+00 : f32
    %184 = vector.broadcast %cst_73 : f32 to vector<8x1xf32>
    %185 = arith.addf %183, %184 : vector<8x1xf32>
    %186 = vector.extract_strided_slice %94 {offsets = [1, 0, 0], sizes = [1, 8, 8], strides = [1, 1, 1]} : vector<4x8x8xf32> to vector<1x8x8xf32>
    %187 = vector.shape_cast %186 : vector<1x8x8xf32> to vector<8x8xf32>
    %188 = vector.broadcast %185 : vector<8x1xf32> to vector<8x8xf32>
    %189 = arith.mulf %188, %187 : vector<8x8xf32>
    %190 = arith.addf %160, %189 : vector<8x8xf32>
    %cst_74 = arith.constant dense<0xFF800000> : vector<8xf32>
    %191 = vector.multi_reduction <maximumf>, %190, %cst_74 [1] : vector<8x8xf32> to vector<8xf32>
    %192 = vector.shape_cast %191 : vector<8xf32> to vector<8x1xf32>
    %193 = vector.broadcast %192 : vector<8x1xf32> to vector<8x8xf32>
    %194 = arith.subf %190, %193 : vector<8x8xf32>
    %195 = math.exp %194 : vector<8x8xf32>
    %cst_75 = arith.constant dense<0.000000e+00> : vector<8xf32>
    %196 = vector.multi_reduction <add>, %195, %cst_75 [1] : vector<8x8xf32> to vector<8xf32>
    %197 = vector.shape_cast %196 : vector<8xf32> to vector<8x1xf32>
    %198 = tpu.reciprocal %197 {approx = true} : vector<8x1xf32> -> vector<8x1xf32>
    %199 = vector.broadcast %198 : vector<8x1xf32> to vector<8x8xf32>
    %200 = arith.mulf %195, %199 : vector<8x8xf32>
    %cst_76 = arith.constant dense<0.000000e+00> : vector<8x8xf32>
    %201 = tpu.matmul %200, %159, %cst_76 {dimension_numbers = #tpu.dot_dimension_numbers<[1], [0], [0], [1], [0, 0, 1, 1], [], []>} : vector<8x8xf32>, vector<8x8xf32>, vector<8x8xf32> -> vector<8x8xf32>
    %202 = vector.extract_strided_slice %102 {offsets = [0, 16], sizes = [8, 8], strides = [1, 1]} : vector<8x32xf32> to vector<8x8xf32>
    %cst_77 = arith.constant 0.353553385 : f32
    %203 = vector.broadcast %cst_77 : f32 to vector<8x8xf32>
    %204 = arith.mulf %202, %203 : vector<8x8xf32>
    %205 = vector.extract_strided_slice %103 {offsets = [0, 16], sizes = [8, 8], strides = [1, 1]} : vector<8x32xf32> to vector<8x8xf32>
    %206 = vector.extract_strided_slice %104 {offsets = [0, 16], sizes = [8, 8], strides = [1, 1]} : vector<8x32xf32> to vector<8x8xf32>
    %cst_78 = arith.constant dense<0.000000e+00> : vector<8x8xf32>
    %207 = tpu.matmul %204, %205, %cst_78 {dimension_numbers = #tpu.dot_dimension_numbers<[1], [1], [0], [0], [0, 0, 1, 0], [], []>} : vector<8x8xf32>, vector<8x8xf32>, vector<8x8xf32> -> vector<8x8xf32>
    %208 = vector.extract_strided_slice %105 {offsets = [0, 16], sizes = [8, 8], strides = [1, 1]} : vector<8x32xf32> to vector<8x8xf32>
    %209 = vector.extract_strided_slice %208 {offsets = [0, 0], sizes = [8, 4], strides = [1, 1]} : vector<8x8xf32> to vector<8x4xf32>
    %cst_79 = arith.constant dense<0.000000e+00> : vector<8xf32>
    %210 = vector.multi_reduction <add>, %209, %cst_79 [1] : vector<8x4xf32> to vector<8xf32>
    %211 = vector.shape_cast %210 : vector<8xf32> to vector<8x1xf32>
    %212 = arith.negf %211 : vector<8x1xf32>
    %213 = math.exp %212 : vector<8x1xf32>
    %cst_80 = arith.constant 1.000000e+00 : f32
    %214 = vector.broadcast %cst_80 : f32 to vector<8x1xf32>
    %215 = arith.addf %214, %213 : vector<8x1xf32>
    %216 = arith.divf %214, %215 : vector<8x1xf32>
    %217 = vector.extract_strided_slice %208 {offsets = [0, 4], sizes = [8, 4], strides = [1, 1]} : vector<8x8xf32> to vector<8x4xf32>
    %cst_81 = arith.constant dense<0.000000e+00> : vector<8xf32>
    %218 = vector.multi_reduction <add>, %217, %cst_81 [1] : vector<8x4xf32> to vector<8xf32>
    %219 = vector.shape_cast %218 : vector<8xf32> to vector<8x1xf32>
    %220 = arith.negf %219 : vector<8x1xf32>
    %221 = math.exp %220 : vector<8x1xf32>
    %cst_82 = arith.constant 1.000000e+00 : f32
    %222 = vector.broadcast %cst_82 : f32 to vector<8x1xf32>
    %223 = arith.addf %222, %221 : vector<8x1xf32>
    %224 = arith.divf %222, %223 : vector<8x1xf32>
    %225 = vector.extract_strided_slice %107 {offsets = [0, 2], sizes = [1, 1], strides = [1, 1]} : vector<1x4xf32> to vector<1x1xf32>
    %226 = vector.broadcast %225 : vector<1x1xf32> to vector<8x1xf32>
    %227 = arith.mulf %224, %226 : vector<8x1xf32>
    %cst_83 = arith.constant 1.000000e+00 : f32
    %228 = vector.broadcast %cst_83 : f32 to vector<8x1xf32>
    %229 = arith.subf %227, %228 : vector<8x1xf32>
    %230 = arith.mulf %216, %229 : vector<8x1xf32>
    %cst_84 = arith.constant 2.000000e+00 : f32
    %231 = vector.broadcast %cst_84 : f32 to vector<8x1xf32>
    %232 = arith.addf %230, %231 : vector<8x1xf32>
    %233 = vector.extract_strided_slice %94 {offsets = [2, 0, 0], sizes = [1, 8, 8], strides = [1, 1, 1]} : vector<4x8x8xf32> to vector<1x8x8xf32>
    %234 = vector.shape_cast %233 : vector<1x8x8xf32> to vector<8x8xf32>
    %235 = vector.broadcast %232 : vector<8x1xf32> to vector<8x8xf32>
    %236 = arith.mulf %235, %234 : vector<8x8xf32>
    %237 = arith.addf %207, %236 : vector<8x8xf32>
    %cst_85 = arith.constant dense<0xFF800000> : vector<8xf32>
    %238 = vector.multi_reduction <maximumf>, %237, %cst_85 [1] : vector<8x8xf32> to vector<8xf32>
    %239 = vector.shape_cast %238 : vector<8xf32> to vector<8x1xf32>
    %240 = vector.broadcast %239 : vector<8x1xf32> to vector<8x8xf32>
    %241 = arith.subf %237, %240 : vector<8x8xf32>
    %242 = math.exp %241 : vector<8x8xf32>
    %cst_86 = arith.constant dense<0.000000e+00> : vector<8xf32>
    %243 = vector.multi_reduction <add>, %242, %cst_86 [1] : vector<8x8xf32> to vector<8xf32>
    %244 = vector.shape_cast %243 : vector<8xf32> to vector<8x1xf32>
    %245 = tpu.reciprocal %244 {approx = true} : vector<8x1xf32> -> vector<8x1xf32>
    %246 = vector.broadcast %245 : vector<8x1xf32> to vector<8x8xf32>
    %247 = arith.mulf %242, %246 : vector<8x8xf32>
    %cst_87 = arith.constant dense<0.000000e+00> : vector<8x8xf32>
    %248 = tpu.matmul %247, %206, %cst_87 {dimension_numbers = #tpu.dot_dimension_numbers<[1], [0], [0], [1], [0, 0, 1, 1], [], []>} : vector<8x8xf32>, vector<8x8xf32>, vector<8x8xf32> -> vector<8x8xf32>
    %249 = vector.extract_strided_slice %102 {offsets = [0, 24], sizes = [8, 8], strides = [1, 1]} : vector<8x32xf32> to vector<8x8xf32>
    %cst_88 = arith.constant 0.353553385 : f32
    %250 = vector.broadcast %cst_88 : f32 to vector<8x8xf32>
    %251 = arith.mulf %249, %250 : vector<8x8xf32>
    %252 = vector.extract_strided_slice %103 {offsets = [0, 24], sizes = [8, 8], strides = [1, 1]} : vector<8x32xf32> to vector<8x8xf32>
    %253 = vector.extract_strided_slice %104 {offsets = [0, 24], sizes = [8, 8], strides = [1, 1]} : vector<8x32xf32> to vector<8x8xf32>
    %cst_89 = arith.constant dense<0.000000e+00> : vector<8x8xf32>
    %254 = tpu.matmul %251, %252, %cst_89 {dimension_numbers = #tpu.dot_dimension_numbers<[1], [1], [0], [0], [0, 0, 1, 0], [], []>} : vector<8x8xf32>, vector<8x8xf32>, vector<8x8xf32> -> vector<8x8xf32>
    %255 = vector.extract_strided_slice %105 {offsets = [0, 24], sizes = [8, 8], strides = [1, 1]} : vector<8x32xf32> to vector<8x8xf32>
    %256 = vector.extract_strided_slice %255 {offsets = [0, 0], sizes = [8, 4], strides = [1, 1]} : vector<8x8xf32> to vector<8x4xf32>
    %cst_90 = arith.constant dense<0.000000e+00> : vector<8xf32>
    %257 = vector.multi_reduction <add>, %256, %cst_90 [1] : vector<8x4xf32> to vector<8xf32>
    %258 = vector.shape_cast %257 : vector<8xf32> to vector<8x1xf32>
    %259 = arith.negf %258 : vector<8x1xf32>
    %260 = math.exp %259 : vector<8x1xf32>
    %cst_91 = arith.constant 1.000000e+00 : f32
    %261 = vector.broadcast %cst_91 : f32 to vector<8x1xf32>
    %262 = arith.addf %261, %260 : vector<8x1xf32>
    %263 = arith.divf %261, %262 : vector<8x1xf32>
    %264 = vector.extract_strided_slice %255 {offsets = [0, 4], sizes = [8, 4], strides = [1, 1]} : vector<8x8xf32> to vector<8x4xf32>
    %cst_92 = arith.constant dense<0.000000e+00> : vector<8xf32>
    %265 = vector.multi_reduction <add>, %264, %cst_92 [1] : vector<8x4xf32> to vector<8xf32>
    %266 = vector.shape_cast %265 : vector<8xf32> to vector<8x1xf32>
    %267 = arith.negf %266 : vector<8x1xf32>
    %268 = math.exp %267 : vector<8x1xf32>
    %cst_93 = arith.constant 1.000000e+00 : f32
    %269 = vector.broadcast %cst_93 : f32 to vector<8x1xf32>
    %270 = arith.addf %269, %268 : vector<8x1xf32>
    %271 = arith.divf %269, %270 : vector<8x1xf32>
    %272 = vector.extract_strided_slice %107 {offsets = [0, 3], sizes = [1, 1], strides = [1, 1]} : vector<1x4xf32> to vector<1x1xf32>
    %273 = vector.broadcast %272 : vector<1x1xf32> to vector<8x1xf32>
    %274 = arith.mulf %271, %273 : vector<8x1xf32>
    %cst_94 = arith.constant 1.000000e+00 : f32
    %275 = vector.broadcast %cst_94 : f32 to vector<8x1xf32>
    %276 = arith.subf %274, %275 : vector<8x1xf32>
    %277 = arith.mulf %263, %276 : vector<8x1xf32>
    %cst_95 = arith.constant 2.000000e+00 : f32
    %278 = vector.broadcast %cst_95 : f32 to vector<8x1xf32>
    %279 = arith.addf %277, %278 : vector<8x1xf32>
    %280 = vector.extract_strided_slice %94 {offsets = [3, 0, 0], sizes = [1, 8, 8], strides = [1, 1, 1]} : vector<4x8x8xf32> to vector<1x8x8xf32>
    %281 = vector.shape_cast %280 : vector<1x8x8xf32> to vector<8x8xf32>
    %282 = vector.broadcast %279 : vector<8x1xf32> to vector<8x8xf32>
    %283 = arith.mulf %282, %281 : vector<8x8xf32>
    %284 = arith.addf %254, %283 : vector<8x8xf32>
    %cst_96 = arith.constant dense<0xFF800000> : vector<8xf32>
    %285 = vector.multi_reduction <maximumf>, %284, %cst_96 [1] : vector<8x8xf32> to vector<8xf32>
    %286 = vector.shape_cast %285 : vector<8xf32> to vector<8x1xf32>
    %287 = vector.broadcast %286 : vector<8x1xf32> to vector<8x8xf32>
    %288 = arith.subf %284, %287 : vector<8x8xf32>
    %289 = math.exp %288 : vector<8x8xf32>
    %cst_97 = arith.constant dense<0.000000e+00> : vector<8xf32>
    %290 = vector.multi_reduction <add>, %289, %cst_97 [1] : vector<8x8xf32> to vector<8xf32>
    %291 = vector.shape_cast %290 : vector<8xf32> to vector<8x1xf32>
    %292 = tpu.reciprocal %291 {approx = true} : vector<8x1xf32> -> vector<8x1xf32>
    %293 = vector.broadcast %292 : vector<8x1xf32> to vector<8x8xf32>
    %294 = arith.mulf %289, %293 : vector<8x8xf32>
    %cst_98 = arith.constant dense<0.000000e+00> : vector<8x8xf32>
    %295 = tpu.matmul %294, %253, %cst_98 {dimension_numbers = #tpu.dot_dimension_numbers<[1], [0], [0], [1], [0, 0, 1, 1], [], []>} : vector<8x8xf32>, vector<8x8xf32>, vector<8x8xf32> -> vector<8x8xf32>
    %296 = tpu.concatenate %154, %201, %248, %295 in 1 : vector<8x8xf32>, vector<8x8xf32>, vector<8x8xf32>, vector<8x8xf32> -> vector<8x32xf32>
    %c0_99 = arith.constant 0 : index
    %c0_100 = arith.constant 0 : index
    %c0_101 = arith.constant 0 : index
    %297 = vector.load %arg10[%c0_99, %c0_100, %c0_101] : memref<2x32x32xf32, #tpu.memory_space<vmem>>, vector<1x32x32xf32>
    %298 = vector.shape_cast %297 : vector<1x32x32xf32> to vector<32x32xf32>
    %cst_102 = arith.constant dense<0.000000e+00> : vector<8x32xf32>
    %299 = tpu.matmul %296, %298, %cst_102 {dimension_numbers = #tpu.dot_dimension_numbers<[1], [0], [0], [1], [0, 0, 1, 1], [], []>} : vector<8x32xf32>, vector<32x32xf32>, vector<8x32xf32> -> vector<8x32xf32>
    %c0_103 = arith.constant 0 : index
    %c0_104 = arith.constant 0 : index
    %c0_105 = arith.constant 0 : index
    %300 = vector.load %arg11[%c0_103, %c0_104, %c0_105] : memref<2x1x32xf32, #tpu.memory_space<vmem>>, vector<1x1x32xf32>
    %301 = vector.shape_cast %300 : vector<1x1x32xf32> to vector<1x32xf32>
    %302 = vector.broadcast %301 : vector<1x32xf32> to vector<8x32xf32>
    %303 = arith.addf %299, %302 : vector<8x32xf32>
    %304 = arith.addf %93, %303 : vector<8x32xf32>
    %c0_106 = arith.constant 0 : index
    %c0_107 = arith.constant 0 : index
    %c0_108 = arith.constant 0 : index
    %305 = vector.load %arg12[%c0_106, %c0_107, %c0_108] : memref<2x2x32xf32, #tpu.memory_space<vmem>>, vector<1x2x32xf32>
    %306 = vector.shape_cast %305 : vector<1x2x32xf32> to vector<2x32xf32>
    %cst_109 = arith.constant dense<0.000000e+00> : vector<8xf32>
    %307 = vector.multi_reduction <add>, %304, %cst_109 [1] : vector<8x32xf32> to vector<8xf32>
    %308 = vector.shape_cast %307 : vector<8xf32> to vector<8x1xf32>
    %cst_110 = arith.constant 3.200000e+01 : f32
    %309 = vector.broadcast %cst_110 : f32 to vector<8x1xf32>
    %310 = arith.divf %308, %309 : vector<8x1xf32>
    %311 = vector.broadcast %310 : vector<8x1xf32> to vector<8x32xf32>
    %312 = arith.subf %304, %311 : vector<8x32xf32>
    %313 = arith.mulf %312, %312 : vector<8x32xf32>
    %cst_111 = arith.constant dense<0.000000e+00> : vector<8xf32>
    %314 = vector.multi_reduction <add>, %313, %cst_111 [1] : vector<8x32xf32> to vector<8xf32>
    %315 = vector.shape_cast %314 : vector<8xf32> to vector<8x1xf32>
    %cst_112 = arith.constant 3.200000e+01 : f32
    %316 = vector.broadcast %cst_112 : f32 to vector<8x1xf32>
    %317 = arith.divf %315, %316 : vector<8x1xf32>
    %318 = vector.broadcast %310 : vector<8x1xf32> to vector<8x32xf32>
    %319 = arith.subf %304, %318 : vector<8x32xf32>
    %cst_113 = arith.constant 9.99999974E-6 : f32
    %320 = vector.broadcast %cst_113 : f32 to vector<8x1xf32>
    %321 = arith.addf %317, %320 : vector<8x1xf32>
    %322 = math.rsqrt %321 : vector<8x1xf32>
    %323 = vector.broadcast %322 : vector<8x1xf32> to vector<8x32xf32>
    %324 = arith.mulf %319, %323 : vector<8x32xf32>
    %325 = vector.extract_strided_slice %306 {offsets = [0, 0], sizes = [1, 32], strides = [1, 1]} : vector<2x32xf32> to vector<1x32xf32>
    %326 = vector.broadcast %325 : vector<1x32xf32> to vector<8x32xf32>
    %327 = arith.mulf %324, %326 : vector<8x32xf32>
    %328 = vector.extract_strided_slice %306 {offsets = [1, 0], sizes = [1, 32], strides = [1, 1]} : vector<2x32xf32> to vector<1x32xf32>
    %329 = vector.broadcast %328 : vector<1x32xf32> to vector<8x32xf32>
    %330 = arith.addf %327, %329 : vector<8x32xf32>
    %c0_114 = arith.constant 0 : index
    %c0_115 = arith.constant 0 : index
    %c0_116 = arith.constant 0 : index
    %331 = vector.load %arg13[%c0_114, %c0_115, %c0_116] : memref<2x32x72xf32, #tpu.memory_space<vmem>>, vector<1x32x72xf32>
    %332 = vector.shape_cast %331 : vector<1x32x72xf32> to vector<32x72xf32>
    %cst_117 = arith.constant dense<0.000000e+00> : vector<8x72xf32>
    %333 = tpu.matmul %330, %332, %cst_117 {dimension_numbers = #tpu.dot_dimension_numbers<[1], [0], [0], [1], [0, 0, 1, 1], [], []>} : vector<8x32xf32>, vector<32x72xf32>, vector<8x72xf32> -> vector<8x72xf32>
    %c0_118 = arith.constant 0 : index
    %c0_119 = arith.constant 0 : index
    %c0_120 = arith.constant 0 : index
    %334 = vector.load %arg14[%c0_118, %c0_119, %c0_120] : memref<2x1x72xf32, #tpu.memory_space<vmem>>, vector<1x1x72xf32>
    %335 = vector.shape_cast %334 : vector<1x1x72xf32> to vector<1x72xf32>
    %336 = vector.broadcast %335 : vector<1x72xf32> to vector<8x72xf32>
    %337 = arith.addf %333, %336 : vector<8x72xf32>
    %338 = vector.extract_strided_slice %337 {offsets = [0, 0], sizes = [8, 64], strides = [1, 1]} : vector<8x72xf32> to vector<8x64xf32>
    %cst_121 = arith.constant 5.000000e-01 : f32
    %339 = vector.broadcast %cst_121 : f32 to vector<8x64xf32>
    %340 = arith.mulf %339, %338 : vector<8x64xf32>
    %cst_122 = arith.constant 0.707106769 : f32
    %341 = vector.broadcast %cst_122 : f32 to vector<8x64xf32>
    %342 = arith.mulf %338, %341 : vector<8x64xf32>
    %343 = math.absf %342 : vector<8x64xf32>
    %cst_123 = arith.constant 0.327591091 : f32
    %344 = vector.broadcast %cst_123 : f32 to vector<8x64xf32>
    %345 = arith.mulf %344, %343 : vector<8x64xf32>
    %cst_124 = arith.constant 1.000000e+00 : f32
    %346 = vector.broadcast %cst_124 : f32 to vector<8x64xf32>
    %347 = arith.addf %346, %345 : vector<8x64xf32>
    %cst_125 = arith.constant 1.000000e+00 : f32
    %348 = vector.broadcast %cst_125 : f32 to vector<8x64xf32>
    %349 = arith.divf %348, %347 : vector<8x64xf32>
    %cst_126 = arith.constant 1.06140542 : f32
    %350 = vector.broadcast %cst_126 : f32 to vector<8x64xf32>
    %351 = arith.mulf %350, %349 : vector<8x64xf32>
    %cst_127 = arith.constant 1.45315206 : f32
    %352 = vector.broadcast %cst_127 : f32 to vector<8x64xf32>
    %353 = arith.subf %351, %352 : vector<8x64xf32>
    %354 = arith.mulf %353, %349 : vector<8x64xf32>
    %cst_128 = arith.constant 1.42141378 : f32
    %355 = vector.broadcast %cst_128 : f32 to vector<8x64xf32>
    %356 = arith.addf %354, %355 : vector<8x64xf32>
    %357 = arith.mulf %356, %349 : vector<8x64xf32>
    %cst_129 = arith.constant 0.284496725 : f32
    %358 = vector.broadcast %cst_129 : f32 to vector<8x64xf32>
    %359 = arith.subf %357, %358 : vector<8x64xf32>
    %360 = arith.mulf %359, %349 : vector<8x64xf32>
    %cst_130 = arith.constant 0.254829586 : f32
    %361 = vector.broadcast %cst_130 : f32 to vector<8x64xf32>
    %362 = arith.addf %360, %361 : vector<8x64xf32>
    %363 = arith.mulf %362, %349 : vector<8x64xf32>
    %cst_131 = arith.constant 0.000000e+00 : f32
    %364 = vector.broadcast %cst_131 : f32 to vector<8x64xf32>
    %365 = arith.subf %364, %342 : vector<8x64xf32>
    %366 = arith.mulf %365, %342 : vector<8x64xf32>
    %367 = math.exp %366 : vector<8x64xf32>
    %368 = arith.mulf %363, %367 : vector<8x64xf32>
    %cst_132 = arith.constant 1.000000e+00 : f32
    %369 = vector.broadcast %cst_132 : f32 to vector<8x64xf32>
    %370 = arith.subf %369, %368 : vector<8x64xf32>
    %cst_133 = arith.constant 0.000000e+00 : f32
    %371 = vector.broadcast %cst_133 : f32 to vector<8x64xf32>
    %372 = arith.cmpf oge, %342, %371 : vector<8x64xf32>
    %cst_134 = arith.constant 0.000000e+00 : f32
    %373 = vector.broadcast %cst_134 : f32 to vector<8x64xf32>
    %374 = arith.subf %373, %370 : vector<8x64xf32>
    %375 = arith.select %372, %370, %374 : vector<8x64xi1>, vector<8x64xf32>
    %cst_135 = arith.constant 1.000000e+00 : f32
    %376 = vector.broadcast %cst_135 : f32 to vector<8x64xf32>
    %377 = arith.addf %376, %375 : vector<8x64xf32>
    %378 = arith.mulf %340, %377 : vector<8x64xf32>
    %379 = vector.extract_strided_slice %337 {offsets = [0, 64], sizes = [8, 8], strides = [1, 1]} : vector<8x72xf32> to vector<8x8xf32>
    %cst_136 = arith.constant 0.000000e+00 : f32
    %380 = vector.broadcast %cst_136 : f32 to vector<8x8xf32>
    %381 = arith.cmpf ogt, %379, %380 : vector<8x8xf32>
    %cst_137 = arith.constant 0.000000e+00 : f32
    %382 = vector.broadcast %cst_137 : f32 to vector<8x8xf32>
    %383 = arith.minimumf %379, %382 : vector<8x8xf32>
    %384 = math.exp %383 : vector<8x8xf32>
    %cst_138 = arith.constant 1.000000e+00 : f32
    %385 = vector.broadcast %cst_138 : f32 to vector<8x8xf32>
    %386 = arith.subf %384, %385 : vector<8x8xf32>
    %387 = arith.select %381, %379, %386 : vector<8x8xi1>, vector<8x8xf32>
    %388 = tpu.concatenate %378, %387 in 1 : vector<8x64xf32>, vector<8x8xf32> -> vector<8x72xf32>
    %c0_139 = arith.constant 0 : index
    %c0_140 = arith.constant 0 : index
    %c0_141 = arith.constant 0 : index
    %389 = vector.load %arg15[%c0_139, %c0_140, %c0_141] : memref<2x72x32xf32, #tpu.memory_space<vmem>>, vector<1x72x32xf32>
    %390 = vector.shape_cast %389 : vector<1x72x32xf32> to vector<72x32xf32>
    %cst_142 = arith.constant dense<0.000000e+00> : vector<8x32xf32>
    %391 = tpu.matmul %388, %390, %cst_142 {dimension_numbers = #tpu.dot_dimension_numbers<[1], [0], [0], [1], [0, 0, 1, 1], [], []>} : vector<8x72xf32>, vector<72x32xf32>, vector<8x32xf32> -> vector<8x32xf32>
    %c0_143 = arith.constant 0 : index
    %c0_144 = arith.constant 0 : index
    %c0_145 = arith.constant 0 : index
    %392 = vector.load %arg16[%c0_143, %c0_144, %c0_145] : memref<2x1x32xf32, #tpu.memory_space<vmem>>, vector<1x1x32xf32>
    %393 = vector.shape_cast %392 : vector<1x1x32xf32> to vector<1x32xf32>
    %394 = vector.broadcast %393 : vector<1x32xf32> to vector<8x32xf32>
    %395 = arith.addf %391, %394 : vector<8x32xf32>
    %396 = arith.addf %330, %395 : vector<8x32xf32>
    %c0_146 = arith.constant 0 : index
    %c0_147 = arith.constant 0 : index
    %c0_148 = arith.constant 0 : index
    %397 = vector.load %arg17[%c0_146, %c0_147, %c0_148] : memref<2x2x32xf32, #tpu.memory_space<vmem>>, vector<1x2x32xf32>
    %398 = vector.shape_cast %397 : vector<1x2x32xf32> to vector<2x32xf32>
    %cst_149 = arith.constant dense<0.000000e+00> : vector<8xf32>
    %399 = vector.multi_reduction <add>, %396, %cst_149 [1] : vector<8x32xf32> to vector<8xf32>
    %400 = vector.shape_cast %399 : vector<8xf32> to vector<8x1xf32>
    %cst_150 = arith.constant 3.200000e+01 : f32
    %401 = vector.broadcast %cst_150 : f32 to vector<8x1xf32>
    %402 = arith.divf %400, %401 : vector<8x1xf32>
    %403 = vector.broadcast %402 : vector<8x1xf32> to vector<8x32xf32>
    %404 = arith.subf %396, %403 : vector<8x32xf32>
    %405 = arith.mulf %404, %404 : vector<8x32xf32>
    %cst_151 = arith.constant dense<0.000000e+00> : vector<8xf32>
    %406 = vector.multi_reduction <add>, %405, %cst_151 [1] : vector<8x32xf32> to vector<8xf32>
    %407 = vector.shape_cast %406 : vector<8xf32> to vector<8x1xf32>
    %cst_152 = arith.constant 3.200000e+01 : f32
    %408 = vector.broadcast %cst_152 : f32 to vector<8x1xf32>
    %409 = arith.divf %407, %408 : vector<8x1xf32>
    %410 = vector.broadcast %402 : vector<8x1xf32> to vector<8x32xf32>
    %411 = arith.subf %396, %410 : vector<8x32xf32>
    %cst_153 = arith.constant 9.99999974E-6 : f32
    %412 = vector.broadcast %cst_153 : f32 to vector<8x1xf32>
    %413 = arith.addf %409, %412 : vector<8x1xf32>
    %414 = math.rsqrt %413 : vector<8x1xf32>
    %415 = vector.broadcast %414 : vector<8x1xf32> to vector<8x32xf32>
    %416 = arith.mulf %411, %415 : vector<8x32xf32>
    %417 = vector.extract_strided_slice %398 {offsets = [0, 0], sizes = [1, 32], strides = [1, 1]} : vector<2x32xf32> to vector<1x32xf32>
    %418 = vector.broadcast %417 : vector<1x32xf32> to vector<8x32xf32>
    %419 = arith.mulf %416, %418 : vector<8x32xf32>
    %420 = vector.extract_strided_slice %398 {offsets = [1, 0], sizes = [1, 32], strides = [1, 1]} : vector<2x32xf32> to vector<1x32xf32>
    %421 = vector.broadcast %420 : vector<1x32xf32> to vector<8x32xf32>
    %422 = arith.addf %419, %421 : vector<8x32xf32>
    %c1_154 = arith.constant 1 : index
    %c0_155 = arith.constant 0 : index
    %c0_156 = arith.constant 0 : index
    %423 = vector.load %arg7[%c1_154, %c0_155, %c0_156] : memref<2x32x128xf32, #tpu.memory_space<vmem>>, vector<1x32x128xf32>
    %424 = vector.shape_cast %423 : vector<1x32x128xf32> to vector<32x128xf32>
    %cst_157 = arith.constant dense<0.000000e+00> : vector<8x128xf32>
    %425 = tpu.matmul %422, %424, %cst_157 {dimension_numbers = #tpu.dot_dimension_numbers<[1], [0], [0], [1], [0, 0, 1, 1], [], []>} : vector<8x32xf32>, vector<32x128xf32>, vector<8x128xf32> -> vector<8x128xf32>
    %c1_158 = arith.constant 1 : index
    %c0_159 = arith.constant 0 : index
    %c0_160 = arith.constant 0 : index
    %426 = vector.load %arg8[%c1_158, %c0_159, %c0_160] : memref<2x1x128xf32, #tpu.memory_space<vmem>>, vector<1x1x128xf32>
    %427 = vector.shape_cast %426 : vector<1x1x128xf32> to vector<1x128xf32>
    %428 = vector.broadcast %427 : vector<1x128xf32> to vector<8x128xf32>
    %429 = arith.addf %425, %428 : vector<8x128xf32>
    %430 = vector.extract_strided_slice %429 {offsets = [0, 0], sizes = [8, 32], strides = [1, 1]} : vector<8x128xf32> to vector<8x32xf32>
    %431 = vector.extract_strided_slice %429 {offsets = [0, 32], sizes = [8, 32], strides = [1, 1]} : vector<8x128xf32> to vector<8x32xf32>
    %432 = vector.extract_strided_slice %429 {offsets = [0, 64], sizes = [8, 32], strides = [1, 1]} : vector<8x128xf32> to vector<8x32xf32>
    %433 = vector.extract_strided_slice %429 {offsets = [0, 96], sizes = [8, 32], strides = [1, 1]} : vector<8x128xf32> to vector<8x32xf32>
    %c1_161 = arith.constant 1 : index
    %c0_162 = arith.constant 0 : index
    %c0_163 = arith.constant 0 : index
    %434 = vector.load %arg9[%c1_161, %c0_162, %c0_163] : memref<2x1x4xf32, #tpu.memory_space<vmem>>, vector<1x1x4xf32>
    %435 = vector.shape_cast %434 : vector<1x1x4xf32> to vector<1x4xf32>
    %436 = vector.extract_strided_slice %430 {offsets = [0, 0], sizes = [8, 8], strides = [1, 1]} : vector<8x32xf32> to vector<8x8xf32>
    %cst_164 = arith.constant 0.353553385 : f32
    %437 = vector.broadcast %cst_164 : f32 to vector<8x8xf32>
    %438 = arith.mulf %436, %437 : vector<8x8xf32>
    %439 = vector.extract_strided_slice %431 {offsets = [0, 0], sizes = [8, 8], strides = [1, 1]} : vector<8x32xf32> to vector<8x8xf32>
    %440 = vector.extract_strided_slice %432 {offsets = [0, 0], sizes = [8, 8], strides = [1, 1]} : vector<8x32xf32> to vector<8x8xf32>
    %cst_165 = arith.constant dense<0.000000e+00> : vector<8x8xf32>
    %441 = tpu.matmul %438, %439, %cst_165 {dimension_numbers = #tpu.dot_dimension_numbers<[1], [1], [0], [0], [0, 0, 1, 0], [], []>} : vector<8x8xf32>, vector<8x8xf32>, vector<8x8xf32> -> vector<8x8xf32>
    %442 = vector.extract_strided_slice %433 {offsets = [0, 0], sizes = [8, 8], strides = [1, 1]} : vector<8x32xf32> to vector<8x8xf32>
    %443 = vector.extract_strided_slice %442 {offsets = [0, 0], sizes = [8, 4], strides = [1, 1]} : vector<8x8xf32> to vector<8x4xf32>
    %cst_166 = arith.constant dense<0.000000e+00> : vector<8xf32>
    %444 = vector.multi_reduction <add>, %443, %cst_166 [1] : vector<8x4xf32> to vector<8xf32>
    %445 = vector.shape_cast %444 : vector<8xf32> to vector<8x1xf32>
    %446 = arith.negf %445 : vector<8x1xf32>
    %447 = math.exp %446 : vector<8x1xf32>
    %cst_167 = arith.constant 1.000000e+00 : f32
    %448 = vector.broadcast %cst_167 : f32 to vector<8x1xf32>
    %449 = arith.addf %448, %447 : vector<8x1xf32>
    %450 = arith.divf %448, %449 : vector<8x1xf32>
    %451 = vector.extract_strided_slice %442 {offsets = [0, 4], sizes = [8, 4], strides = [1, 1]} : vector<8x8xf32> to vector<8x4xf32>
    %cst_168 = arith.constant dense<0.000000e+00> : vector<8xf32>
    %452 = vector.multi_reduction <add>, %451, %cst_168 [1] : vector<8x4xf32> to vector<8xf32>
    %453 = vector.shape_cast %452 : vector<8xf32> to vector<8x1xf32>
    %454 = arith.negf %453 : vector<8x1xf32>
    %455 = math.exp %454 : vector<8x1xf32>
    %cst_169 = arith.constant 1.000000e+00 : f32
    %456 = vector.broadcast %cst_169 : f32 to vector<8x1xf32>
    %457 = arith.addf %456, %455 : vector<8x1xf32>
    %458 = arith.divf %456, %457 : vector<8x1xf32>
    %459 = vector.extract_strided_slice %435 {offsets = [0, 0], sizes = [1, 1], strides = [1, 1]} : vector<1x4xf32> to vector<1x1xf32>
    %460 = vector.broadcast %459 : vector<1x1xf32> to vector<8x1xf32>
    %461 = arith.mulf %458, %460 : vector<8x1xf32>
    %cst_170 = arith.constant 1.000000e+00 : f32
    %462 = vector.broadcast %cst_170 : f32 to vector<8x1xf32>
    %463 = arith.subf %461, %462 : vector<8x1xf32>
    %464 = arith.mulf %450, %463 : vector<8x1xf32>
    %cst_171 = arith.constant 2.000000e+00 : f32
    %465 = vector.broadcast %cst_171 : f32 to vector<8x1xf32>
    %466 = arith.addf %464, %465 : vector<8x1xf32>
    %467 = vector.extract_strided_slice %94 {offsets = [0, 0, 0], sizes = [1, 8, 8], strides = [1, 1, 1]} : vector<4x8x8xf32> to vector<1x8x8xf32>
    %468 = vector.shape_cast %467 : vector<1x8x8xf32> to vector<8x8xf32>
    %469 = vector.broadcast %466 : vector<8x1xf32> to vector<8x8xf32>
    %470 = arith.mulf %469, %468 : vector<8x8xf32>
    %471 = arith.addf %441, %470 : vector<8x8xf32>
    %cst_172 = arith.constant dense<0xFF800000> : vector<8xf32>
    %472 = vector.multi_reduction <maximumf>, %471, %cst_172 [1] : vector<8x8xf32> to vector<8xf32>
    %473 = vector.shape_cast %472 : vector<8xf32> to vector<8x1xf32>
    %474 = vector.broadcast %473 : vector<8x1xf32> to vector<8x8xf32>
    %475 = arith.subf %471, %474 : vector<8x8xf32>
    %476 = math.exp %475 : vector<8x8xf32>
    %cst_173 = arith.constant dense<0.000000e+00> : vector<8xf32>
    %477 = vector.multi_reduction <add>, %476, %cst_173 [1] : vector<8x8xf32> to vector<8xf32>
    %478 = vector.shape_cast %477 : vector<8xf32> to vector<8x1xf32>
    %479 = tpu.reciprocal %478 {approx = true} : vector<8x1xf32> -> vector<8x1xf32>
    %480 = vector.broadcast %479 : vector<8x1xf32> to vector<8x8xf32>
    %481 = arith.mulf %476, %480 : vector<8x8xf32>
    %cst_174 = arith.constant dense<0.000000e+00> : vector<8x8xf32>
    %482 = tpu.matmul %481, %440, %cst_174 {dimension_numbers = #tpu.dot_dimension_numbers<[1], [0], [0], [1], [0, 0, 1, 1], [], []>} : vector<8x8xf32>, vector<8x8xf32>, vector<8x8xf32> -> vector<8x8xf32>
    %483 = vector.extract_strided_slice %430 {offsets = [0, 8], sizes = [8, 8], strides = [1, 1]} : vector<8x32xf32> to vector<8x8xf32>
    %cst_175 = arith.constant 0.353553385 : f32
    %484 = vector.broadcast %cst_175 : f32 to vector<8x8xf32>
    %485 = arith.mulf %483, %484 : vector<8x8xf32>
    %486 = vector.extract_strided_slice %431 {offsets = [0, 8], sizes = [8, 8], strides = [1, 1]} : vector<8x32xf32> to vector<8x8xf32>
    %487 = vector.extract_strided_slice %432 {offsets = [0, 8], sizes = [8, 8], strides = [1, 1]} : vector<8x32xf32> to vector<8x8xf32>
    %cst_176 = arith.constant dense<0.000000e+00> : vector<8x8xf32>
    %488 = tpu.matmul %485, %486, %cst_176 {dimension_numbers = #tpu.dot_dimension_numbers<[1], [1], [0], [0], [0, 0, 1, 0], [], []>} : vector<8x8xf32>, vector<8x8xf32>, vector<8x8xf32> -> vector<8x8xf32>
    %489 = vector.extract_strided_slice %433 {offsets = [0, 8], sizes = [8, 8], strides = [1, 1]} : vector<8x32xf32> to vector<8x8xf32>
    %490 = vector.extract_strided_slice %489 {offsets = [0, 0], sizes = [8, 4], strides = [1, 1]} : vector<8x8xf32> to vector<8x4xf32>
    %cst_177 = arith.constant dense<0.000000e+00> : vector<8xf32>
    %491 = vector.multi_reduction <add>, %490, %cst_177 [1] : vector<8x4xf32> to vector<8xf32>
    %492 = vector.shape_cast %491 : vector<8xf32> to vector<8x1xf32>
    %493 = arith.negf %492 : vector<8x1xf32>
    %494 = math.exp %493 : vector<8x1xf32>
    %cst_178 = arith.constant 1.000000e+00 : f32
    %495 = vector.broadcast %cst_178 : f32 to vector<8x1xf32>
    %496 = arith.addf %495, %494 : vector<8x1xf32>
    %497 = arith.divf %495, %496 : vector<8x1xf32>
    %498 = vector.extract_strided_slice %489 {offsets = [0, 4], sizes = [8, 4], strides = [1, 1]} : vector<8x8xf32> to vector<8x4xf32>
    %cst_179 = arith.constant dense<0.000000e+00> : vector<8xf32>
    %499 = vector.multi_reduction <add>, %498, %cst_179 [1] : vector<8x4xf32> to vector<8xf32>
    %500 = vector.shape_cast %499 : vector<8xf32> to vector<8x1xf32>
    %501 = arith.negf %500 : vector<8x1xf32>
    %502 = math.exp %501 : vector<8x1xf32>
    %cst_180 = arith.constant 1.000000e+00 : f32
    %503 = vector.broadcast %cst_180 : f32 to vector<8x1xf32>
    %504 = arith.addf %503, %502 : vector<8x1xf32>
    %505 = arith.divf %503, %504 : vector<8x1xf32>
    %506 = vector.extract_strided_slice %435 {offsets = [0, 1], sizes = [1, 1], strides = [1, 1]} : vector<1x4xf32> to vector<1x1xf32>
    %507 = vector.broadcast %506 : vector<1x1xf32> to vector<8x1xf32>
    %508 = arith.mulf %505, %507 : vector<8x1xf32>
    %cst_181 = arith.constant 1.000000e+00 : f32
    %509 = vector.broadcast %cst_181 : f32 to vector<8x1xf32>
    %510 = arith.subf %508, %509 : vector<8x1xf32>
    %511 = arith.mulf %497, %510 : vector<8x1xf32>
    %cst_182 = arith.constant 2.000000e+00 : f32
    %512 = vector.broadcast %cst_182 : f32 to vector<8x1xf32>
    %513 = arith.addf %511, %512 : vector<8x1xf32>
    %514 = vector.extract_strided_slice %94 {offsets = [1, 0, 0], sizes = [1, 8, 8], strides = [1, 1, 1]} : vector<4x8x8xf32> to vector<1x8x8xf32>
    %515 = vector.shape_cast %514 : vector<1x8x8xf32> to vector<8x8xf32>
    %516 = vector.broadcast %513 : vector<8x1xf32> to vector<8x8xf32>
    %517 = arith.mulf %516, %515 : vector<8x8xf32>
    %518 = arith.addf %488, %517 : vector<8x8xf32>
    %cst_183 = arith.constant dense<0xFF800000> : vector<8xf32>
    %519 = vector.multi_reduction <maximumf>, %518, %cst_183 [1] : vector<8x8xf32> to vector<8xf32>
    %520 = vector.shape_cast %519 : vector<8xf32> to vector<8x1xf32>
    %521 = vector.broadcast %520 : vector<8x1xf32> to vector<8x8xf32>
    %522 = arith.subf %518, %521 : vector<8x8xf32>
    %523 = math.exp %522 : vector<8x8xf32>
    %cst_184 = arith.constant dense<0.000000e+00> : vector<8xf32>
    %524 = vector.multi_reduction <add>, %523, %cst_184 [1] : vector<8x8xf32> to vector<8xf32>
    %525 = vector.shape_cast %524 : vector<8xf32> to vector<8x1xf32>
    %526 = tpu.reciprocal %525 {approx = true} : vector<8x1xf32> -> vector<8x1xf32>
    %527 = vector.broadcast %526 : vector<8x1xf32> to vector<8x8xf32>
    %528 = arith.mulf %523, %527 : vector<8x8xf32>
    %cst_185 = arith.constant dense<0.000000e+00> : vector<8x8xf32>
    %529 = tpu.matmul %528, %487, %cst_185 {dimension_numbers = #tpu.dot_dimension_numbers<[1], [0], [0], [1], [0, 0, 1, 1], [], []>} : vector<8x8xf32>, vector<8x8xf32>, vector<8x8xf32> -> vector<8x8xf32>
    %530 = vector.extract_strided_slice %430 {offsets = [0, 16], sizes = [8, 8], strides = [1, 1]} : vector<8x32xf32> to vector<8x8xf32>
    %cst_186 = arith.constant 0.353553385 : f32
    %531 = vector.broadcast %cst_186 : f32 to vector<8x8xf32>
    %532 = arith.mulf %530, %531 : vector<8x8xf32>
    %533 = vector.extract_strided_slice %431 {offsets = [0, 16], sizes = [8, 8], strides = [1, 1]} : vector<8x32xf32> to vector<8x8xf32>
    %534 = vector.extract_strided_slice %432 {offsets = [0, 16], sizes = [8, 8], strides = [1, 1]} : vector<8x32xf32> to vector<8x8xf32>
    %cst_187 = arith.constant dense<0.000000e+00> : vector<8x8xf32>
    %535 = tpu.matmul %532, %533, %cst_187 {dimension_numbers = #tpu.dot_dimension_numbers<[1], [1], [0], [0], [0, 0, 1, 0], [], []>} : vector<8x8xf32>, vector<8x8xf32>, vector<8x8xf32> -> vector<8x8xf32>
    %536 = vector.extract_strided_slice %433 {offsets = [0, 16], sizes = [8, 8], strides = [1, 1]} : vector<8x32xf32> to vector<8x8xf32>
    %537 = vector.extract_strided_slice %536 {offsets = [0, 0], sizes = [8, 4], strides = [1, 1]} : vector<8x8xf32> to vector<8x4xf32>
    %cst_188 = arith.constant dense<0.000000e+00> : vector<8xf32>
    %538 = vector.multi_reduction <add>, %537, %cst_188 [1] : vector<8x4xf32> to vector<8xf32>
    %539 = vector.shape_cast %538 : vector<8xf32> to vector<8x1xf32>
    %540 = arith.negf %539 : vector<8x1xf32>
    %541 = math.exp %540 : vector<8x1xf32>
    %cst_189 = arith.constant 1.000000e+00 : f32
    %542 = vector.broadcast %cst_189 : f32 to vector<8x1xf32>
    %543 = arith.addf %542, %541 : vector<8x1xf32>
    %544 = arith.divf %542, %543 : vector<8x1xf32>
    %545 = vector.extract_strided_slice %536 {offsets = [0, 4], sizes = [8, 4], strides = [1, 1]} : vector<8x8xf32> to vector<8x4xf32>
    %cst_190 = arith.constant dense<0.000000e+00> : vector<8xf32>
    %546 = vector.multi_reduction <add>, %545, %cst_190 [1] : vector<8x4xf32> to vector<8xf32>
    %547 = vector.shape_cast %546 : vector<8xf32> to vector<8x1xf32>
    %548 = arith.negf %547 : vector<8x1xf32>
    %549 = math.exp %548 : vector<8x1xf32>
    %cst_191 = arith.constant 1.000000e+00 : f32
    %550 = vector.broadcast %cst_191 : f32 to vector<8x1xf32>
    %551 = arith.addf %550, %549 : vector<8x1xf32>
    %552 = arith.divf %550, %551 : vector<8x1xf32>
    %553 = vector.extract_strided_slice %435 {offsets = [0, 2], sizes = [1, 1], strides = [1, 1]} : vector<1x4xf32> to vector<1x1xf32>
    %554 = vector.broadcast %553 : vector<1x1xf32> to vector<8x1xf32>
    %555 = arith.mulf %552, %554 : vector<8x1xf32>
    %cst_192 = arith.constant 1.000000e+00 : f32
    %556 = vector.broadcast %cst_192 : f32 to vector<8x1xf32>
    %557 = arith.subf %555, %556 : vector<8x1xf32>
    %558 = arith.mulf %544, %557 : vector<8x1xf32>
    %cst_193 = arith.constant 2.000000e+00 : f32
    %559 = vector.broadcast %cst_193 : f32 to vector<8x1xf32>
    %560 = arith.addf %558, %559 : vector<8x1xf32>
    %561 = vector.extract_strided_slice %94 {offsets = [2, 0, 0], sizes = [1, 8, 8], strides = [1, 1, 1]} : vector<4x8x8xf32> to vector<1x8x8xf32>
    %562 = vector.shape_cast %561 : vector<1x8x8xf32> to vector<8x8xf32>
    %563 = vector.broadcast %560 : vector<8x1xf32> to vector<8x8xf32>
    %564 = arith.mulf %563, %562 : vector<8x8xf32>
    %565 = arith.addf %535, %564 : vector<8x8xf32>
    %cst_194 = arith.constant dense<0xFF800000> : vector<8xf32>
    %566 = vector.multi_reduction <maximumf>, %565, %cst_194 [1] : vector<8x8xf32> to vector<8xf32>
    %567 = vector.shape_cast %566 : vector<8xf32> to vector<8x1xf32>
    %568 = vector.broadcast %567 : vector<8x1xf32> to vector<8x8xf32>
    %569 = arith.subf %565, %568 : vector<8x8xf32>
    %570 = math.exp %569 : vector<8x8xf32>
    %cst_195 = arith.constant dense<0.000000e+00> : vector<8xf32>
    %571 = vector.multi_reduction <add>, %570, %cst_195 [1] : vector<8x8xf32> to vector<8xf32>
    %572 = vector.shape_cast %571 : vector<8xf32> to vector<8x1xf32>
    %573 = tpu.reciprocal %572 {approx = true} : vector<8x1xf32> -> vector<8x1xf32>
    %574 = vector.broadcast %573 : vector<8x1xf32> to vector<8x8xf32>
    %575 = arith.mulf %570, %574 : vector<8x8xf32>
    %cst_196 = arith.constant dense<0.000000e+00> : vector<8x8xf32>
    %576 = tpu.matmul %575, %534, %cst_196 {dimension_numbers = #tpu.dot_dimension_numbers<[1], [0], [0], [1], [0, 0, 1, 1], [], []>} : vector<8x8xf32>, vector<8x8xf32>, vector<8x8xf32> -> vector<8x8xf32>
    %577 = vector.extract_strided_slice %430 {offsets = [0, 24], sizes = [8, 8], strides = [1, 1]} : vector<8x32xf32> to vector<8x8xf32>
    %cst_197 = arith.constant 0.353553385 : f32
    %578 = vector.broadcast %cst_197 : f32 to vector<8x8xf32>
    %579 = arith.mulf %577, %578 : vector<8x8xf32>
    %580 = vector.extract_strided_slice %431 {offsets = [0, 24], sizes = [8, 8], strides = [1, 1]} : vector<8x32xf32> to vector<8x8xf32>
    %581 = vector.extract_strided_slice %432 {offsets = [0, 24], sizes = [8, 8], strides = [1, 1]} : vector<8x32xf32> to vector<8x8xf32>
    %cst_198 = arith.constant dense<0.000000e+00> : vector<8x8xf32>
    %582 = tpu.matmul %579, %580, %cst_198 {dimension_numbers = #tpu.dot_dimension_numbers<[1], [1], [0], [0], [0, 0, 1, 0], [], []>} : vector<8x8xf32>, vector<8x8xf32>, vector<8x8xf32> -> vector<8x8xf32>
    %583 = vector.extract_strided_slice %433 {offsets = [0, 24], sizes = [8, 8], strides = [1, 1]} : vector<8x32xf32> to vector<8x8xf32>
    %584 = vector.extract_strided_slice %583 {offsets = [0, 0], sizes = [8, 4], strides = [1, 1]} : vector<8x8xf32> to vector<8x4xf32>
    %cst_199 = arith.constant dense<0.000000e+00> : vector<8xf32>
    %585 = vector.multi_reduction <add>, %584, %cst_199 [1] : vector<8x4xf32> to vector<8xf32>
    %586 = vector.shape_cast %585 : vector<8xf32> to vector<8x1xf32>
    %587 = arith.negf %586 : vector<8x1xf32>
    %588 = math.exp %587 : vector<8x1xf32>
    %cst_200 = arith.constant 1.000000e+00 : f32
    %589 = vector.broadcast %cst_200 : f32 to vector<8x1xf32>
    %590 = arith.addf %589, %588 : vector<8x1xf32>
    %591 = arith.divf %589, %590 : vector<8x1xf32>
    %592 = vector.extract_strided_slice %583 {offsets = [0, 4], sizes = [8, 4], strides = [1, 1]} : vector<8x8xf32> to vector<8x4xf32>
    %cst_201 = arith.constant dense<0.000000e+00> : vector<8xf32>
    %593 = vector.multi_reduction <add>, %592, %cst_201 [1] : vector<8x4xf32> to vector<8xf32>
    %594 = vector.shape_cast %593 : vector<8xf32> to vector<8x1xf32>
    %595 = arith.negf %594 : vector<8x1xf32>
    %596 = math.exp %595 : vector<8x1xf32>
    %cst_202 = arith.constant 1.000000e+00 : f32
    %597 = vector.broadcast %cst_202 : f32 to vector<8x1xf32>
    %598 = arith.addf %597, %596 : vector<8x1xf32>
    %599 = arith.divf %597, %598 : vector<8x1xf32>
    %600 = vector.extract_strided_slice %435 {offsets = [0, 3], sizes = [1, 1], strides = [1, 1]} : vector<1x4xf32> to vector<1x1xf32>
    %601 = vector.broadcast %600 : vector<1x1xf32> to vector<8x1xf32>
    %602 = arith.mulf %599, %601 : vector<8x1xf32>
    %cst_203 = arith.constant 1.000000e+00 : f32
    %603 = vector.broadcast %cst_203 : f32 to vector<8x1xf32>
    %604 = arith.subf %602, %603 : vector<8x1xf32>
    %605 = arith.mulf %591, %604 : vector<8x1xf32>
    %cst_204 = arith.constant 2.000000e+00 : f32
    %606 = vector.broadcast %cst_204 : f32 to vector<8x1xf32>
    %607 = arith.addf %605, %606 : vector<8x1xf32>
    %608 = vector.extract_strided_slice %94 {offsets = [3, 0, 0], sizes = [1, 8, 8], strides = [1, 1, 1]} : vector<4x8x8xf32> to vector<1x8x8xf32>
    %609 = vector.shape_cast %608 : vector<1x8x8xf32> to vector<8x8xf32>
    %610 = vector.broadcast %607 : vector<8x1xf32> to vector<8x8xf32>
    %611 = arith.mulf %610, %609 : vector<8x8xf32>
    %612 = arith.addf %582, %611 : vector<8x8xf32>
    %cst_205 = arith.constant dense<0xFF800000> : vector<8xf32>
    %613 = vector.multi_reduction <maximumf>, %612, %cst_205 [1] : vector<8x8xf32> to vector<8xf32>
    %614 = vector.shape_cast %613 : vector<8xf32> to vector<8x1xf32>
    %615 = vector.broadcast %614 : vector<8x1xf32> to vector<8x8xf32>
    %616 = arith.subf %612, %615 : vector<8x8xf32>
    %617 = math.exp %616 : vector<8x8xf32>
    %cst_206 = arith.constant dense<0.000000e+00> : vector<8xf32>
    %618 = vector.multi_reduction <add>, %617, %cst_206 [1] : vector<8x8xf32> to vector<8xf32>
    %619 = vector.shape_cast %618 : vector<8xf32> to vector<8x1xf32>
    %620 = tpu.reciprocal %619 {approx = true} : vector<8x1xf32> -> vector<8x1xf32>
    %621 = vector.broadcast %620 : vector<8x1xf32> to vector<8x8xf32>
    %622 = arith.mulf %617, %621 : vector<8x8xf32>
    %cst_207 = arith.constant dense<0.000000e+00> : vector<8x8xf32>
    %623 = tpu.matmul %622, %581, %cst_207 {dimension_numbers = #tpu.dot_dimension_numbers<[1], [0], [0], [1], [0, 0, 1, 1], [], []>} : vector<8x8xf32>, vector<8x8xf32>, vector<8x8xf32> -> vector<8x8xf32>
    %624 = tpu.concatenate %482, %529, %576, %623 in 1 : vector<8x8xf32>, vector<8x8xf32>, vector<8x8xf32>, vector<8x8xf32> -> vector<8x32xf32>
    %c1_208 = arith.constant 1 : index
    %c0_209 = arith.constant 0 : index
    %c0_210 = arith.constant 0 : index
    %625 = vector.load %arg10[%c1_208, %c0_209, %c0_210] : memref<2x32x32xf32, #tpu.memory_space<vmem>>, vector<1x32x32xf32>
    %626 = vector.shape_cast %625 : vector<1x32x32xf32> to vector<32x32xf32>
    %cst_211 = arith.constant dense<0.000000e+00> : vector<8x32xf32>
    %627 = tpu.matmul %624, %626, %cst_211 {dimension_numbers = #tpu.dot_dimension_numbers<[1], [0], [0], [1], [0, 0, 1, 1], [], []>} : vector<8x32xf32>, vector<32x32xf32>, vector<8x32xf32> -> vector<8x32xf32>
    %c1_212 = arith.constant 1 : index
    %c0_213 = arith.constant 0 : index
    %c0_214 = arith.constant 0 : index
    %628 = vector.load %arg11[%c1_212, %c0_213, %c0_214] : memref<2x1x32xf32, #tpu.memory_space<vmem>>, vector<1x1x32xf32>
    %629 = vector.shape_cast %628 : vector<1x1x32xf32> to vector<1x32xf32>
    %630 = vector.broadcast %629 : vector<1x32xf32> to vector<8x32xf32>
    %631 = arith.addf %627, %630 : vector<8x32xf32>
    %632 = arith.addf %422, %631 : vector<8x32xf32>
    %c1_215 = arith.constant 1 : index
    %c0_216 = arith.constant 0 : index
    %c0_217 = arith.constant 0 : index
    %633 = vector.load %arg12[%c1_215, %c0_216, %c0_217] : memref<2x2x32xf32, #tpu.memory_space<vmem>>, vector<1x2x32xf32>
    %634 = vector.shape_cast %633 : vector<1x2x32xf32> to vector<2x32xf32>
    %cst_218 = arith.constant dense<0.000000e+00> : vector<8xf32>
    %635 = vector.multi_reduction <add>, %632, %cst_218 [1] : vector<8x32xf32> to vector<8xf32>
    %636 = vector.shape_cast %635 : vector<8xf32> to vector<8x1xf32>
    %cst_219 = arith.constant 3.200000e+01 : f32
    %637 = vector.broadcast %cst_219 : f32 to vector<8x1xf32>
    %638 = arith.divf %636, %637 : vector<8x1xf32>
    %639 = vector.broadcast %638 : vector<8x1xf32> to vector<8x32xf32>
    %640 = arith.subf %632, %639 : vector<8x32xf32>
    %641 = arith.mulf %640, %640 : vector<8x32xf32>
    %cst_220 = arith.constant dense<0.000000e+00> : vector<8xf32>
    %642 = vector.multi_reduction <add>, %641, %cst_220 [1] : vector<8x32xf32> to vector<8xf32>
    %643 = vector.shape_cast %642 : vector<8xf32> to vector<8x1xf32>
    %cst_221 = arith.constant 3.200000e+01 : f32
    %644 = vector.broadcast %cst_221 : f32 to vector<8x1xf32>
    %645 = arith.divf %643, %644 : vector<8x1xf32>
    %646 = vector.broadcast %638 : vector<8x1xf32> to vector<8x32xf32>
    %647 = arith.subf %632, %646 : vector<8x32xf32>
    %cst_222 = arith.constant 9.99999974E-6 : f32
    %648 = vector.broadcast %cst_222 : f32 to vector<8x1xf32>
    %649 = arith.addf %645, %648 : vector<8x1xf32>
    %650 = math.rsqrt %649 : vector<8x1xf32>
    %651 = vector.broadcast %650 : vector<8x1xf32> to vector<8x32xf32>
    %652 = arith.mulf %647, %651 : vector<8x32xf32>
    %653 = vector.extract_strided_slice %634 {offsets = [0, 0], sizes = [1, 32], strides = [1, 1]} : vector<2x32xf32> to vector<1x32xf32>
    %654 = vector.broadcast %653 : vector<1x32xf32> to vector<8x32xf32>
    %655 = arith.mulf %652, %654 : vector<8x32xf32>
    %656 = vector.extract_strided_slice %634 {offsets = [1, 0], sizes = [1, 32], strides = [1, 1]} : vector<2x32xf32> to vector<1x32xf32>
    %657 = vector.broadcast %656 : vector<1x32xf32> to vector<8x32xf32>
    %658 = arith.addf %655, %657 : vector<8x32xf32>
    %c1_223 = arith.constant 1 : index
    %c0_224 = arith.constant 0 : index
    %c0_225 = arith.constant 0 : index
    %659 = vector.load %arg13[%c1_223, %c0_224, %c0_225] : memref<2x32x72xf32, #tpu.memory_space<vmem>>, vector<1x32x72xf32>
    %660 = vector.shape_cast %659 : vector<1x32x72xf32> to vector<32x72xf32>
    %cst_226 = arith.constant dense<0.000000e+00> : vector<8x72xf32>
    %661 = tpu.matmul %658, %660, %cst_226 {dimension_numbers = #tpu.dot_dimension_numbers<[1], [0], [0], [1], [0, 0, 1, 1], [], []>} : vector<8x32xf32>, vector<32x72xf32>, vector<8x72xf32> -> vector<8x72xf32>
    %c1_227 = arith.constant 1 : index
    %c0_228 = arith.constant 0 : index
    %c0_229 = arith.constant 0 : index
    %662 = vector.load %arg14[%c1_227, %c0_228, %c0_229] : memref<2x1x72xf32, #tpu.memory_space<vmem>>, vector<1x1x72xf32>
    %663 = vector.shape_cast %662 : vector<1x1x72xf32> to vector<1x72xf32>
    %664 = vector.broadcast %663 : vector<1x72xf32> to vector<8x72xf32>
    %665 = arith.addf %661, %664 : vector<8x72xf32>
    %666 = vector.extract_strided_slice %665 {offsets = [0, 0], sizes = [8, 64], strides = [1, 1]} : vector<8x72xf32> to vector<8x64xf32>
    %cst_230 = arith.constant 5.000000e-01 : f32
    %667 = vector.broadcast %cst_230 : f32 to vector<8x64xf32>
    %668 = arith.mulf %667, %666 : vector<8x64xf32>
    %cst_231 = arith.constant 0.707106769 : f32
    %669 = vector.broadcast %cst_231 : f32 to vector<8x64xf32>
    %670 = arith.mulf %666, %669 : vector<8x64xf32>
    %671 = math.absf %670 : vector<8x64xf32>
    %cst_232 = arith.constant 0.327591091 : f32
    %672 = vector.broadcast %cst_232 : f32 to vector<8x64xf32>
    %673 = arith.mulf %672, %671 : vector<8x64xf32>
    %cst_233 = arith.constant 1.000000e+00 : f32
    %674 = vector.broadcast %cst_233 : f32 to vector<8x64xf32>
    %675 = arith.addf %674, %673 : vector<8x64xf32>
    %cst_234 = arith.constant 1.000000e+00 : f32
    %676 = vector.broadcast %cst_234 : f32 to vector<8x64xf32>
    %677 = arith.divf %676, %675 : vector<8x64xf32>
    %cst_235 = arith.constant 1.06140542 : f32
    %678 = vector.broadcast %cst_235 : f32 to vector<8x64xf32>
    %679 = arith.mulf %678, %677 : vector<8x64xf32>
    %cst_236 = arith.constant 1.45315206 : f32
    %680 = vector.broadcast %cst_236 : f32 to vector<8x64xf32>
    %681 = arith.subf %679, %680 : vector<8x64xf32>
    %682 = arith.mulf %681, %677 : vector<8x64xf32>
    %cst_237 = arith.constant 1.42141378 : f32
    %683 = vector.broadcast %cst_237 : f32 to vector<8x64xf32>
    %684 = arith.addf %682, %683 : vector<8x64xf32>
    %685 = arith.mulf %684, %677 : vector<8x64xf32>
    %cst_238 = arith.constant 0.284496725 : f32
    %686 = vector.broadcast %cst_238 : f32 to vector<8x64xf32>
    %687 = arith.subf %685, %686 : vector<8x64xf32>
    %688 = arith.mulf %687, %677 : vector<8x64xf32>
    %cst_239 = arith.constant 0.254829586 : f32
    %689 = vector.broadcast %cst_239 : f32 to vector<8x64xf32>
    %690 = arith.addf %688, %689 : vector<8x64xf32>
    %691 = arith.mulf %690, %677 : vector<8x64xf32>
    %cst_240 = arith.constant 0.000000e+00 : f32
    %692 = vector.broadcast %cst_240 : f32 to vector<8x64xf32>
    %693 = arith.subf %692, %670 : vector<8x64xf32>
    %694 = arith.mulf %693, %670 : vector<8x64xf32>
    %695 = math.exp %694 : vector<8x64xf32>
    %696 = arith.mulf %691, %695 : vector<8x64xf32>
    %cst_241 = arith.constant 1.000000e+00 : f32
    %697 = vector.broadcast %cst_241 : f32 to vector<8x64xf32>
    %698 = arith.subf %697, %696 : vector<8x64xf32>
    %cst_242 = arith.constant 0.000000e+00 : f32
    %699 = vector.broadcast %cst_242 : f32 to vector<8x64xf32>
    %700 = arith.cmpf oge, %670, %699 : vector<8x64xf32>
    %cst_243 = arith.constant 0.000000e+00 : f32
    %701 = vector.broadcast %cst_243 : f32 to vector<8x64xf32>
    %702 = arith.subf %701, %698 : vector<8x64xf32>
    %703 = arith.select %700, %698, %702 : vector<8x64xi1>, vector<8x64xf32>
    %cst_244 = arith.constant 1.000000e+00 : f32
    %704 = vector.broadcast %cst_244 : f32 to vector<8x64xf32>
    %705 = arith.addf %704, %703 : vector<8x64xf32>
    %706 = arith.mulf %668, %705 : vector<8x64xf32>
    %707 = vector.extract_strided_slice %665 {offsets = [0, 64], sizes = [8, 8], strides = [1, 1]} : vector<8x72xf32> to vector<8x8xf32>
    %cst_245 = arith.constant 0.000000e+00 : f32
    %708 = vector.broadcast %cst_245 : f32 to vector<8x8xf32>
    %709 = arith.cmpf ogt, %707, %708 : vector<8x8xf32>
    %cst_246 = arith.constant 0.000000e+00 : f32
    %710 = vector.broadcast %cst_246 : f32 to vector<8x8xf32>
    %711 = arith.minimumf %707, %710 : vector<8x8xf32>
    %712 = math.exp %711 : vector<8x8xf32>
    %cst_247 = arith.constant 1.000000e+00 : f32
    %713 = vector.broadcast %cst_247 : f32 to vector<8x8xf32>
    %714 = arith.subf %712, %713 : vector<8x8xf32>
    %715 = arith.select %709, %707, %714 : vector<8x8xi1>, vector<8x8xf32>
    %716 = tpu.concatenate %706, %715 in 1 : vector<8x64xf32>, vector<8x8xf32> -> vector<8x72xf32>
    %c1_248 = arith.constant 1 : index
    %c0_249 = arith.constant 0 : index
    %c0_250 = arith.constant 0 : index
    %717 = vector.load %arg15[%c1_248, %c0_249, %c0_250] : memref<2x72x32xf32, #tpu.memory_space<vmem>>, vector<1x72x32xf32>
    %718 = vector.shape_cast %717 : vector<1x72x32xf32> to vector<72x32xf32>
    %cst_251 = arith.constant dense<0.000000e+00> : vector<8x32xf32>
    %719 = tpu.matmul %716, %718, %cst_251 {dimension_numbers = #tpu.dot_dimension_numbers<[1], [0], [0], [1], [0, 0, 1, 1], [], []>} : vector<8x72xf32>, vector<72x32xf32>, vector<8x32xf32> -> vector<8x32xf32>
    %c1_252 = arith.constant 1 : index
    %c0_253 = arith.constant 0 : index
    %c0_254 = arith.constant 0 : index
    %720 = vector.load %arg16[%c1_252, %c0_253, %c0_254] : memref<2x1x32xf32, #tpu.memory_space<vmem>>, vector<1x1x32xf32>
    %721 = vector.shape_cast %720 : vector<1x1x32xf32> to vector<1x32xf32>
    %722 = vector.broadcast %721 : vector<1x32xf32> to vector<8x32xf32>
    %723 = arith.addf %719, %722 : vector<8x32xf32>
    %724 = arith.addf %658, %723 : vector<8x32xf32>
    %c1_255 = arith.constant 1 : index
    %c0_256 = arith.constant 0 : index
    %c0_257 = arith.constant 0 : index
    %725 = vector.load %arg17[%c1_255, %c0_256, %c0_257] : memref<2x2x32xf32, #tpu.memory_space<vmem>>, vector<1x2x32xf32>
    %726 = vector.shape_cast %725 : vector<1x2x32xf32> to vector<2x32xf32>
    %cst_258 = arith.constant dense<0.000000e+00> : vector<8xf32>
    %727 = vector.multi_reduction <add>, %724, %cst_258 [1] : vector<8x32xf32> to vector<8xf32>
    %728 = vector.shape_cast %727 : vector<8xf32> to vector<8x1xf32>
    %cst_259 = arith.constant 3.200000e+01 : f32
    %729 = vector.broadcast %cst_259 : f32 to vector<8x1xf32>
    %730 = arith.divf %728, %729 : vector<8x1xf32>
    %731 = vector.broadcast %730 : vector<8x1xf32> to vector<8x32xf32>
    %732 = arith.subf %724, %731 : vector<8x32xf32>
    %733 = arith.mulf %732, %732 : vector<8x32xf32>
    %cst_260 = arith.constant dense<0.000000e+00> : vector<8xf32>
    %734 = vector.multi_reduction <add>, %733, %cst_260 [1] : vector<8x32xf32> to vector<8xf32>
    %735 = vector.shape_cast %734 : vector<8xf32> to vector<8x1xf32>
    %cst_261 = arith.constant 3.200000e+01 : f32
    %736 = vector.broadcast %cst_261 : f32 to vector<8x1xf32>
    %737 = arith.divf %735, %736 : vector<8x1xf32>
    %738 = vector.broadcast %730 : vector<8x1xf32> to vector<8x32xf32>
    %739 = arith.subf %724, %738 : vector<8x32xf32>
    %cst_262 = arith.constant 9.99999974E-6 : f32
    %740 = vector.broadcast %cst_262 : f32 to vector<8x1xf32>
    %741 = arith.addf %737, %740 : vector<8x1xf32>
    %742 = math.rsqrt %741 : vector<8x1xf32>
    %743 = vector.broadcast %742 : vector<8x1xf32> to vector<8x32xf32>
    %744 = arith.mulf %739, %743 : vector<8x32xf32>
    %745 = vector.extract_strided_slice %726 {offsets = [0, 0], sizes = [1, 32], strides = [1, 1]} : vector<2x32xf32> to vector<1x32xf32>
    %746 = vector.broadcast %745 : vector<1x32xf32> to vector<8x32xf32>
    %747 = arith.mulf %744, %746 : vector<8x32xf32>
    %748 = vector.extract_strided_slice %726 {offsets = [1, 0], sizes = [1, 32], strides = [1, 1]} : vector<2x32xf32> to vector<1x32xf32>
    %749 = vector.broadcast %748 : vector<1x32xf32> to vector<8x32xf32>
    %750 = arith.addf %747, %749 : vector<8x32xf32>
    %c0_263 = arith.constant 0 : index
    %c0_264 = arith.constant 0 : index
    %c0_265 = arith.constant 0 : index
    %751 = vector.load %arg18[%c0_263, %c0_264, %c0_265] : memref<1x8x32xf32, #tpu.memory_space<vmem>>, vector<1x8x32xf32>
    %752 = vector.shape_cast %751 : vector<1x8x32xf32> to vector<8x32xf32>
    %753 = vector.shape_cast %750 : vector<8x32xf32> to vector<1x8x32xf32>
    tpu.vector_store %arg18[%c0_263, %c0_264, %c0_265], %753 {strides = array<i32>} : memref<1x8x32xf32, #tpu.memory_space<vmem>>, vector<1x8x32xf32>,
    return
  }
  func.func @transform_0(%arg0: i32) -> (i32, i32, i32) {
    %c0_i32 = arith.constant 0 : i32
    %c0_i32_0 = arith.constant 0 : i32
    %c0_i32_1 = arith.constant 0 : i32
    return %arg0, %c0_i32, %c0_i32_0 : i32, i32, i32
  }
  func.func @transform_1(%arg0: i32) -> (i32, i32, i32, i32) {
    %c0_i32 = arith.constant 0 : i32
    %c0_i32_0 = arith.constant 0 : i32
    %c0_i32_1 = arith.constant 0 : i32
    %c0_i32_2 = arith.constant 0 : i32
    return %arg0, %c0_i32, %c0_i32_0, %c0_i32_1 : i32, i32, i32, i32
  }
  func.func @transform_2(%arg0: i32) -> (i32, i32, i32) {
    %c0_i32 = arith.constant 0 : i32
    %c0_i32_0 = arith.constant 0 : i32
    %c0_i32_1 = arith.constant 0 : i32
    %c0_i32_2 = arith.constant 0 : i32
    return %c0_i32, %c0_i32_0, %c0_i32_1 : i32, i32, i32
  }
  func.func @transform_3(%arg0: i32) -> (i32, i32) {
    %c0_i32 = arith.constant 0 : i32
    %c0_i32_0 = arith.constant 0 : i32
    %c0_i32_1 = arith.constant 0 : i32
    return %c0_i32, %c0_i32_0 : i32, i32
  }
  func.func @transform_4(%arg0: i32) -> (i32, i32) {
    %c0_i32 = arith.constant 0 : i32
    %c0_i32_0 = arith.constant 0 : i32
    %c0_i32_1 = arith.constant 0 : i32
    return %c0_i32, %c0_i32_0 : i32, i32
  }
  func.func @transform_5(%arg0: i32) -> (i32, i32, i32) {
    %c0_i32 = arith.constant 0 : i32
    %c0_i32_0 = arith.constant 0 : i32
    %c0_i32_1 = arith.constant 0 : i32
    %c0_i32_2 = arith.constant 0 : i32
    return %c0_i32, %c0_i32_0, %c0_i32_1 : i32, i32, i32
  }
  func.func @transform_6(%arg0: i32) -> (i32, i32, i32) {
    %c0_i32 = arith.constant 0 : i32
    %c0_i32_0 = arith.constant 0 : i32
    %c0_i32_1 = arith.constant 0 : i32
    %c0_i32_2 = arith.constant 0 : i32
    return %c0_i32, %c0_i32_0, %c0_i32_1 : i32, i32, i32
  }
  func.func @transform_7(%arg0: i32) -> (i32, i32, i32) {
    %c0_i32 = arith.constant 0 : i32
    %c0_i32_0 = arith.constant 0 : i32
    %c0_i32_1 = arith.constant 0 : i32
    %c0_i32_2 = arith.constant 0 : i32
    return %c0_i32, %c0_i32_0, %c0_i32_1 : i32, i32, i32
  }
  func.func @transform_8(%arg0: i32) -> (i32, i32, i32) {
    %c0_i32 = arith.constant 0 : i32
    %c0_i32_0 = arith.constant 0 : i32
    %c0_i32_1 = arith.constant 0 : i32
    %c0_i32_2 = arith.constant 0 : i32
    return %c0_i32, %c0_i32_0, %c0_i32_1 : i32, i32, i32
  }
  func.func @transform_9(%arg0: i32) -> (i32, i32, i32) {
    %c0_i32 = arith.constant 0 : i32
    %c0_i32_0 = arith.constant 0 : i32
    %c0_i32_1 = arith.constant 0 : i32
    %c0_i32_2 = arith.constant 0 : i32
    return %c0_i32, %c0_i32_0, %c0_i32_1 : i32, i32, i32
  }
  func.func @transform_10(%arg0: i32) -> (i32, i32, i32) {
    %c0_i32 = arith.constant 0 : i32
    %c0_i32_0 = arith.constant 0 : i32
    %c0_i32_1 = arith.constant 0 : i32
    %c0_i32_2 = arith.constant 0 : i32
    return %c0_i32, %c0_i32_0, %c0_i32_1 : i32, i32, i32
  }
  func.func @transform_11(%arg0: i32) -> (i32, i32, i32) {
    %c0_i32 = arith.constant 0 : i32
    %c0_i32_0 = arith.constant 0 : i32
    %c0_i32_1 = arith.constant 0 : i32
    %c0_i32_2 = arith.constant 0 : i32
    return %c0_i32, %c0_i32_0, %c0_i32_1 : i32, i32, i32
  }
  func.func @transform_12(%arg0: i32) -> (i32, i32, i32) {
    %c0_i32 = arith.constant 0 : i32
    %c0_i32_0 = arith.constant 0 : i32
    %c0_i32_1 = arith.constant 0 : i32
    %c0_i32_2 = arith.constant 0 : i32
    return %c0_i32, %c0_i32_0, %c0_i32_1 : i32, i32, i32
  }
  func.func @transform_13(%arg0: i32) -> (i32, i32, i32) {
    %c0_i32 = arith.constant 0 : i32
    %c0_i32_0 = arith.constant 0 : i32
    %c0_i32_1 = arith.constant 0 : i32
    %c0_i32_2 = arith.constant 0 : i32
    return %c0_i32, %c0_i32_0, %c0_i32_1 : i32, i32, i32
  }
  func.func @transform_14(%arg0: i32) -> (i32, i32, i32) {
    %c0_i32 = arith.constant 0 : i32
    %c0_i32_0 = arith.constant 0 : i32
    %c0_i32_1 = arith.constant 0 : i32
    %c0_i32_2 = arith.constant 0 : i32
    return %c0_i32, %c0_i32_0, %c0_i32_1 : i32, i32, i32
  }
  func.func @transform_15(%arg0: i32) -> (i32, i32, i32) {
    %c0_i32 = arith.constant 0 : i32
    %c0_i32_0 = arith.constant 0 : i32
    %c0_i32_1 = arith.constant 0 : i32
    %c0_i32_2 = arith.constant 0 : i32
    return %c0_i32, %c0_i32_0, %c0_i32_1 : i32, i32, i32
  }
  func.func @transform_16(%arg0: i32) -> (i32, i32, i32) {
    %c0_i32 = arith.constant 0 : i32
    %c0_i32_0 = arith.constant 0 : i32
    %c0_i32_1 = arith.constant 0 : i32
    %c0_i32_2 = arith.constant 0 : i32
    return %c0_i32, %c0_i32_0, %c0_i32_1 : i32, i32, i32
  }
  func.func @transform_17(%arg0: i32) -> (i32, i32, i32) {
    %c0_i32 = arith.constant 0 : i32
    %c0_i32_0 = arith.constant 0 : i32
    %c0_i32_1 = arith.constant 0 : i32
    return %arg0, %c0_i32, %c0_i32_0 : i32, i32, i32
  }
}

</mosaic_0001>

<bundles_post_ra>
// kernel: custom_wavlm_encoder.1
= control target key start
LH: loop header
LB: loop body
LE: loop exit
PB: predicated region body
PF: predicated region fallthrough
CT: control target
= control target key end

     0   :  { %s5613_s0 = inlined_call_operand.vmem [shape: f32[2,8,32], index: 0, kind: input, shape index: {}]   ;;  %s5614_s1 = inlined_call_operand.vmem [shape: f32[2,4,8,128], index: 1, kind: input, shape index: {}]   ;;  %s5615_s2 = inlined_call_operand.vmem [shape: f32[4,128,8], index: 2, kind: input, shape index: {}]   ;;  %s5616_s3 = inlined_call_operand.vmem [shape: f32[1,32], index: 3, kind: input, shape index: {}]   ;;  %s5617_s4 = inlined_call_operand.vmem [shape: f32[2,32], index: 4, kind: input, shape index: {}]   ;;  %s5618_s5 = inlined_call_operand.vmem [shape: f32[4,8,8], index: 5, kind: input, shape index: {}]   ;;  %s5619_s6 = inlined_call_operand.vmem [shape: f32[2,32,128], index: 6, kind: input, shape index: {}]   ;;  %s5620_s7 = inlined_call_operand.vmem [shape: f32[2,1,128], index: 7, kind: input, shape index: {}]   ;;  %s5621_s8 = inlined_call_operand.vmem [shape: f32[2,1,4], index: 8, kind: input, shape index: {}]   ;;  %s5622_s9 = inlined_call_operand.vmem [shape: f32[2,32,32], index: 9, kind: input, shape index: {}]   ;;  %s5623_s10 = inlined_call_operand.vmem [shape: f32[2,1,32], index: 10, kind: input, shape index: {}]   ;;  %s5624_s11 = inlined_call_operand.vmem [shape: f32[2,2,32], index: 11, kind: input, shape index: {}]   ;;  %s5625_s12 = inlined_call_operand.vmem [shape: f32[2,32,72], index: 12, kind: input, shape index: {}]   ;;  %s5626_s13 = inlined_call_operand.vmem [shape: f32[2,1,72], index: 13, kind: input, shape index: {}]   ;;  %s5627_s14 = inlined_call_operand.vmem [shape: f32[2,72,32], index: 14, kind: input, shape index: {}]   ;;  %s5628_s15 = inlined_call_operand.vmem [shape: f32[2,1,32], index: 15, kind: input, shape index: {}]   ;;  %s5629_s16 = inlined_call_operand.vmem [shape: f32[2,2,32], index: 16, kind: input, shape index: {}]   ;;  %s5630_s17 = inlined_call_operand.hbm [shape: f32[2,8,32], index: 17, kind: output, shape index: {}]  }
   0x1   :  { %5654 = sst [smem:[#allocation11_spill]] %s5613_s0 }
   0x2   :  { %5655 = sst [smem:[#allocation12_spill]] %s5614_s1 }
   0x3   :  { %5656 = sst [smem:[#allocation13_spill]] %s5630_s17 }
   0x4   :  { %22 = vsyncpa [#allocation3], 0 }
   0x5   :  { %24 = vsyncpa [#allocation3 + $0x1], 0  ;;  %s4763_s24 = smov 0   ;;  %s4765_s25 = smov 0  }
   0x6   :  { %s4767_s26 = smov 0   ;;  %s4769_s27 = smov 0  }
   0x7 LB: > { %5657 = sst [smem:[#allocation5_spill]] %s4632_s24  ;;  %s4784_s28 = sadd.s32 4294967295, %s4644_s27   ;;  %s4644_s27 = sphi %s4769_s27, %s5686_s27   ;;  %s4640_s26 = sphi %s4767_s26, %s5688_s26   ;;  %s4636_s25 = sphi %s4765_s25, %s5690_s25   ;;  %s4632_s24 = sphi %s4763_s24, %s5689_s24  }
   0x8   : > { %5658 = sst [smem:[#allocation6_spill]] %s4640_s26  ;;  %s3588_s29 = sadd.s32 4294967294, %s4644_s27  }
   0x9   : > { %5659 = sst [smem:[#allocation7_spill]] %s4644_s27  ;;  %s4788_s0 = sadd.s32 1, %s4644_s27  }
   0xa   : > { %5660 = sst [smem:[#allocation8_spill]] %s4788_s0  ;;  %s404_s30 = sadd.s32 1, %s4640_s26 }
   0xb   : > { %s401_s18 = ssub.s32 %s4644_s27, %s4788_s0  ;;  %p414_p0 = scmp.ne.s32.totalorder %s4640_s26, %s4636_s25 }
   0xc   : > { %p402_p1 = scmp.eq.s32.totalorder %s401_s18, 0  ;;  %p415_p2 = scmp.eq.s32.totalorder %s4784_s28, 1 }
   0xd   : > { %p420_p3 = scmp.ne.s32.totalorder %s4636_s25, %s4632_s24  ;;  %p421_p4 = scmp.eq.s32.totalorder %s3588_s29, 1 }
   0xe   : > { %s4799_s19 = scalar_select %p402_p1, %s4640_s26, %s404_s30  }
   0xf   : > { %p4801_p5 = por %p415_p2, %p414_p0  ;;  %p4805_p6 = por %p421_p4, %p420_p3 }
  0x10   : > { %5661 = sst [smem:[#allocation9_spill]] %s4799_s19  ;;  %p3591_p7 = scmp.ge.s32.totalorder %s4644_s27, 1 }
  0x11   : > { %s5663_s20 = scalar_select %p4805_p6, 1, 0 }
  0x12   : > { %p499_p8 = scmp.lt.s32.totalorder %s4644_s27, 3 }
  0x13   : > { %5664 = sst [smem:[#allocation10_spill]] %s5663_s20 }
  0x14   : > { %p500_p9 = pnand %p3591_p7, %p499_p8 }
  0x15   : > { %v569_v0 = vld [vmem:[%s5615_s2] sm:$0xff] (!%p500_p9)  ;;  %v570_v1 = vld [vmem:[%s5615_s2 + $0x8] sm:$0xff] (!%p500_p9)  ;;  %v4646_v3 = vmov (!%p500_p9), 0.0|0.0   ;;  %v571_v6 = vld [vmem:[%s5615_s2 + $0x10] sm:$0xff] (!%p500_p9)  ;;  %vm4647_vm0 = vmmov (!%p500_p9), 0   ;;  %v4648_v11 = vmov (!%p500_p9), 0.0  }
  0x16   : > { %503 = sbr.rel (%p500_p9) target bundleno = 6651 (0x19fb), region = 88  ;;  %v3596_v2 = vld [vmem:[%s5615_s2 + $0x80] sm:$0xff] (!%p500_p9)  ;;  %4230 = vmatprep.subr.bf16.mxu0 (!%p500_p9), %v4646_v3  ;;  %4254 = vmatprep.subr.bf16.mxu1 (!%p500_p9), %v4646_v3  ;;  %v4231_v4 = vpack.c.bf16 (!%p500_p9), %v570_v1, %v569_v0  ;;  %v3597_v5 = vld [vmem:[%s5615_s2 + $0x88] sm:$0xff] (!%p500_p9)  ;;  %v572_v7 = vld [vmem:[%s5615_s2 + $0x18] sm:$0xff] (!%p500_p9)  ;;  %p555_p10 = scmp.lt.s32.totalorder (!%p500_p9), %s4784_s28, 1  ;;  %vm928_vm1 = vcmask (!%p500_p9), 64512  }
  0x17   : > { %v4255_v8 = vpack.c.bf16 (!%p500_p9), %v3597_v5, %v3596_v2  ;;  %v3598_v9 = vld [vmem:[%s5615_s2 + $0x90] sm:$0xff] (!%p500_p9)  ;;  %v3599_v10 = vld [vmem:[%s5615_s2 + $0x98] sm:$0xff] (!%p500_p9)  ;;  %3934 = vmatprep.mubr.msk.f32.mxu0 (!%p500_p9), %vm4647_vm0, %v4648_v11  ;;  %3969 = vmatprep.mubr.msk.f32.mxu1 (!%p500_p9), %vm4647_vm0, %v4648_v11  ;;  %v4234_v12 = vpack.c.bf16 (!%p500_p9), %v572_v7, %v571_v6  ;;  %v573_v14 = vld [vmem:[%s5615_s2 + $0x20] sm:$0xff] (!%p500_p9)  ;;  %s5665_s20 = sld [smem:[#allocation12_spill]] (!%p500_p9)  ;;  %s5652_s27 = smov (!%p500_p9), 8   ;;  %vm930_vm2 = vcmask (!%p500_p9), 130048  }
  0x18   : > { %4232 = vmatpush3.bf16.msra.mxu0 (!%p500_p9), %v4231_v4  ;;  %v4258_v13 = vpack.c.bf16 (!%p500_p9), %v3599_v10, %v3598_v9  ;;  %v574_v15 = vld [vmem:[%s5615_s2 + $0x28] sm:$0xff] (!%p500_p9)  ;;  %v3600_v16 = vld [vmem:[%s5615_s2 + $0xa0] sm:$0xff] (!%p500_p9)  ;;  %v575_v20 = vld [vmem:[%s5615_s2 + $0x30] sm:$0xff] (!%p500_p9)  ;;  %vm932_vm3 = vcmask (!%p500_p9), 195584   ;;  %s5666_s29 = sld [smem:[#allocation11_spill]] (!%p500_p9)  ;;  %vm971_vm5 = vcmask (!%p500_p9), 261120  }
  0x19   : > { %4256 = vmatpush3.bf16.msra.mxu1 (!%p500_p9), %v4255_v8  ;;  %4233 = vmatprep.subr.bf16.mxu0 (!%p500_p9), %v4646_v3  ;;  %v3601_v17 = vld [vmem:[%s5615_s2 + $0xa8] sm:$0xff] (!%p500_p9)  ;;  %v4237_v18 = vpack.c.bf16 (!%p500_p9), %v574_v15, %v573_v14  ;;  %v576_v21 = vld [vmem:[%s5615_s2 + $0x38] sm:$0xff] (!%p500_p9)  ;;  %v3602_v22 = vld [vmem:[%s5615_s2 + $0xb0] sm:$0xff] (!%p500_p9)  ;;  %s5644_s24 = smov (!%p500_p9), 88   ;;  %s4653_s0 = smov (!%p500_p9), 96   ;;  %vm1090_vm6 = vcmask (!%p500_p9), 31744  }
  0x1a   : > { %4257 = vmatprep.subr.bf16.mxu1 (!%p500_p9), %v4646_v3  ;;  %v4261_v19 = vpack.c.bf16 (!%p500_p9), %v3601_v17, %v3600_v16  ;;  %v3603_v23 = vld [vmem:[%s5615_s2 + $0xb8] sm:$0xff] (!%p500_p9)  ;;  %v4240_v24 = vpack.c.bf16 (!%p500_p9), %v576_v21, %v575_v20  ;;  %v577_v26 = vld [vmem:[%s5615_s2 + $0x40] sm:$0xff] (!%p500_p9)  ;;  %v578_v27 = vld [vmem:[%s5615_s2 + $0x48] sm:$0xff] (!%p500_p9)  ;;  %s5638_s17 = smov (!%p500_p9), 80   ;;  %s5639_s22 = smov (!%p500_p9), 72   ;;  %vm2130_vm8 = vcmask (!%p500_p9), 523264  }
  0x1b   : > { %v4264_v25 = vpack.c.bf16 (!%p500_p9), %v3603_v23, %v3602_v22  ;;  %v3604_v28 = vld [vmem:[%s5615_s2 + $0xc0] sm:$0xff] (!%p500_p9)  ;;  %v3605_v29 = vld [vmem:[%s5615_s2 + $0xc8] sm:$0xff] (!%p500_p9)  ;;  %v4243_v30 = vpack.c.bf16 (!%p500_p9), %v578_v27, %v577_v26  ;;  %v579_v32 = vld [vmem:[%s5615_s2 + $0x50] sm:$0xff] (!%p500_p9)  ;;  %s5650_s23 = smov (!%p500_p9), 112   ;;  %s5651_s19 = smov (!%p500_p9), 32   ;;  %vm2148_vm10 = vcmask (!%p500_p9), 588800  }
  0x1c   : > { %4235 = vmatpush3.bf16.msra.mxu0 (!%p500_p9), %v4234_v12  ;;  %v4267_v31 = vpack.c.bf16 (!%p500_p9), %v3605_v29, %v3604_v28  ;;  %v580_v33 = vld [vmem:[%s5615_s2 + $0x58] sm:$0xff] (!%p500_p9)  ;;  %v3606_v34 = vld [vmem:[%s5615_s2 + $0xd0] sm:$0xff] (!%p500_p9)  ;;  %v581_v38 = vld [vmem:[%s5615_s2 + $0x60] sm:$0xff] (!%p500_p9) }
  0x1d   : > { %4259 = vmatpush3.bf16.msra.mxu1 %v4258_v13  ;;  %4236 = vmatprep.subr.bf16.mxu0 %v4646_v3  ;;  %v3607_v35 = vld [vmem:[%s5615_s2 + $0xd8] sm:$0xff]  ;;  %v4246_v36 = vpack.c.bf16 %v580_v33, %v579_v32  ;;  %v582_v39 = vld [vmem:[%s5615_s2 + $0x68] sm:$0xff]  ;;  %v3608_v40 = vld [vmem:[%s5615_s2 + $0xe0] sm:$0xff]  ;;  %s4913_s26 = scalar_select %p555_p10, %s4784_s28, 1 }
  0x1e   : > { %4260 = vmatprep.subr.bf16.mxu1 %v4646_v3  ;;  %v4270_v37 = vpack.c.bf16 %v3607_v35, %v3606_v34  ;;  %v3609_v41 = vld [vmem:[%s5615_s2 + $0xe8] sm:$0xff]  ;;  %v4249_v42 = vpack.c.bf16 %v582_v39, %v581_v38  ;;  %v583_v44 = vld [vmem:[%s5615_s2 + $0x70] sm:$0xff]  ;;  %v584_v45 = vld [vmem:[%s5615_s2 + $0x78] sm:$0xff] }
  0x1f   : > { %v4273_v43 = vpack.c.bf16 %v3609_v41, %v3608_v40  ;;  %v3610_v46 = vld [vmem:[%s5615_s2 + $0xf0] sm:$0xff]  ;;  %v3611_v47 = vld [vmem:[%s5615_s2 + $0xf8] sm:$0xff]  ;;  %s3751_s18 = sshll.u32 %s4913_s26, 5  ;;  %v4252_v48 = vpack.c.bf16 %v584_v45, %v583_v44  ;;  %v3612_v50 = vld [vmem:[%s5615_s2 + $0x100] sm:$0xff] }
  0x20   : > { %4238 = vmatpush3.bf16.msra.mxu0 %v4237_v18  ;;  %v4276_v49 = vpack.c.bf16 %v3611_v47, %v3610_v46  ;;  %s4934_s21 = scalar_lea.vmem %s5665_s20, %s3751_s18  ;;  %v3613_v51 = vld [vmem:[%s5615_s2 + $0x108] sm:$0xff]  ;;  %v3628_v52 = vld [vmem:[%s5615_s2 + $0x180] sm:$0xff]  ;;  %v3614_v58 = vld [vmem:[%s5615_s2 + $0x110] sm:$0xff]  ;;  %s4651_s18 = smov 24  }
  0x21   : > { %4262 = vmatpush3.bf16.msra.mxu1 %v4261_v19  ;;  %4239 = vmatprep.subr.bf16.mxu0 %v4646_v3  ;;  %v3629_v53 = vld [vmem:[%s5615_s2 + $0x188] sm:$0xff]  ;;  %v565_v54 = vld [vmem:[%s4934_s21] sm:$0xff]  ;;  %v4279_v55 = vpack.c.bf16 %v3613_v51, %v3612_v50  ;;  %v3615_v59 = vld [vmem:[%s5615_s2 + $0x118] sm:$0xff]  ;;  %s3593_s20 = sshll.u32 %s4913_s26, 3  ;;  %s5642_s26 = smov 20  }
  0x22   : > { %4263 = vmatprep.subr.bf16.mxu1 %v4646_v3  ;;  %v566_v56 = vld [vmem:[%s4934_s21 + $0x8] sm:$0xff]  ;;  %v4303_v57 = vpack.c.bf16 %v3629_v53, %v3628_v52  ;;  %v3630_v60 = vld [vmem:[%s5615_s2 + $0x190] sm:$0xff]  ;;  %v3631_v61 = vld [vmem:[%s5615_s2 + $0x198] sm:$0xff]  ;;  %v4282_v62 = vpack.c.bf16 %v3615_v59, %v3614_v58  ;;  %s558_s30 = scalar_lea.vmem %s5666_s29, %s3593_s20  ;;  %s5643_s20 = smov 120  }
  0x23   : > { %v4306_v63 = vpack.c.bf16 %v3631_v61, %v3630_v60  ;;  %v3616_v0 = vld [vmem:[%s5615_s2 + $0x120] sm:$0xff]  ;;  %v3617_v1 = vld [vmem:[%s5615_s2 + $0x128] sm:$0xff]  ;;  %v3618_v7 = vld [vmem:[%s5615_s2 + $0x130] sm:$0xff]  ;;  %s4658_s29 = smov 28  }
  0x24   : > { %4241 = vmatpush3.bf16.msra.mxu0 %v4240_v24  ;;  %v3632_v2 = vld [vmem:[%s5615_s2 + $0x1a0] sm:$0xff]  ;;  %v3633_v4 = vld [vmem:[%s5615_s2 + $0x1a8] sm:$0xff]  ;;  %v4285_v5 = vpack.c.bf16 %v3617_v1, %v3616_v0  ;;  %v3619_v8 = vld [vmem:[%s5615_s2 + $0x138] sm:$0xff] }
  0x25   : > { %4265 = vmatpush3.bf16.msra.mxu1 %v4264_v25  ;;  %4242 = vmatprep.subr.bf16.mxu0 %v4646_v3  ;;  %v4309_v6 = vpack.c.bf16 %v3633_v4, %v3632_v2  ;;  %v3634_v9 = vld [vmem:[%s5615_s2 + $0x1b0] sm:$0xff]  ;;  %v3635_v10 = vld [vmem:[%s5615_s2 + $0x1b8] sm:$0xff]  ;;  %v4288_v12 = vpack.c.bf16 %v3619_v8, %v3618_v7  ;;  %v3620_v14 = vld [vmem:[%s5615_s2 + $0x140] sm:$0xff] }
  0x26   : > { %4266 = vmatprep.subr.bf16.mxu1 %v4646_v3  ;;  %v4312_v13 = vpack.c.bf16 %v3635_v10, %v3634_v9  ;;  %v3621_v15 = vld [vmem:[%s5615_s2 + $0x148] sm:$0xff]  ;;  %v3636_v16 = vld [vmem:[%s5615_s2 + $0x1c0] sm:$0xff]  ;;  %v3622_v20 = vld [vmem:[%s5615_s2 + $0x150] sm:$0xff] }
  0x27   : > { %v3637_v17 = vld [vmem:[%s5615_s2 + $0x1c8] sm:$0xff]  ;;  %v4291_v18 = vpack.c.bf16 %v3621_v15, %v3620_v14  ;;  %v3623_v21 = vld [vmem:[%s5615_s2 + $0x158] sm:$0xff]  ;;  %v3638_v22 = vld [vmem:[%s5615_s2 + $0x1d0] sm:$0xff] }
  0x28   : > { %4244 = vmatpush3.bf16.msra.mxu0 %v4243_v30  ;;  %v4315_v19 = vpack.c.bf16 %v3637_v17, %v3636_v16  ;;  %v3639_v23 = vld [vmem:[%s5615_s2 + $0x1d8] sm:$0xff]  ;;  %v4294_v24 = vpack.c.bf16 %v3623_v21, %v3622_v20  ;;  %v3624_v26 = vld [vmem:[%s5615_s2 + $0x160] sm:$0xff]  ;;  %v3625_v27 = vld [vmem:[%s5615_s2 + $0x168] sm:$0xff] }
  0x29   : > { %4268 = vmatpush3.bf16.msra.mxu1 %v4267_v31  ;;  %4245 = vmatprep.subr.bf16.mxu0 %v4646_v3  ;;  %v4318_v25 = vpack.c.bf16 %v3639_v23, %v3638_v22  ;;  %v3640_v28 = vld [vmem:[%s5615_s2 + $0x1e0] sm:$0xff]  ;;  %v3641_v29 = vld [vmem:[%s5615_s2 + $0x1e8] sm:$0xff]  ;;  %v4297_v30 = vpack.c.bf16 %v3625_v27, %v3624_v26  ;;  %v3626_v32 = vld [vmem:[%s5615_s2 + $0x170] sm:$0xff] }
  0x2a   : > { %4269 = vmatprep.subr.bf16.mxu1 %v4646_v3  ;;  %v4321_v31 = vpack.c.bf16 %v3641_v29, %v3640_v28  ;;  %v3627_v33 = vld [vmem:[%s5615_s2 + $0x178] sm:$0xff]  ;;  %v3642_v34 = vld [vmem:[%s5615_s2 + $0x1f0] sm:$0xff]  ;;  %v3644_v51 = vld [vmem:[%s5616_s3] ss:$0 sm:$0xff] }
  0x2b   : > { %v3643_v35 = vld [vmem:[%s5615_s2 + $0x1f8] sm:$0xff]  ;;  %v567_v38 = vld [vmem:[%s4934_s21 + $0x10] sm:$0xff]  ;;  %v1000_v27 = vld [vmem:[%s5619_s6] sm:$0xff] }
  0x2c   : > { %4247 = vmatpush3.bf16.msra.mxu0 %v4246_v36  ;;  %v4300_v36 = vpack.c.bf16 %v3627_v33, %v3626_v32  ;;  %v568_v39 = vld [vmem:[%s4934_s21 + $0x18] sm:$0xff]  ;;  %s4650_s21 = smov 16   ;;  %v1001_v28 = vld [vmem:[%s5619_s6 + $0x8] sm:$0xff] }
  0x2d   : > { %4271 = vmatpush3.bf16.msra.mxu1 %v4270_v37  ;;  %4248 = vmatprep.subr.bf16.mxu0 %v4646_v3  ;;  %v4324_v37 = vpack.c.bf16 %v3643_v35, %v3642_v34  ;;  %v4327_v29 = vpack.c.bf16 %v1001_v28, %v1000_v27  ;;  %v986_v35 = vlaneseq }
  0x2e   : > { %4272 = vmatprep.subr.bf16.mxu1 %v4646_v3 }
  0x30   : > { %4250 = vmatpush3.bf16.msra.mxu0 %v4249_v42 }
  0x31   : > { %4274 = vmatpush3.bf16.msra.mxu1 %v4273_v43  ;;  %4251 = vmatprep.subr.bf16.mxu0 %v4646_v3 }
  0x32   : > { %4275 = vmatprep.subr.bf16.mxu1 %v4646_v3 }
  0x34   : > { %4253 = vmatpush3.bf16.msra.mxu0 %v4252_v48 }
  0x35   : > { %4277 = vmatpush3.bf16.msra.mxu1 %v4276_v49  ;;  %4278 = vmatprep.subr.bf16.mxu0 %v4646_v3 }
  0x36   : > { %4302 = vmatprep.subr.bf16.mxu1 %v4646_v3 }
  0x37   : > { %3935 = vmatmul.mubr.f32.vlgmr.msra.gmra.mrb[0].mxu0 %v565_v54 }
  0x38   : > { %3970 = vmatmul.mubr.f32.vlgmr.msra.gmra.mrb[0].mxu1 %v566_v56  ;;  %4280 = vmatpush3.bf16.msra.mxu0 %v4279_v55 }
  0x39   : > { %4304 = vmatpush3.bf16.msra.mxu1 %v4303_v57  ;;  %4281 = vmatprep.subr.bf16.mxu0 %v4646_v3 }
  0x3a   : > { %4305 = vmatprep.subr.bf16.mxu1 %v4646_v3  ;;  %4004 = vmatprep.mubr.msk.f32.mxu0 %vm4647_vm0, %v4648_v11 }
  0x3b   : > { %4039 = vmatprep.mubr.msk.f32.mxu1 %vm4647_vm0, %v4648_v11 }
  0x3c   : > { %4283 = vmatpush3.bf16.msra.mxu0 %v4282_v62 }
  0x3d   : > { %4307 = vmatpush3.bf16.msra.mxu1 %v4306_v63  ;;  %4284 = vmatprep.subr.bf16.mxu0 %v4646_v3 }
  0x3e   : > { %4308 = vmatprep.subr.bf16.mxu1 %v4646_v3 }
  0x40   : > { %4286 = vmatpush3.bf16.msra.mxu0 %v4285_v5 }
  0x41   : > { %4310 = vmatpush3.bf16.msra.mxu1 %v4309_v6  ;;  %4287 = vmatprep.subr.bf16.mxu0 %v4646_v3 }
  0x42   : > { %4311 = vmatprep.subr.bf16.mxu1 %v4646_v3 }
  0x44   : > { %4289 = vmatpush3.bf16.msra.mxu0 %v4288_v12 }
  0x45   : > { %4313 = vmatpush3.bf16.msra.mxu1 %v4312_v13  ;;  %4290 = vmatprep.subr.bf16.mxu0 %v4646_v3 }
  0x46   : > { %4314 = vmatprep.subr.bf16.mxu1 %v4646_v3 }
  0x48   : > { %4292 = vmatpush3.bf16.msra.mxu0 %v4291_v18  ;;  %v564_v18 = vld [vmem:[%s558_s30] sm:$0xff]  ;;  %s5645_s30 = smov 104  }
  0x49   : > { %4316 = vmatpush3.bf16.msra.mxu1 %v4315_v19  ;;  %4293 = vmatprep.subr.bf16.mxu0 %v4646_v3 }
  0x4a   : > { %4317 = vmatprep.subr.bf16.mxu1 %v4646_v3 }
  0x4c   : > { %4295 = vmatpush3.bf16.msra.mxu0 %v4294_v24 }
  0x4d   : > { %4319 = vmatpush3.bf16.msra.mxu1 %v4318_v25  ;;  %4296 = vmatprep.subr.bf16.mxu0 %v4646_v3 }
  0x4e   : > { %4320 = vmatprep.subr.bf16.mxu1 %v4646_v3 }
  0x50   : > { %4298 = vmatpush3.bf16.msra.mxu0 %v4297_v30  ;;  %v1002_v30 = vld [vmem:[%s5619_s6 + $0x10] sm:$0xff] }
  0x51   : > { %4322 = vmatpush3.bf16.msra.mxu1 %v4321_v31  ;;  %4299 = vmatprep.subr.bf16.mxu0 %v4646_v3  ;;  %v1003_v31 = vld [vmem:[%s5619_s6 + $0x18] sm:$0xff] }
  0x52   : > { %4323 = vmatprep.subr.bf16.mxu1 %v4646_v3  ;;  %v4330_v32 = vpack.c.bf16 %v1003_v31, %v1002_v30 }
  0x54   : > { %4301 = vmatpush3.bf16.msra.mxu0 %v4300_v36 }
  0x55   : > { %4325 = vmatpush3.bf16.msra.mxu1 %v4324_v37  ;;  %4326 = vmatprep.subr.bf16.mxu0 %v4646_v3  ;;  %v987_v37 = vshrl.u32 %v986_v35, 7 }
  0x56   : > { %4053 = vmatprep.subr.mxu1 %v4648_v11 }
  0x57   : > { %4005 = vmatmul.mubr.f32.vlgmr.msra.gmra.mrb[2].mxu0 %v567_v38  ;;  %v5092_v38 = vsub.s32 0, %v987_v37 }
  0x58   : > { %4040 = vmatmul.mubr.f32.vlgmr.msra.gmra.mrb[2].mxu1 %v568_v39  ;;  %4050 = vmatprep.mubr.msk.f32.mxu0 %vm4647_vm0, %v4648_v11  ;;  %v970_v39 = vld [vmem:[%s5617_s4] sm:$0x3] }
  0x59   : > { %4055 = vmatprep.mubr.msk.f32.mxu1 %vm4647_vm0, %v4648_v11  ;;  %4328 = vmatpush3.bf16.msra.mxu0 %v4327_v29 }
  0x5a   : > { %4329 = vmatprep.subr.bf16.mxu0 %v4646_v3 }
  0x5d   : > { %4331 = vmatpush3.bf16.msra.mxu0 %v4330_v32 }
  0x5e   : > { %4063 = vmatprep.subr.mxu0 %v4648_v11 }
 0x10a   : > { %v651_v40 = vpop.f32.mrb[0].mxu0 }
 0x10b   : > { %v738_v41 = vpop.f32.mrb[0].mxu1  ;;  %v3936_v42 = vpop.f32.mrb[1].mxu0 }
 0x10c   : > { %917 = vrot.lane.b32.xlu0 %v738_v41, %s5652_s27  ;;  %v3971_v43 = vpop.f32.mrb[1].mxu1  ;;  %v989_v41 = vrot.slane %v970_v39, %v5092_v38 }
 0x12a   : > { %v825_v44 = vpop.f32.mrb[2].mxu0 }
 0x12b   : > { %v912_v45 = vpop.f32.mrb[2].mxu1  ;;  %921 = vrot.lane.b32.xlu0 %v825_v44, %s4650_s21  ;;  %v4006_v46 = vpop.f32.mrb[3].mxu0 }
 0x12c   : > { %v4041_v47 = vpop.f32.mrb[3].mxu1  ;;  %925 = vrot.lane.b32.xlu1 %v912_v45, %s4651_s18 }
 0x12d   : > { %v3647_v47 = vld [vmem:[%s5620_s7] ss:$0 sm:$0xff] }
 0x17e   : > { %v918_v48 = vpop.permute.xlu0 %917 }
 0x17f   : > { %v929_v49 = vsel %vm928_vm1, %v651_v40, %v918_v48  ;;  %v5097_v40 = vsub.s32 1, %v987_v37 }
 0x181   : > { %v994_v44 = vrot.slane %v970_v39, %v5097_v40 }
 0x19d   : > { %v922_v50 = vpop.permute.xlu0 %921 }
 0x19e   : > { %v931_v52 = vsel %vm930_vm2, %v929_v49, %v922_v50  ;;  %v926_v53 = vpop.permute.xlu1 %925 }
 0x19f   : > { %v933_v54 = vsel %vm932_vm3, %v931_v52, %v926_v53 }
 0x1a0   : > { %v941_v55 = vadd.f32 %v3644_v51, %v933_v54 }
 0x1a2   : > { %v943_v56 = vmul.f32 0.70710677, %v941_v55  ;;  %v942_v16 = vmul.f32 0.5, %v941_v55 }
 0x1a4   : > { %v944_v57 = vand.u32 2147483647, %v943_v56  ;;  %v958_v60 = vsub.f32 0.0, %v943_v56  ;;  %vm964_vm4 = vcmp.ge.f32.partialorder %v943_v56, 0.0 }
 0x1a6   : > { %v945_v58 = vmul.f32 0.3275911, %v944_v57  ;;  %v959_v62 = vmul.f32 %v958_v60, %v943_v56 }
 0x1a8   : > { %v946_v59 = vadd.f32 1.0, %v945_v58  ;;  %v960_v1 = vmul.f32 1.442695, %v959_v62 }
 0x1aa   : > { %4460 = vrcp.f32 %v946_v59 }
 0x1ab   : > { %4462 = vpow2.f32 %v960_v1 }
 0x1b4   : > { %v4461_v61 = vpop.eup %4460 }
 0x1b5   : > { %v949_v63 = vmul.f32 1.0614054, %v4461_v61  ;;  %v4463_v10 = vpop.eup %4462 }
 0x1b7   : > { %v3645_v0 = vadd.f32 -1.4531521, %v949_v63 }
 0x1b9   : > { %v951_v2 = vmul.f32 %v4461_v61, %v3645_v0 }
 0x1bb   : > { %v952_v4 = vadd.f32 1.4214138, %v951_v2 }
 0x1bd   : > { %v953_v5 = vmul.f32 %v4461_v61, %v952_v4 }
 0x1bf   : > { %v3646_v6 = vadd.f32 -0.28449672, %v953_v5 }
 0x1c1   : > { %v955_v7 = vmul.f32 %v4461_v61, %v3646_v6 }
 0x1c3   : > { %v956_v8 = vadd.f32 0.2548296, %v955_v7 }
 0x1c5   : > { %v957_v9 = vmul.f32 %v4461_v61, %v956_v8 }
 0x1c7   : > { %v962_v12 = vmul.f32 %v4463_v10, %v957_v9 }
 0x1c9   : > { %v963_v13 = vsub.f32 1.0, %v962_v12 }
 0x1cb   : > { %v965_v14 = vsub.f32 0.0, %v963_v13 }
 0x1cd   : > { %v966_v15 = vsel %vm964_vm4, %v963_v13, %v965_v14  ;;  %v4664_v13 = vmov 0   ;;  %v4665_v14 = vmov 1  }
 0x1ce   : > { %v967_v17 = vadd.f32 1.0, %v966_v15  ;;  %4451 = vset.pattern.permute.xlu1 %v4664_v13  ;;  %4452 = vset.pattern.permute.xlu0 %v4665_v14 }
 0x1d0   : > { %v968_v19 = vmul.f32 %v967_v17, %v942_v16 }
 0x1d2   : > { %v969_v20 = vadd.f32 %v968_v19, %v564_v18 }
 0x1d4   : > { %v972_v21 = vsel %vm971_vm5, %v969_v20, 0.0 }
 0x1d5   : > { %973 = vadd.xlane.f32.xlu1 %v972_v21 }
 0x262   : > { %v974_v22 = vpop.xlane.xlu1 %973 }
 0x263   : > { %v976_v23 = vmul.f32 0.03125, %v974_v22 }
 0x265   : > { %v977_v24 = vsub.f32 %v969_v20, %v976_v23 }
 0x267   : > { %v978_v25 = vmul.f32 %v977_v24, %v977_v24 }
 0x269   : > { %v979_v26 = vsel %vm971_vm5, %v978_v25, 0.0 }
 0x26a   : > { %980 = vadd.xlane.f32.xlu0 %v979_v26 }
 0x2f7   : > { %v981_v33 = vpop.xlane.xlu0 %980 }
 0x2f8   : > { %v982_v34 = vmul.f32 0.03125, %v981_v33 }
 0x2fa   : > { %v983_v36 = vadd.f32 1e-05, %v982_v34 }
 0x2fc   : > { %4464 = vrsqrt.f32 %v983_v36 }
 0x306   : > { %v4465_v42 = vpop.eup %4464 }
 0x307   : > { %v985_v43 = vmul.f32 %v4465_v42, %v977_v24 }
 0x309   : > { %v990_v45 = vmul.f32 %v989_v41, %v985_v43  ;;  %v3651_v43 = vld [vmem:[%s5621_s8] ss:$0 sm:$0xff] }
 0x30b   : > { %v5101_v46 = vadd.f32 %v994_v44, %v990_v45 }
 0x30d   : > { %4051 = vmatmul.mubr.msk.f32.vlgmr.msra.gmra.mrb[4].mxu0 %vm971_vm5, %v5101_v46 }
 0x30e   : > { %4065 = vmatprep.mubr.msk.f32.mxu0 %vm4647_vm0, %v4648_v11 }
 0x3e0   : > { %v1080_v48 = vpop.f32.mrb[4].mxu0 }
 0x3e1   : > { %v5110_v49 = vadd.f32 %v3647_v47, %v1080_v48  ;;  %v4052_v50 = vpop.f32.mrb[5].mxu0 }
 0x3e3   : > { %1328 = vrot.lane.b32.xlu1 %v5110_v49, %s5644_s24  ;;  %1128 = vrot.lane.b32.xlu0 %v5110_v49, %s4653_s0  ;;  %v1085_v51 = vmul.f32 0.35355338, %v5110_v49  ;;  %s5649_s24 = smov 64  }
 0x3e7   : > { %1527 = vrot.lane.b32.xlu0 %v5110_v49, %s5638_s17  ;;  %1326 = vrot.lane.b32.xlu1 %v1085_v51, %s5643_s20  ;;  %s5641_s17 = smov 12   ;;  %s5671_s20 = smov 64  }
 0x3eb   : > { %1726 = vrot.lane.b32.xlu0 %v5110_v49, %s5639_s22  ;;  %1525 = vrot.lane.b32.xlu1 %v1085_v51, %s5650_s23  ;;  %s5640_s22 = smov 4   ;;  %s5673_s23 = smov 120  }
 0x3ef   : > { %1100 = vrot.lane.b32.xlu0 %v5110_v49, %s4658_s29  ;;  %1724 = vrot.lane.b32.xlu1 %v1085_v51, %s5645_s30  ;;  %s5648_s30 = smov 48  }
 0x3f3   : > { %1304 = vrot.lane.b32.xlu0 %v5110_v49, %s5642_s26  ;;  %1087 = vrot.lane.b32.xlu1 %v5110_v49, %s5651_s19  ;;  %s5672_s26 = smov 88   ;;  %s5674_s19 = smov 80  }
 0x3f7   : > { %1503 = vrot.lane.b32.xlu0 %v5110_v49, %s5641_s17  ;;  %1292 = vrot.lane.b32.xlu1 %v5110_v49, %s4651_s18  ;;  %s5646_s17 = smov 40  }
 0x3fb   : > { %1702 = vrot.lane.b32.xlu0 %v5110_v49, %s5640_s22  ;;  %1491 = vrot.lane.b32.xlu1 %v5110_v49, %s4650_s21  ;;  %s5647_s22 = smov 56  }
 0x3ff   : > { %1690 = vrot.lane.b32.xlu1 %v5110_v49, %s5652_s27 }
 0x455   : > { %v1329_v52 = vpop.permute.xlu1 %1328  ;;  %v1129_v53 = vpop.permute.xlu0 %1128 }
 0x456   : > { %4054 = vmatpush3.xpose.msk.msra.mxu1 %vm928_vm1, %v1129_v53  ;;  %4064 = vmatpush3.xpose.msk.msra.mxu0 %vm928_vm1, %v1329_v52 }
 0x457   : > { %4073 = vmatprep.subr.mxu0 %v4648_v11  ;;  %4058 = vmatprep.subr.mxu1 %v4648_v11 }
 0x459   : > { %v1528_v54 = vpop.permute.xlu0 %1527  ;;  %v1327_v55 = vpop.permute.xlu1 %1326  ;;  %4056 = vmatmul.mubr.msk.f32.vlgmr.msra.gmra.mrb[4].mxu1 %vm928_vm1, %v1085_v51 }
 0x45a   : > { %4066 = vmatmul.mubr.msk.f32.vlgmr.msra.gmra.mrb[6].mxu0 %vm928_vm1, %v1327_v55  ;;  %4060 = vmatprep.mubr.msk.f32.mxu1 %vm4647_vm0, %v4648_v11 }
 0x45b   : > { %4074 = vmatpush3.xpose.msk.msra.mxu0 %vm928_vm1, %v1528_v54  ;;  %4075 = vmatprep.mubr.msk.f32.mxu0 %vm4647_vm0, %v4648_v11 }
 0x45c   : > { %4083 = vmatprep.subr.mxu0 %v4648_v11 }
 0x45d   : > { %v1727_v56 = vpop.permute.xlu0 %1726  ;;  %v1526_v57 = vpop.permute.xlu1 %1525 }
 0x45e   : > { %4076 = vmatmul.mubr.msk.f32.vlgmr.msra.gmra.mrb[8].mxu0 %vm928_vm1, %v1526_v57 }
 0x45f   : > { %4084 = vmatpush3.xpose.msk.msra.mxu0 %vm928_vm1, %v1727_v56  ;;  %4085 = vmatprep.mubr.msk.f32.mxu0 %vm4647_vm0, %v4648_v11 }
 0x460   : > { %4332 = vmatprep.subr.bf16.mxu0 %v4646_v3 }
 0x461   : > { %v1101_v58 = vpop.permute.xlu0 %1100  ;;  %v1725_v59 = vpop.permute.xlu1 %1724 }
 0x462   : > { %4086 = vmatmul.mubr.msk.f32.vlgmr.msra.gmra.mrb[10].mxu0 %vm928_vm1, %v1725_v59  ;;  %v1103_v60 = vsel %vm1090_vm6, %v1101_v58, 0.0 }
 0x463   : > { %1104 = vadd.xlane.f32.xlu0 %v1103_v60  ;;  %4101 = vmatprep.mubr.msk.f32.mxu0 %vm4647_vm0, %v4648_v11 }
 0x465   : > { %v1305_v61 = vpop.permute.xlu0 %1304  ;;  %v1088_v62 = vpop.permute.xlu1 %1087 }
 0x466   : > { %v1307_v63 = vsel %vm1090_vm6, %v1305_v61, 0.0  ;;  %v1091_v0 = vsel %vm1090_vm6, %v1088_v62, 0.0 }
 0x467   : > { %1308 = vadd.xlane.f32.xlu0 %v1307_v63  ;;  %1092 = vadd.xlane.f32.xlu1 %v1091_v0 }
 0x469   : > { %v1504_v1 = vpop.permute.xlu0 %1503  ;;  %v1293_v2 = vpop.permute.xlu1 %1292 }
 0x46a   : > { %v1506_v4 = vsel %vm1090_vm6, %v1504_v1, 0.0  ;;  %v1295_v5 = vsel %vm1090_vm6, %v1293_v2, 0.0 }
 0x46b   : > { %1507 = vadd.xlane.f32.xlu1 %v1506_v4  ;;  %1296 = vadd.xlane.f32.xlu0 %v1295_v5 }
 0x46d   : > { %v1703_v6 = vpop.permute.xlu0 %1702  ;;  %v1492_v7 = vpop.permute.xlu1 %1491 }
 0x46e   : > { %v1705_v8 = vsel %vm1090_vm6, %v1703_v6, 0.0  ;;  %v1494_v9 = vsel %vm1090_vm6, %v1492_v7, 0.0  ;;  %v4666_v6 = vmov 2  }
 0x46f   : > { %1706 = vadd.xlane.f32.xlu1 %v1705_v8  ;;  %1495 = vadd.xlane.f32.xlu0 %v1494_v9 }
 0x471   : > { %v1691_v10 = vpop.permute.xlu1 %1690 }
 0x472   : > { %v1693_v12 = vsel %vm1090_vm6, %v1691_v10, 0.0 }
 0x473   : > { %1694 = vadd.xlane.f32.xlu0 %v1693_v12 }
 0x4f0   : > { %v1105_v15 = vpop.xlane.xlu0 %1104 }
 0x4f1   : > { %v3650_v16 = vmul.f32 -1.442695, %v1105_v15 }
 0x4f3   : > { %4466 = vpow2.f32 %v3650_v16 }
 0x4f4   : > { %v1309_v17 = vpop.xlane.xlu0 %1308  ;;  %v1093_v18 = vpop.xlane.xlu1 %1092 }
 0x4f5   : > { %v3657_v19 = vmul.f32 -1.442695, %v1309_v17  ;;  %v3649_v20 = vmul.f32 -1.442695, %v1093_v18  ;;  %v4667_v17 = vmov 3  }
 0x4f7   : > { %4468 = vpow2.f32 %v3657_v19 }
 0x4f8   : > { %4470 = vpow2.f32 %v3649_v20  ;;  %v1297_v21 = vpop.xlane.xlu0 %1296  ;;  %v1508_v22 = vpop.xlane.xlu1 %1507 }
 0x4f9   : > { %v3656_v23 = vmul.f32 -1.442695, %v1297_v21  ;;  %v3663_v24 = vmul.f32 -1.442695, %v1508_v22 }
 0x4fb   : > { %4472 = vpow2.f32 %v3656_v23 }
 0x4fc   : > { %4474 = vpow2.f32 %v3663_v24  ;;  %v1496_v25 = vpop.xlane.xlu0 %1495  ;;  %v1707_v26 = vpop.xlane.xlu1 %1706 }
 0x4fd   : > { %v4467_v27 = vpop.eup %4466  ;;  %v3662_v28 = vmul.f32 -1.442695, %v1496_v25  ;;  %v3669_v29 = vmul.f32 -1.442695, %v1707_v26 }
 0x4fe   : > { %v1109_v30 = vadd.f32 1.0, %v4467_v27 }
 0x4ff   : > { %4476 = vpow2.f32 %v3662_v28  ;;  %v5184_v28 = vld [vmem:[%s5618_s5 + $0x8] sm:$0xff] }
 0x500   : > { %4478 = vrcp.f32 %v1109_v30  ;;  %v1695_v31 = vpop.xlane.xlu0 %1694 }
 0x501   : > { %v4469_v32 = vpop.eup %4468  ;;  %4480 = vpow2.f32 %v3669_v29  ;;  %v3668_v33 = vmul.f32 -1.442695, %v1695_v31 }
 0x502   : > { %v4471_v34 = vpop.eup %4470  ;;  %v1313_v35 = vadd.f32 1.0, %v4469_v32 }
 0x503   : > { %v1097_v36 = vadd.f32 1.0, %v4471_v34  ;;  %4482 = vpow2.f32 %v3668_v33  ;;  %v5191_v33 = vld [vmem:[%s5618_s5 + $0x10] sm:$0xff] }
 0x504   : > { %4484 = vrcp.f32 %v1313_v35 }
 0x505   : > { %v4473_v37 = vpop.eup %4472  ;;  %4486 = vrcp.f32 %v1097_v36 }
 0x506   : > { %v4475_v39 = vpop.eup %4474  ;;  %v1301_v41 = vadd.f32 1.0, %v4473_v37 }
 0x507   : > { %v1512_v42 = vadd.f32 1.0, %v4475_v39  ;;  %v5198_v39 = vld [vmem:[%s5618_s5 + $0x18] sm:$0xff] }
 0x508   : > { %4488 = vrcp.f32 %v1301_v41 }
 0x509   : > { %v4477_v44 = vpop.eup %4476  ;;  %4490 = vrcp.f32 %v1512_v42 }
 0x50a   : > { %v4479_v45 = vpop.eup %4478  ;;  %v1500_v47 = vadd.f32 1.0, %v4477_v44 }
 0x50b   : > { %v4481_v48 = vpop.eup %4480  ;;  %v1118_v50 = vmul.f32 %v4479_v45, %v3651_v43 }
 0x50c   : > { %4492 = vrcp.f32 %v1500_v47  ;;  %v1711_v51 = vadd.f32 1.0, %v4481_v48 }
 0x50d   : > { %v4483_v52 = vpop.eup %4482  ;;  %v3652_v53 = vadd.f32 -1.0, %v1118_v50 }
 0x50e   : > { %v4485_v54 = vpop.eup %4484  ;;  %4494 = vrcp.f32 %v1711_v51  ;;  %v1699_v55 = vadd.f32 1.0, %v4483_v52 }
 0x50f   : > { %v4487_v56 = vpop.eup %4486  ;;  %v1316_v57 = vmul.f32 %v4485_v54, %v3651_v43 }
 0x510   : > { %4496 = vrcp.f32 %v1699_v55  ;;  %v1120_v58 = vmul.f32 %v4487_v56, %v3652_v53 }
 0x511   : > { %v3658_v59 = vadd.f32 -1.0, %v1316_v57 }
 0x512   : > { %v4489_v60 = vpop.eup %4488  ;;  %v1121_v61 = vadd.f32 2.0, %v1120_v58 }
 0x513   : > { %v4491_v62 = vpop.eup %4490  ;;  %v1318_v63 = vmul.f32 %v4489_v60, %v3658_v59 }
 0x514   : > { %1124 = vperm.xlu1 %4451, %v1121_v61   ;;  %v1515_v0 = vmul.f32 %v4491_v62, %v3651_v43 }
 0x515   : > { %v1319_v1 = vadd.f32 2.0, %v1318_v63 }
 0x516   : > { %v4493_v2 = vpop.eup %4492  ;;  %v3664_v4 = vadd.f32 -1.0, %v1515_v0 }
 0x517   : > { %1322 = vperm.xlu0 %4452, %v1319_v1  }
 0x518   : > { %v4495_v5 = vpop.eup %4494  ;;  %4453 = vset.pattern.permute.xlu1 %v4666_v6  ;;  %v1517_v7 = vmul.f32 %v4493_v2, %v3664_v4 }
 0x519   : > { %v1714_v8 = vmul.f32 %v4495_v5, %v3651_v43 }
 0x51a   : > { %v4497_v9 = vpop.eup %4496  ;;  %v1518_v10 = vadd.f32 2.0, %v1517_v7 }
 0x51b   : > { %v3670_v12 = vadd.f32 -1.0, %v1714_v8  ;;  %4455 = vset.pattern.permute.xlu0 %v4664_v13  ;;  %v5178_v13 = vld [vmem:[%s5618_s5] sm:$0xff] }
 0x51c   : > { %1521 = vperm.xlu1 %4453, %v1518_v10  }
 0x51d   : > { %v1716_v15 = vmul.f32 %v4497_v9, %v3670_v12 }
 0x51f   : > { %v1717_v16 = vadd.f32 2.0, %v1716_v15 }
 0x520   : > { %4454 = vset.pattern.permute.xlu1 %v4667_v17 }
 0x521   : > { %1720 = vperm.xlu1 %4454, %v1717_v16  }
 0x525   : > { %4457 = vset.pattern.permute.xlu1 %v4666_v6 }
 0x52c   : > { %v1201_v18 = vpop.f32.mrb[4].mxu1 }
 0x52d   : > { %v4057_v19 = vpop.f32.mrb[5].mxu1  ;;  %v1400_v20 = vpop.f32.mrb[6].mxu0 }
 0x52e   : > { %v4067_v21 = vpop.f32.mrb[7].mxu0 }
 0x531   : > { %v1599_v22 = vpop.f32.mrb[8].mxu0 }
 0x532   : > { %v4077_v23 = vpop.f32.mrb[9].mxu0 }
 0x535   : > { %v1798_v24 = vpop.f32.mrb[10].mxu0 }
 0x536   : > { %v4087_v25 = vpop.f32.mrb[11].mxu0 }
 0x537   : > { %v1904_v25 = vld [vmem:[%s5622_s9] sm:$0xff] }
 0x593   : > { %v1125_v26 = vpop.permute.xlu1 %1124 }
 0x594   : > { %v1127_v27 = vmul.f32 %v1125_v26, %v5178_v13  ;;  %v1905_v26 = vld [vmem:[%s5622_s9 + $0x8] sm:$0xff] }
 0x596   : > { %v1323_v29 = vpop.permute.xlu0 %1322  ;;  %v1202_v30 = vadd.f32 %v1201_v18, %v1127_v27  ;;  %v4333_v27 = vpack.c.bf16 %v1905_v26, %v1904_v25  ;;  %v2137_v25 = vld [vmem:[%s5627_s14 + $0x28] sm:$0xff] }
 0x597   : > { %v1325_v31 = vmul.f32 %v1323_v29, %v5184_v28  ;;  %v1906_v29 = vld [vmem:[%s5622_s9 + $0x10] sm:$0xff] }
 0x598   : > { %v1205_v32 = vsel %vm928_vm1, %v1202_v30, -inf  ;;  %4334 = vmatpush3.bf16.msra.mxu0 %v4333_v27  ;;  %v2138_v27 = vld [vmem:[%s5627_s14 + $0x30] sm:$0xff] }
 0x599   : > { %1206 = vmax.xlane.f32.xlu1 %v1205_v32  ;;  %v1401_v34 = vadd.f32 %v1400_v20, %v1325_v31  ;;  %4335 = vmatprep.subr.bf16.mxu0 %v4646_v3 }
 0x59b   : > { %v1522_v35 = vpop.permute.xlu1 %1521  ;;  %v1404_v36 = vsel %vm928_vm1, %v1401_v34, -inf }
 0x59c   : > { %v1524_v37 = vmul.f32 %v1522_v35, %v5191_v33  ;;  %1405 = vmax.xlane.f32.xlu0 %v1404_v36 }
 0x59e   : > { %v1600_v41 = vadd.f32 %v1599_v22, %v1524_v37 }
 0x5a0   : > { %v1721_v42 = vpop.permute.xlu1 %1720  ;;  %v1603_v43 = vsel %vm928_vm1, %v1600_v41, -inf }
 0x5a1   : > { %v1723_v44 = vmul.f32 %v1721_v42, %v5198_v39  ;;  %1604 = vmax.xlane.f32.xlu1 %v1603_v43 }
 0x5a3   : > { %v1799_v45 = vadd.f32 %v1798_v24, %v1723_v44 }
 0x5a5   : > { %v1802_v47 = vsel %vm928_vm1, %v1799_v45, -inf }
 0x5a6   : > { %1803 = vmax.xlane.f32.xlu1 %v1802_v47 }
 0x5b7   : > { %1216 = vrot.lane.b32.xlu1 %v5110_v49, %s5649_s24  ;;  %s5675_s24 = smov 72  }
 0x626   : > { %v1207_v48 = vpop.xlane.xlu1 %1206 }
 0x627   : > { %v1208_v50 = vsub.f32 %v1202_v30, %v1207_v48  ;;  %v1907_v30 = vld [vmem:[%s5622_s9 + $0x18] sm:$0xff] }
 0x628   : > { %v4336_v31 = vpack.c.bf16 %v1907_v30, %v1906_v29  ;;  %v2139_v29 = vld [vmem:[%s5627_s14 + $0x38] sm:$0xff] }
 0x629   : > { %v1209_v51 = vmul.f32 1.442695, %v1208_v50  ;;  %v1406_v52 = vpop.xlane.xlu0 %1405  ;;  %v4354_v30 = vpack.c.bf16 %v2139_v29, %v2138_v27  ;;  %v3686_v27 = vld [vmem:[%s5619_s6 + $0x38] sm:$0xff] }
 0x62a   : > { %v1407_v53 = vsub.f32 %v1401_v34, %v1406_v52  ;;  %4337 = vmatpush3.bf16.msra.mxu0 %v4336_v31  ;;  %v3674_v52 = vld [vmem:[%s5623_s10] ss:$0 sm:$0xff] }
 0x62b   : > { %4498 = vpow2.f32 %v1209_v51  ;;  %4338 = vmatprep.subr.bf16.mxu0 %v4646_v3  ;;  %v2140_v31 = vld [vmem:[%s5627_s14 + $0x40] sm:$0xff] }
 0x62c   : > { %v1408_v54 = vmul.f32 1.442695, %v1407_v53 }
 0x62e   : > { %4500 = vpow2.f32 %v1408_v54  ;;  %v1605_v55 = vpop.xlane.xlu1 %1604 }
 0x62f   : > { %v1606_v56 = vsub.f32 %v1600_v41, %v1605_v55 }
 0x631   : > { %v1607_v57 = vmul.f32 1.442695, %v1606_v56 }
 0x633   : > { %4502 = vpow2.f32 %v1607_v57  ;;  %v1804_v58 = vpop.xlane.xlu1 %1803 }
 0x634   : > { %v1805_v59 = vsub.f32 %v1799_v45, %v1804_v58 }
 0x635   : > { %v4499_v60 = vpop.eup %4498 }
 0x636   : > { %v1806_v61 = vmul.f32 1.442695, %v1805_v59  ;;  %v1211_v62 = vsel %vm928_vm1, %v4499_v60, 0.0 }
 0x637   : > { %1212 = vadd.xlane.f32.xlu1 %v1211_v62  ;;  %v1217_v63 = vpop.permute.xlu1 %1216 }
 0x638   : > { %v4501_v0 = vpop.eup %4500  ;;  %4504 = vpow2.f32 %v1806_v61  ;;  %4059 = vmatpush3.msra.mxu1 %v1217_v63  ;;  %v2013_v63 = vld [vmem:[%s5625_s12] sm:$0xff] }
 0x639   : > { %v1410_v1 = vsel %vm928_vm1, %v4501_v0, 0.0  ;;  %4068 = vmatprep.subr.mxu1 %v4648_v11 }
 0x63b   : > { %1411 = vadd.xlane.f32.xlu1 %v1410_v1 }
 0x63d   : > { %v4503_v2 = vpop.eup %4502 }
 0x63e   : > { %v1609_v4 = vsel %vm928_vm1, %v4503_v2, 0.0 }
 0x63f   : > { %1610 = vadd.xlane.f32.xlu1 %v1609_v4 }
 0x642   : > { %v4505_v5 = vpop.eup %4504 }
 0x643   : > { %v1808_v6 = vsel %vm928_vm1, %v4505_v5, 0.0 }
 0x644   : > { %1809 = vadd.xlane.f32.xlu0 %v1808_v6 }
 0x650   : > { %1614 = vrot.lane.b32.xlu1 %v5110_v49, %s5648_s30  ;;  %s5668_s30 = smov 112  }
 0x654   : > { %1813 = vrot.lane.b32.xlu1 %v5110_v49, %s5646_s17  ;;  %s5669_s17 = smov 104  }
 0x65a   : > { %1415 = vrot.lane.b32.xlu0 %v5110_v49, %s5647_s22  ;;  %s5670_s22 = smov 8  }
 0x6c4   : > { %v1213_v7 = vpop.xlane.xlu1 %1212 }
 0x6c5   : > { %4506 = vrcp.f32 %v1213_v7 }
 0x6c8   : > { %v1412_v8 = vpop.xlane.xlu1 %1411 }
 0x6c9   : > { %4508 = vrcp.f32 %v1412_v8  ;;  %v1989_v8 = vld [vmem:[%s5624_s11] sm:$0x3] }
 0x6cc   : > { %v1611_v9 = vpop.xlane.xlu1 %1610 }
 0x6cd   : > { %4510 = vrcp.f32 %v1611_v9  ;;  %v2006_v9 = vrot.slane %v1989_v8, %v5092_v38 }
 0x6cf   : > { %v4507_v10 = vpop.eup %4506 }
 0x6d0   : > { %v1215_v12 = vmul.f32 %v4507_v10, %v4499_v60  ;;  %v1615_v19 = vpop.permute.xlu1 %1614 }
 0x6d1   : > { %v1810_v15 = vpop.xlane.xlu0 %1809 }
 0x6d2   : > { %4512 = vrcp.f32 %v1810_v15  ;;  %4061 = vmatmul.mubr.msk.f32.vlgmr.msra.gmra.mrb[6].mxu1 %vm928_vm1, %v1215_v12  ;;  %v2011_v15 = vrot.slane %v1989_v8, %v5097_v40 }
 0x6d3   : > { %v4509_v16 = vpop.eup %4508  ;;  %4070 = vmatprep.mubr.msk.f32.mxu1 %vm4647_vm0, %v4648_v11 }
 0x6d4   : > { %v1414_v18 = vmul.f32 %v4509_v16, %v4501_v0  ;;  %v1814_v22 = vpop.permute.xlu1 %1813  ;;  %v2014_v0 = vld [vmem:[%s5625_s12 + $0x8] sm:$0xff] }
 0x6d5   : > { %v1416_v20 = vpop.permute.xlu0 %1415  ;;  %v4339_v1 = vpack.c.bf16 %v2014_v0, %v2013_v63 }
 0x6d6   : > { %4069 = vmatpush3.msra.mxu1 %v1416_v20  ;;  %v2133_v20 = vld [vmem:[%s5627_s14 + $0x8] sm:$0xff] }
 0x6d7   : > { %v4511_v49 = vpop.eup %4510  ;;  %4071 = vmatmul.mubr.msk.f32.vlgmr.msra.gmra.mrb[8].mxu1 %vm928_vm1, %v1414_v18  ;;  %4078 = vmatprep.subr.mxu1 %v4648_v11 }
 0x6d8   : > { %v1613_v21 = vmul.f32 %v4511_v49, %v4503_v2  ;;  %4079 = vmatpush3.msra.mxu1 %v1615_v19  ;;  %4080 = vmatprep.mubr.msk.f32.mxu1 %vm4647_vm0, %v4648_v11  ;;  %v2016_v2 = vld [vmem:[%s5625_s12 + $0x18] sm:$0xff]  ;;  %v2132_v19 = vld [vmem:[%s5627_s14] sm:$0xff]  ;;  %v2134_v49 = vld [vmem:[%s5627_s14 + $0x10] sm:$0xff] }
 0x6d9   : > { %4088 = vmatprep.subr.mxu1 %v4648_v11 }
 0x6db   : > { %4081 = vmatmul.mubr.msk.f32.vlgmr.msra.gmra.mrb[10].mxu1 %vm928_vm1, %v1613_v21  ;;  %v4345_v21 = vpack.c.bf16 %v2133_v20, %v2132_v19 }
 0x6dc   : > { %v4513_v23 = vpop.eup %4512  ;;  %4089 = vmatpush3.msra.mxu1 %v1814_v22  ;;  %4090 = vmatprep.mubr.msk.f32.mxu1 %vm4647_vm0, %v4648_v11  ;;  %v2135_v22 = vld [vmem:[%s5627_s14 + $0x18] sm:$0xff] }
 0x6dd   : > { %v1812_v24 = vmul.f32 %v4513_v23, %v4505_v5  ;;  %4356 = vmatprep.subr.bf16.mxu1 %v4646_v3  ;;  %v4348_v23 = vpack.c.bf16 %v2135_v22, %v2134_v49 }
 0x6df   : > { %4091 = vmatmul.mubr.msk.f32.vlgmr.msra.gmra.mrb[12].mxu1 %vm928_vm1, %v1812_v24  ;;  %v2136_v24 = vld [vmem:[%s5627_s14 + $0x20] sm:$0xff] }
 0x6e0   : > { %4144 = vmatprep.mubr.msk.f32.mxu1 %vm4647_vm0, %v4648_v11  ;;  %v4351_v26 = vpack.c.bf16 %v2137_v25, %v2136_v24  ;;  %v3683_v24 = vld [vmem:[%s5619_s6 + $0x20] sm:$0xff]  ;;  %v3684_v25 = vld [vmem:[%s5619_s6 + $0x28] sm:$0xff] }
 0x7a5   : > { %v1288_v32 = vpop.f32.mrb[6].mxu1 }
 0x7a6   : > { %v4062_v34 = vpop.f32.mrb[7].mxu1 }
 0x7aa   : > { %v1487_v35 = vpop.f32.mrb[8].mxu1 }
 0x7ab   : > { %1890 = vrot.lane.b32.xlu0 %v1487_v35, %s5652_s27  ;;  %v4072_v36 = vpop.f32.mrb[9].mxu1  ;;  %s5667_s27 = smov 32  }
 0x7ae   : > { %v1686_v37 = vpop.f32.mrb[10].mxu1 }
 0x7af   : > { %1894 = vrot.lane.b32.xlu1 %v1686_v37, %s4650_s21  ;;  %v4082_v41 = vpop.f32.mrb[11].mxu1 }
 0x7b2   : > { %v1885_v42 = vpop.f32.mrb[12].mxu1 }
 0x7b3   : > { %1898 = vrot.lane.b32.xlu0 %v1885_v42, %s4651_s18  ;;  %v4092_v43 = vpop.f32.mrb[13].mxu1 }
 0x81d   : > { %v1891_v44 = vpop.permute.xlu0 %1890 }
 0x81e   : > { %v1901_v47 = vsel %vm928_vm1, %v1288_v32, %v1891_v44  ;;  %v3676_v32 = vld [vmem:[%s5626_s13] ss:$0 sm:$0xff] }
 0x821   : > { %v1895_v45 = vpop.permute.xlu1 %1894 }
 0x822   : > { %v1902_v48 = vsel %vm930_vm2, %v1901_v47, %v1895_v45 }
 0x825   : > { %v1899_v50 = vpop.permute.xlu0 %1898 }
 0x826   : > { %v1903_v51 = vsel %vm932_vm3, %v1902_v48, %v1899_v50 }
 0x827   : > { %4102 = vmatmul.mubr.msk.f32.vlgmr.msra.gmra.mrb[12].mxu0 %vm971_vm5, %v1903_v51 }
 0x828   : > { %4112 = vmatprep.mubr.msk.f32.mxu0 %vm4647_vm0, %v4648_v11  ;;  %4340 = vmatpush3.bf16.msra.mxu0 %v4339_v1 }
 0x829   : > { %4341 = vmatprep.subr.bf16.mxu0 %v4646_v3 }
 0x8fa   : > { %v1984_v53 = vpop.f32.mrb[12].mxu0 }
 0x8fb   : > { %v1985_v54 = vadd.f32 %v3674_v52, %v1984_v53  ;;  %v4103_v55 = vpop.f32.mrb[13].mxu0 }
 0x8fd   : > { %v1988_v56 = vadd.f32 %v1985_v54, %v5101_v46  ;;  %v2015_v46 = vld [vmem:[%s5625_s12 + $0x10] sm:$0xff] }
 0x8fe   : > { %v4342_v4 = vpack.c.bf16 %v2016_v2, %v2015_v46 }
 0x8ff   : > { %v1990_v57 = vsel %vm971_vm5, %v1988_v56, 0.0 }
 0x900   : > { %1991 = vadd.xlane.f32.xlu1 %v1990_v57  ;;  %4343 = vmatpush3.bf16.msra.mxu0 %v4342_v4 }
 0x901   : > { %4344 = vmatprep.subr.bf16.mxu0 %v4646_v3 }
 0x98d   : > { %v1992_v58 = vpop.xlane.xlu1 %1991 }
 0x98e   : > { %v1993_v59 = vmul.f32 0.03125, %v1992_v58 }
 0x990   : > { %v1994_v60 = vsub.f32 %v1988_v56, %v1993_v59 }
 0x992   : > { %v1995_v61 = vmul.f32 %v1994_v60, %v1994_v60 }
 0x994   : > { %v1996_v62 = vsel %vm971_vm5, %v1995_v61, 0.0 }
 0x995   : > { %1997 = vadd.xlane.f32.xlu0 %v1996_v62 }
 0xa22   : > { %v1998_v5 = vpop.xlane.xlu0 %1997 }
 0xa23   : > { %v1999_v6 = vmul.f32 0.03125, %v1998_v5 }
 0xa25   : > { %v2000_v7 = vadd.f32 1e-05, %v1999_v6 }
 0xa27   : > { %4514 = vrsqrt.f32 %v2000_v7 }
 0xa31   : > { %v4515_v10 = vpop.eup %4514 }
 0xa32   : > { %v2002_v12 = vmul.f32 %v4515_v10, %v1994_v60 }
 0xa34   : > { %v2007_v16 = vmul.f32 %v2006_v9, %v2002_v12  ;;  %v3681_v9 = vld [vmem:[%s5628_s15] ss:$0 sm:$0xff] }
 0xa36   : > { %v5279_v18 = vadd.f32 %v2011_v15, %v2007_v16 }
 0xa38   : > { %4113 = vmatmul.mubr.msk.f32.vlgmr.msra.gmra.mrb[14].mxu0 %vm971_vm5, %v5279_v18 }
 0xa39   : > { %4133 = vmatprep.mubr.msk.f32.mxu0 %vm4647_vm0, %v4648_v11  ;;  %4346 = vmatpush3.bf16.msra.mxu0 %v4345_v21 }
 0xa3a   : > { %4347 = vmatprep.subr.bf16.mxu0 %v4646_v3 }
 0xa3d   : > { %4349 = vmatpush3.bf16.msra.mxu0 %v4348_v23 }
 0xa3e   : > { %4350 = vmatprep.subr.bf16.mxu0 %v4646_v3 }
 0xa41   : > { %4352 = vmatpush3.bf16.msra.mxu0 %v4351_v26  ;;  %v4357_v26 = vpack.c.bf16 %v3684_v25, %v3683_v24 }
 0xa42   : > { %4353 = vmatprep.subr.bf16.mxu0 %v4646_v3 }
 0xa43   : > { %4358 = vmatpush3.bf16.msra.mxu1 %v4357_v26 }
 0xa44   : > { %4359 = vmatprep.subr.bf16.mxu1 %v4646_v3 }
 0xa45   : > { %4355 = vmatpush3.bf16.msra.mxu0 %v4354_v30 }
 0xa46   : > { %4131 = vmatprep.subr.mxu0 %v4648_v11 }
 0xa49   : > { %4132 = vmatpush3.msra.mxu0 %v2140_v31 }
 0xa4a   : > { %4162 = vmatprep.subr.mxu0 %v4648_v11 }
 0xb0b   : > { %v2093_v34 = vpop.f32.mrb[14].mxu0 }
 0xb0c   : > { %v2094_v35 = vadd.f32 %v3676_v32, %v2093_v34  ;;  %v4114_v36 = vpop.f32.mrb[15].mxu0  ;;  %v2223_v34 = vld [vmem:[%s5629_s16] sm:$0x3] }
 0xb0e   : > { %v2098_v37 = vmul.f32 0.70710677, %v2094_v35  ;;  %v2125_v52 = vmin.f32 %v2094_v35, 0.0  ;;  %v2097_v4 = vmul.f32 0.5, %v2094_v35  ;;  %vm2124_vm9 = vcmp.gt.f32.partialorder %v2094_v35, 0.0 }
 0xb10   : > { %v2099_v41 = vand.u32 2147483647, %v2098_v37  ;;  %v2113_v44 = vsub.f32 0.0, %v2098_v37  ;;  %v2126_v55 = vmul.f32 1.442695, %v2125_v52  ;;  %vm2119_vm7 = vcmp.ge.f32.partialorder %v2098_v37, 0.0 }
 0xb12   : > { %v2100_v42 = vmul.f32 0.3275911, %v2099_v41  ;;  %v2114_v47 = vmul.f32 %v2113_v44, %v2098_v37  ;;  %v2245_v41 = vrot.slane %v2223_v34, %v5097_v40  ;;  %v3688_v44 = vld [vmem:[%s5620_s7 + $0x1] ss:$0 sm:$0xff] }
 0xb14   : > { %v2101_v43 = vadd.f32 1.0, %v2100_v42  ;;  %v2115_v51 = vmul.f32 1.442695, %v2114_v47 }
 0xb16   : > { %4516 = vrcp.f32 %v2101_v43 }
 0xb17   : > { %4518 = vpow2.f32 %v2115_v51 }
 0xb18   : > { %4520 = vpow2.f32 %v2126_v55 }
 0xb20   : > { %v4517_v45 = vpop.eup %4516 }
 0xb21   : > { %v2104_v48 = vmul.f32 1.0614054, %v4517_v45  ;;  %v4519_v61 = vpop.eup %4518 }
 0xb22   : > { %v4521_v0 = vpop.eup %4520 }
 0xb23   : > { %v3678_v50 = vadd.f32 -1.4531521, %v2104_v48  ;;  %v3680_v2 = vadd.f32 -1.0, %v4521_v0  ;;  %v5377_v0 = vld [vmem:[%s5621_s8 + $0x1] ss:$0 sm:$0xff] }
 0xb25   : > { %v2106_v53 = vmul.f32 %v4517_v45, %v3678_v50  ;;  %v2129_v7 = vsel %vm2124_vm9, %v2094_v35, %v3680_v2  ;;  %v2240_v35 = vrot.slane %v2223_v34, %v5092_v38 }
 0xb27   : > { %v2107_v54 = vadd.f32 1.4214138, %v2106_v53 }
 0xb29   : > { %v2108_v56 = vmul.f32 %v4517_v45, %v2107_v54 }
 0xb2b   : > { %v3679_v57 = vadd.f32 -0.28449672, %v2108_v56 }
 0xb2d   : > { %v2110_v58 = vmul.f32 %v4517_v45, %v3679_v57 }
 0xb2f   : > { %v2111_v59 = vadd.f32 0.2548296, %v2110_v58 }
 0xb31   : > { %v2112_v60 = vmul.f32 %v4517_v45, %v2111_v59 }
 0xb33   : > { %v2117_v62 = vmul.f32 %v4519_v61, %v2112_v60 }
 0xb35   : > { %v2118_v63 = vsub.f32 1.0, %v2117_v62 }
 0xb37   : > { %v2120_v1 = vsub.f32 0.0, %v2118_v63 }
 0xb39   : > { %v2121_v46 = vsel %vm2119_vm7, %v2118_v63, %v2120_v1 }
 0xb3a   : > { %v2122_v5 = vadd.f32 1.0, %v2121_v46 }
 0xb3c   : > { %v2123_v6 = vmul.f32 %v2122_v5, %v2097_v4 }
 0xb3e   : > { %v2131_v8 = vsel %vm2130_vm8, %v2123_v6, %v2129_v7 }
 0xb3f   : > { %4134 = vmatmul.mubr.msk.f32.vlgmr.msra.gmra.mrb[16].mxu0 %vm2148_vm10, %v2131_v8 }
 0xb40   : > { %4164 = vmatprep.mubr.msk.f32.mxu0 %vm4647_vm0, %v4648_v11 }
 0xc12   : > { %v2218_v10 = vpop.f32.mrb[16].mxu0 }
 0xc13   : > { %v2219_v12 = vadd.f32 %v3681_v9, %v2218_v10  ;;  %v4135_v15 = vpop.f32.mrb[17].mxu0 }
 0xc15   : > { %v2222_v16 = vadd.f32 %v2219_v12, %v5279_v18  ;;  %v3685_v18 = vld [vmem:[%s5619_s6 + $0x30] sm:$0xff] }
 0xc16   : > { %v4360_v29 = vpack.c.bf16 %v3686_v27, %v3685_v18 }
 0xc17   : > { %v2224_v19 = vsel %vm971_vm5, %v2222_v16, 0.0 }
 0xc18   : > { %2225 = vadd.xlane.f32.xlu0 %v2224_v19  ;;  %4361 = vmatpush3.bf16.msra.mxu1 %v4360_v29 }
 0xc19   : > { %4147 = vmatprep.subr.mxu1 %v4648_v11 }
 0xca5   : > { %v2226_v20 = vpop.xlane.xlu0 %2225 }
 0xca6   : > { %v2227_v49 = vmul.f32 0.03125, %v2226_v20 }
 0xca8   : > { %v2228_v21 = vsub.f32 %v2222_v16, %v2227_v49 }
 0xcaa   : > { %v2229_v22 = vmul.f32 %v2228_v21, %v2228_v21 }
 0xcac   : > { %v2230_v23 = vsel %vm971_vm5, %v2229_v22, 0.0 }
 0xcad   : > { %2231 = vadd.xlane.f32.xlu1 %v2230_v23 }
 0xd3a   : > { %v2232_v30 = vpop.xlane.xlu1 %2231 }
 0xd3b   : > { %v2233_v31 = vmul.f32 0.03125, %v2232_v30 }
 0xd3d   : > { %v2234_v32 = vadd.f32 1e-05, %v2233_v31 }
 0xd3f   : > { %4522 = vrsqrt.f32 %v2234_v32 }
 0xd49   : > { %v4523_v36 = vpop.eup %4522 }
 0xd4a   : > { %v2236_v37 = vmul.f32 %v4523_v36, %v2228_v21 }
 0xd4c   : > { %v2241_v42 = vmul.f32 %v2240_v35, %v2236_v37 }
 0xd4e   : > { %v5349_v43 = vadd.f32 %v2245_v41, %v2241_v42 }
 0xd50   : > { %4145 = vmatmul.mubr.msk.f32.vlgmr.msra.gmra.mrb[14].mxu1 %vm971_vm5, %v5349_v43 }
 0xd51   : > { %4149 = vmatprep.mubr.msk.f32.mxu1 %vm4647_vm0, %v4648_v11 }
 0xe23   : > { %v2329_v45 = vpop.f32.mrb[14].mxu1 }
 0xe24   : > { %v5358_v47 = vadd.f32 %v3688_v44, %v2329_v45  ;;  %v4146_v48 = vpop.f32.mrb[15].mxu1 }
 0xe26   : > { %2349 = vrot.lane.b32.xlu1 %v5358_v47, %s4658_s29  ;;  %2377 = vrot.lane.b32.xlu0 %v5358_v47, %s4653_s0  ;;  %v2335_v53 = vmul.f32 0.35355338, %v5358_v47  ;;  %s5677_s0 = smov 12   ;;  %s5678_s29 = smov 4  }
 0xe2a   : > { %2337 = vrot.lane.b32.xlu1 %v5358_v47, %s5667_s27  ;;  %s5676_s27 = smov 20  }
 0xe98   : > { %v2350_v50 = vpop.permute.xlu1 %2349  ;;  %v2378_v51 = vpop.permute.xlu0 %2377 }
 0xe99   : > { %4148 = vmatpush3.xpose.msk.msra.mxu1 %vm928_vm1, %v2378_v51  ;;  %v2352_v52 = vsel %vm1090_vm6, %v2350_v50, 0.0 }
 0xe9a   : > { %2353 = vadd.xlane.f32.xlu0 %v2352_v52  ;;  %4152 = vmatprep.subr.mxu1 %v4648_v11 }
 0xe9c   : > { %v2338_v54 = vpop.permute.xlu1 %2337  ;;  %4150 = vmatmul.mubr.msk.f32.vlgmr.msra.gmra.mrb[16].mxu1 %vm928_vm1, %v2335_v53 }
 0xe9d   : > { %v2340_v55 = vsel %vm1090_vm6, %v2338_v54, 0.0  ;;  %4154 = vmatprep.mubr.msk.f32.mxu1 %vm4647_vm0, %v4648_v11 }
 0xe9e   : > { %2341 = vadd.xlane.f32.xlu1 %v2340_v55 }
 0xf27   : > { %v2354_v56 = vpop.xlane.xlu0 %2353 }
 0xf28   : > { %v3692_v57 = vmul.f32 -1.442695, %v2354_v56 }
 0xf2a   : > { %4524 = vpow2.f32 %v3692_v57 }
 0xf2b   : > { %v2342_v58 = vpop.xlane.xlu1 %2341 }
 0xf2c   : > { %v3691_v59 = vmul.f32 -1.442695, %v2342_v58 }
 0xf2e   : > { %4526 = vpow2.f32 %v3691_v59 }
 0xf34   : > { %v4525_v60 = vpop.eup %4524 }
 0xf35   : > { %v2358_v61 = vadd.f32 1.0, %v4525_v60 }
 0xf37   : > { %4528 = vrcp.f32 %v2358_v61 }
 0xf38   : > { %v4527_v62 = vpop.eup %4526 }
 0xf39   : > { %v2346_v63 = vadd.f32 1.0, %v4527_v62 }
 0xf3b   : > { %4530 = vrcp.f32 %v2346_v63 }
 0xf41   : > { %v4529_v1 = vpop.eup %4528 }
 0xf42   : > { %v2367_v46 = vmul.f32 %v4529_v1, %v5377_v0 }
 0xf44   : > { %v3694_v2 = vadd.f32 -1.0, %v2367_v46 }
 0xf45   : > { %v4531_v4 = vpop.eup %4530 }
 0xf46   : > { %v2369_v5 = vmul.f32 %v4531_v4, %v3694_v2 }
 0xf48   : > { %v2370_v6 = vadd.f32 2.0, %v2369_v5 }
 0xf4a   : > { %2373 = vperm.xlu0 %4455, %v2370_v6  }
 0xf4e   : > { %2774 = vrot.lane.b32.xlu0 %v2335_v53, %s5668_s30  ;;  %s5679_s30 = smov 48  }
 0xf4f   : > { %4456 = vset.pattern.permute.xlu0 %v4665_v14 }
 0xf52   : > { %2973 = vrot.lane.b32.xlu0 %v2335_v53, %s5669_s17  ;;  %s5680_s17 = smov 56  }
 0xf56   : > { %2541 = vrot.lane.b32.xlu0 %v5358_v47, %s4651_s18 }
 0xf5a   : > { %2740 = vrot.lane.b32.xlu0 %v5358_v47, %s4650_s21 }
 0xf5e   : > { %2939 = vrot.lane.b32.xlu0 %v5358_v47, %s5670_s22 }
 0xf6f   : > { %v2450_v7 = vpop.f32.mrb[16].mxu1 }
 0xf70   : > { %v4151_v8 = vpop.f32.mrb[17].mxu1 }
 0xfc9   : > { %v2374_v9 = vpop.permute.xlu0 %2373 }
 0xfca   : > { %v2376_v10 = vmul.f32 %v2374_v9, %v5178_v13 }
 0xfcc   : > { %v2451_v12 = vadd.f32 %v2450_v7, %v2376_v10 }
 0xfcd   : > { %v2775_v15 = vpop.permute.xlu0 %2774 }
 0xfce   : > { %v2454_v14 = vsel %vm928_vm1, %v2451_v12, -inf }
 0xfcf   : > { %2455 = vmax.xlane.f32.xlu1 %v2454_v14 }
 0xfd1   : > { %v2974_v16 = vpop.permute.xlu0 %2973 }
 0xfd5   : > { %v2542_v19 = vpop.permute.xlu0 %2541 }
 0xfd6   : > { %v2544_v20 = vsel %vm1090_vm6, %v2542_v19, 0.0 }
 0xfd7   : > { %2545 = vadd.xlane.f32.xlu0 %v2544_v20 }
 0xfd9   : > { %v2741_v30 = vpop.permute.xlu0 %2740 }
 0xfda   : > { %v2743_v37 = vsel %vm1090_vm6, %v2741_v30, 0.0 }
 0xfdd   : > { %v2940_v42 = vpop.permute.xlu0 %2939 }
 0xfde   : > { %v2942_v45 = vsel %vm1090_vm6, %v2940_v42, 0.0 }
 0xfe0   : > { %2465 = vrot.lane.b32.xlu1 %v5358_v47, %s5671_s20  ;;  %s5681_s20 = smov 40  }
 0xfe4   : > { %2577 = vrot.lane.b32.xlu1 %v5358_v47, %s5672_s26 }
 0xfe8   : > { %2575 = vrot.lane.b32.xlu1 %v2335_v53, %s5673_s23 }
 0xfec   : > { %2776 = vrot.lane.b32.xlu1 %v5358_v47, %s5674_s19 }
0x105c   : > { %v2456_v13 = vpop.xlane.xlu1 %2455 }
0x105d   : > { %v2457_v49 = vsub.f32 %v2451_v12, %v2456_v13 }
0x105f   : > { %v2458_v21 = vmul.f32 1.442695, %v2457_v49 }
0x1060   : > { %v2466_v22 = vpop.permute.xlu1 %2465 }
0x1061   : > { %4532 = vpow2.f32 %v2458_v21  ;;  %4153 = vmatpush3.msra.mxu1 %v2466_v22 }
0x1062   : > { %4157 = vmatprep.subr.mxu1 %v4648_v11 }
0x1064   : > { %v2578_v25 = vpop.permute.xlu1 %2577  ;;  %v2546_v50 = vpop.xlane.xlu0 %2545 }
0x1065   : > { %v3698_v51 = vmul.f32 -1.442695, %v2546_v50 }
0x1068   : > { %v2576_v26 = vpop.permute.xlu1 %2575 }
0x106b   : > { %v4533_v23 = vpop.eup %4532 }
0x106c   : > { %v2460_v24 = vsel %vm928_vm1, %v4533_v23, 0.0  ;;  %v2777_v18 = vpop.permute.xlu1 %2776 }
0x106d   : > { %2461 = vadd.xlane.f32.xlu1 %v2460_v24 }
0x107e   : > { %2975 = vrot.lane.b32.xlu1 %v5358_v47, %s5675_s24  ;;  %s552_s24 = sand.u32 1, %s4636_s25  }
0x107f   : > { %s3504_s23 = scalar_lea.sflag [#allocation3], %s552_s24 }
0x1082   : > { %2553 = vrot.lane.b32.xlu1 %v5358_v47, %s5676_s27  ;;  %s3592_s27 = sshll.u32 %s552_s24, 3 }
0x1086   : > { %2752 = vrot.lane.b32.xlu1 %v5358_v47, %s5677_s0 }
0x108a   : > { %2951 = vrot.lane.b32.xlu1 %v5358_v47, %s5678_s29 }
0x10fa   : > { %v2462_v27 = vpop.xlane.xlu1 %2461 }
0x10fb   : > { %4534 = vrcp.f32 %v2462_v27 }
0x10fc   : > { %4536 = vpow2.f32 %v3698_v51 }
0x10fe   : > { %v2976_v29 = vpop.permute.xlu1 %2975 }
0x1102   : > { %v2554_v31 = vpop.permute.xlu1 %2553 }
0x1103   : > { %v2556_v32 = vsel %vm1090_vm6, %v2554_v31, 0.0 }
0x1104   : > { %2557 = vadd.xlane.f32.xlu1 %v2556_v32 }
0x1105   : > { %v4535_v34 = vpop.eup %4534 }
0x1106   : > { %v2464_v35 = vmul.f32 %v4535_v34, %v4533_v23  ;;  %v2753_v36 = vpop.permute.xlu1 %2752  ;;  %v4537_v62 = vpop.eup %4536 }
0x1107   : > { %v2755_v41 = vsel %vm1090_vm6, %v2753_v36, 0.0  ;;  %v2550_v46 = vadd.f32 1.0, %v4537_v62 }
0x1108   : > { %4155 = vmatmul.mubr.msk.f32.vlgmr.msra.gmra.mrb[18].mxu1 %vm928_vm1, %v2464_v35  ;;  %2744 = vadd.xlane.f32.xlu1 %v2743_v37 }
0x1109   : > { %4158 = vmatpush3.xpose.msk.msra.mxu1 %vm928_vm1, %v2578_v25  ;;  %2756 = vadd.xlane.f32.xlu0 %v2755_v41 }
0x110a   : > { %v2952_v44 = vpop.permute.xlu1 %2951  ;;  %4159 = vmatprep.mubr.msk.f32.mxu1 %vm4647_vm0, %v4648_v11  ;;  %4167 = vmatprep.subr.mxu1 %v4648_v11 }
0x110b   : > { %v2954_v48 = vsel %vm1090_vm6, %v2952_v44, 0.0 }
0x110c   : > { %4160 = vmatmul.mubr.msk.f32.vlgmr.msra.gmra.mrb[20].mxu1 %vm928_vm1, %v2576_v26  ;;  %2943 = vadd.xlane.f32.xlu1 %v2942_v45 }
0x110d   : > { %4168 = vmatpush3.xpose.msk.msra.mxu1 %vm928_vm1, %v2777_v18  ;;  %2955 = vadd.xlane.f32.xlu0 %v2954_v48 }
0x110e   : > { %4169 = vmatprep.mubr.msk.f32.mxu1 %vm4647_vm0, %v4648_v11  ;;  %4177 = vmatprep.subr.mxu1 %v4648_v11 }
0x1110   : > { %4170 = vmatmul.mubr.msk.f32.vlgmr.msra.gmra.mrb[22].mxu1 %vm928_vm1, %v2775_v15 }
0x1111   : > { %4178 = vmatpush3.xpose.msk.msra.mxu1 %vm928_vm1, %v2976_v29  ;;  %4179 = vmatprep.mubr.msk.f32.mxu1 %vm4647_vm0, %v4648_v11 }
0x1112   : > { %4362 = vmatprep.subr.bf16.mxu1 %v4646_v3 }
0x1114   : > { %4180 = vmatmul.mubr.msk.f32.vlgmr.msra.gmra.mrb[24].mxu1 %vm928_vm1, %v2974_v16 }
0x1115   : > { %4195 = vmatprep.mubr.msk.f32.mxu1 %vm4647_vm0, %v4648_v11 }
0x1191   : > { %v2558_v52 = vpop.xlane.xlu1 %2557 }
0x1192   : > { %v3699_v53 = vmul.f32 -1.442695, %v2558_v52 }
0x1194   : > { %4538 = vpow2.f32 %v3699_v53 }
0x1195   : > { %v2745_v54 = vpop.xlane.xlu1 %2744 }
0x1196   : > { %v2757_v55 = vpop.xlane.xlu0 %2756  ;;  %v3704_v56 = vmul.f32 -1.442695, %v2745_v54 }
0x1197   : > { %v3705_v57 = vmul.f32 -1.442695, %v2757_v55 }
0x1198   : > { %4540 = vpow2.f32 %v3704_v56 }
0x1199   : > { %4542 = vpow2.f32 %v3705_v57  ;;  %v2944_v58 = vpop.xlane.xlu1 %2943 }
0x119a   : > { %v2956_v59 = vpop.xlane.xlu0 %2955  ;;  %v3710_v60 = vmul.f32 -1.442695, %v2944_v58 }
0x119b   : > { %v3711_v61 = vmul.f32 -1.442695, %v2956_v59 }
0x119c   : > { %4544 = vpow2.f32 %v3710_v60 }
0x119d   : > { %4546 = vpow2.f32 %v3711_v61 }
0x119e   : > { %v4539_v63 = vpop.eup %4538 }
0x119f   : > { %v2562_v1 = vadd.f32 1.0, %v4539_v63 }
0x11a1   : > { %4548 = vrcp.f32 %v2562_v1 }
0x11a2   : > { %v4541_v2 = vpop.eup %4540  ;;  %4550 = vrcp.f32 %v2550_v46 }
0x11a3   : > { %v4543_v4 = vpop.eup %4542  ;;  %v2749_v6 = vadd.f32 1.0, %v4541_v2 }
0x11a4   : > { %v2761_v5 = vadd.f32 1.0, %v4543_v4 }
0x11a6   : > { %v4545_v7 = vpop.eup %4544  ;;  %4552 = vrcp.f32 %v2761_v5 }
0x11a7   : > { %v4547_v8 = vpop.eup %4546  ;;  %4554 = vrcp.f32 %v2749_v6  ;;  %v2948_v10 = vadd.f32 1.0, %v4545_v7 }
0x11a8   : > { %v2960_v9 = vadd.f32 1.0, %v4547_v8 }
0x11aa   : > { %4556 = vrcp.f32 %v2960_v9 }
0x11ab   : > { %v4549_v12 = vpop.eup %4548  ;;  %4558 = vrcp.f32 %v2948_v10 }
0x11ac   : > { %v2565_v15 = vmul.f32 %v4549_v12, %v5377_v0  ;;  %v4551_v16 = vpop.eup %4550 }
0x11ae   : > { %v3700_v14 = vadd.f32 -1.0, %v2565_v15 }
0x11b0   : > { %v4553_v19 = vpop.eup %4552  ;;  %v2567_v20 = vmul.f32 %v4551_v16, %v3700_v14 }
0x11b1   : > { %v2764_v13 = vmul.f32 %v4553_v19, %v5377_v0  ;;  %v4555_v21 = vpop.eup %4554 }
0x11b2   : > { %v2568_v49 = vadd.f32 2.0, %v2567_v20 }
0x11b3   : > { %v3706_v22 = vadd.f32 -1.0, %v2764_v13  ;;  %v3716_v13 = vld [vmem:[%s5622_s9 + $0x20] sm:$0xff] }
0x11b4   : > { %v4557_v23 = vpop.eup %4556  ;;  %2571 = vperm.xlu0 %4456, %v2568_v49   ;;  %v3717_v49 = vld [vmem:[%s5622_s9 + $0x28] sm:$0xff] }
0x11b5   : > { %v2766_v24 = vmul.f32 %v4555_v21, %v3706_v22  ;;  %v2963_v25 = vmul.f32 %v4557_v23, %v5377_v0  ;;  %v4559_v27 = vpop.eup %4558  ;;  %v4363_v21 = vpack.c.bf16 %v3717_v49, %v3716_v13  ;;  %v3718_v22 = vld [vmem:[%s5622_s9 + $0x30] sm:$0xff]  ;;  %v3719_v23 = vld [vmem:[%s5622_s9 + $0x38] sm:$0xff] }
0x11b7   : > { %v2767_v26 = vadd.f32 2.0, %v2766_v24  ;;  %v3712_v18 = vadd.f32 -1.0, %v2963_v25  ;;  %4364 = vmatpush3.bf16.msra.mxu1 %v4363_v21  ;;  %v4366_v24 = vpack.c.bf16 %v3719_v23, %v3718_v22 }
0x11b8   : > { %4459 = vset.pattern.permute.xlu0 %v4667_v17  ;;  %4365 = vmatprep.subr.bf16.mxu1 %v4646_v3 }
0x11b9   : > { %2770 = vperm.xlu1 %4457, %v2767_v26   ;;  %v2965_v29 = vmul.f32 %v4559_v27, %v3712_v18 }
0x11bb   : > { %v2966_v30 = vadd.f32 2.0, %v2965_v29  ;;  %4367 = vmatpush3.bf16.msra.mxu1 %v4366_v24 }
0x11bc   : > { %4374 = vmatprep.subr.bf16.mxu1 %v4646_v3 }
0x11bd   : > { %4458 = vset.pattern.permute.xlu1 %v4667_v17 }
0x11be   : > { %2969 = vperm.xlu1 %4458, %v2966_v30  }
0x11db   : > { %v5437_v31 = vpop.f32.mrb[18].mxu1 }
0x11dc   : > { %v4156_v32 = vpop.f32.mrb[19].mxu1 }
0x11df   : > { %v2649_v34 = vpop.f32.mrb[20].mxu1 }
0x11e0   : > { %v4161_v35 = vpop.f32.mrb[21].mxu1 }
0x11e3   : > { %v2848_v36 = vpop.f32.mrb[22].mxu1 }
0x11e4   : > { %v4171_v37 = vpop.f32.mrb[23].mxu1 }
0x11e7   : > { %v3047_v41 = vpop.f32.mrb[24].mxu1 }
0x11e8   : > { %v4181_v0 = vpop.f32.mrb[25].mxu1 }
0x11e9   : > { %v3721_v0 = vld [vmem:[%s5623_s10 + $0x1] ss:$0 sm:$0xff] }
0x1233   : > { %v2572_v42 = vpop.permute.xlu0 %2571 }
0x1234   : > { %v2574_v44 = vmul.f32 %v2572_v42, %v5184_v28 }
0x1236   : > { %v2650_v45 = vadd.f32 %v2649_v34, %v2574_v44 }
0x1238   : > { %v2771_v48 = vpop.permute.xlu1 %2770  ;;  %v2653_v50 = vsel %vm928_vm1, %v2650_v45, -inf }
0x1239   : > { %v2773_v51 = vmul.f32 %v2771_v48, %v5191_v33  ;;  %2654 = vmax.xlane.f32.xlu1 %v2653_v50 }
0x123b   : > { %v2849_v17 = vadd.f32 %v2848_v36, %v2773_v51 }
0x123d   : > { %v2970_v52 = vpop.permute.xlu1 %2969  ;;  %v2852_v53 = vsel %vm928_vm1, %v2849_v17, -inf }
0x123e   : > { %v2972_v54 = vmul.f32 %v2970_v52, %v5198_v39  ;;  %2853 = vmax.xlane.f32.xlu0 %v2852_v53 }
0x1240   : > { %v3048_v55 = vadd.f32 %v3047_v41, %v2972_v54  ;;  %v3724_v54 = vld [vmem:[%s5625_s12 + $0x20] sm:$0xff] }
0x1242   : > { %v3051_v56 = vsel %vm928_vm1, %v3048_v55, -inf }
0x1243   : > { %3052 = vmax.xlane.f32.xlu1 %v3051_v56 }
0x1254   : > { %2863 = vrot.lane.b32.xlu0 %v5358_v47, %s5679_s30  ;;  %2664 = vrot.lane.b32.xlu1 %v5358_v47, %s5680_s17  ;;  %s3748_s30 = sshll.u32 %s4784_s28, 7  ;;  %s4672_s28 = smov [#allocation2]  }
0x12c6   : > { %v2655_v28 = vpop.xlane.xlu1 %2654 }
0x12c7   : > { %v2656_v33 = vsub.f32 %v2650_v45, %v2655_v28  ;;  %v3727_v28 = vld [vmem:[%s5625_s12 + $0x38] sm:$0xff] }
0x12c9   : > { %v2657_v57 = vmul.f32 1.442695, %v2656_v33 }
0x12cb   : > { %4560 = vpow2.f32 %v2657_v57  ;;  %v2854_v58 = vpop.xlane.xlu0 %2853 }
0x12cc   : > { %v2855_v59 = vsub.f32 %v2849_v17, %v2854_v58 }
0x12ce   : > { %v2856_v60 = vmul.f32 1.442695, %v2855_v59 }
0x12cf   : > { %v2864_v15 = vpop.permute.xlu0 %2863 }
0x12d0   : > { %4562 = vpow2.f32 %v2856_v60  ;;  %v3053_v39 = vpop.xlane.xlu1 %3052  ;;  %v3723_v60 = vld [vmem:[%s5624_s11 + $0x2] sm:$0x3] }
0x12d1   : > { %v3054_v61 = vsub.f32 %v3048_v55, %v3053_v39  ;;  %v3725_v55 = vld [vmem:[%s5625_s12 + $0x28] sm:$0xff]  ;;  %v3258_v39 = vrot.slane %v3723_v60, %v5092_v38 }
0x12d2   : > { %v4369_v56 = vpack.c.bf16 %v3725_v55, %v3724_v54 }
0x12d3   : > { %v3055_v62 = vmul.f32 1.442695, %v3054_v61 }
0x12d4   : > { %v2665_v63 = vpop.permute.xlu1 %2664 }
0x12d5   : > { %v4561_v1 = vpop.eup %4560  ;;  %4564 = vpow2.f32 %v3055_v62  ;;  %4163 = vmatpush3.msra.mxu0 %v2665_v63  ;;  %v3263_v63 = vrot.slane %v3723_v60, %v5097_v40 }
0x12d6   : > { %v2659_v46 = vsel %vm928_vm1, %v4561_v1, 0.0  ;;  %4172 = vmatprep.subr.mxu0 %v4648_v11 }
0x12d7   : > { %2660 = vadd.xlane.f32.xlu1 %v2659_v46 }
0x12da   : > { %v4563_v2 = vpop.eup %4562 }
0x12db   : > { %v2858_v4 = vsel %vm928_vm1, %v4563_v2, 0.0 }
0x12dc   : > { %2859 = vadd.xlane.f32.xlu1 %v2858_v4  ;;  %v3735_v4 = vld [vmem:[%s5627_s14 + $0x50] sm:$0xff] }
0x12df   : > { %v4565_v5 = vpop.eup %4564 }
0x12e0   : > { %v3057_v6 = vsel %vm928_vm1, %v4565_v5, 0.0 }
0x12e1   : > { %3058 = vadd.xlane.f32.xlu1 %v3057_v6 }
0x12f2   : > { %3062 = vrot.lane.b32.xlu1 %v5358_v47, %s5681_s20  ;;  %s5682_s20 = sld [smem:[#allocation13_spill]] }
0x12f8   : > { %s5570_s26 = scalar_lea.hbm %s5682_s20, %s3748_s30 }
0x1364   : > { %v2661_v7 = vpop.xlane.xlu1 %2660 }
0x1365   : > { %4566 = vrcp.f32 %v2661_v7  ;;  %v3737_v7 = vld [vmem:[%s5627_s14 + $0x60] sm:$0xff] }
0x1369   : > { %v2860_v8 = vpop.xlane.xlu1 %2859 }
0x136a   : > { %4568 = vrcp.f32 %v2860_v8 }
0x136e   : > { %v3059_v9 = vpop.xlane.xlu1 %3058 }
0x136f   : > { %v4567_v10 = vpop.eup %4566  ;;  %4570 = vrcp.f32 %v3059_v9  ;;  %v3738_v9 = vld [vmem:[%s5627_s14 + $0x68] sm:$0xff] }
0x1370   : > { %v2663_v12 = vmul.f32 %v4567_v10, %v4561_v1  ;;  %v3739_v10 = vld [vmem:[%s5627_s14 + $0x70] sm:$0xff] }
0x1372   : > { %4165 = vmatmul.mubr.msk.f32.vlgmr.msra.gmra.mrb[18].mxu0 %vm928_vm1, %v2663_v12  ;;  %v3063_v47 = vpop.permute.xlu1 %3062  ;;  %v4381_v12 = vpack.c.bf16 %v3739_v10, %v3738_v9 }
0x1373   : > { %4173 = vmatpush3.msra.mxu0 %v2864_v15  ;;  %4174 = vmatprep.mubr.msk.f32.mxu0 %vm4647_vm0, %v4648_v11  ;;  %v3740_v15 = vld [vmem:[%s5627_s14 + $0x78] sm:$0xff] }
0x1374   : > { %v4569_v14 = vpop.eup %4568  ;;  %4182 = vmatprep.subr.mxu0 %v4648_v11 }
0x1375   : > { %v2862_v16 = vmul.f32 %v4569_v14, %v4563_v2  ;;  %v3734_v2 = vld [vmem:[%s5627_s14 + $0x48] sm:$0xff]  ;;  %v3741_v14 = vld [vmem:[%s5627_s14 + $0x80] sm:$0xff] }
0x1376   : > { %v4375_v6 = vpack.c.bf16 %v3735_v4, %v3734_v2 }
0x1377   : > { %4175 = vmatmul.mubr.msk.f32.vlgmr.msra.gmra.mrb[20].mxu0 %vm928_vm1, %v2862_v16  ;;  %v4384_v16 = vpack.c.bf16 %v3741_v14, %v3740_v15 }
0x1378   : > { %4183 = vmatpush3.msra.mxu0 %v3063_v47  ;;  %4184 = vmatprep.mubr.msk.f32.mxu0 %vm4647_vm0, %v4648_v11  ;;  %v3742_v47 = vld [vmem:[%s5627_s14 + $0x88] sm:$0xff] }
0x1379   : > { %v4571_v19 = vpop.eup %4570  ;;  %4368 = vmatprep.subr.bf16.mxu0 %v4646_v3 }
0x137a   : > { %v3061_v20 = vmul.f32 %v4571_v19, %v4565_v5  ;;  %v3736_v5 = vld [vmem:[%s5627_s14 + $0x58] sm:$0xff]  ;;  %v3729_v19 = vld [vmem:[%s5626_s13 + $0x1] ss:$0 sm:$0xff] }
0x137b   : > { %v4378_v8 = vpack.c.bf16 %v3737_v7, %v3736_v5 }
0x137c   : > { %4185 = vmatmul.mubr.msk.f32.vlgmr.msra.gmra.mrb[22].mxu0 %vm928_vm1, %v3061_v20 }
0x137d   : > { %4206 = vmatprep.mubr.msk.f32.mxu0 %vm4647_vm0, %v4648_v11  ;;  %4370 = vmatpush3.bf16.msra.mxu0 %v4369_v56  ;;  %v3744_v56 = vld [vmem:[%s5628_s15 + $0x1] ss:$0 sm:$0xff] }
0x137e   : > { %4371 = vmatprep.subr.bf16.mxu0 %v4646_v3 }
0x1445   : > { %v2736_v25 = vpop.f32.mrb[18].mxu0 }
0x1446   : > { %3139 = vrot.lane.b32.xlu1 %v2736_v25, %s5670_s22  ;;  %v4166_v26 = vpop.f32.mrb[19].mxu0 }
0x144a   : > { %v2935_v18 = vpop.f32.mrb[20].mxu0 }
0x144b   : > { %3143 = vrot.lane.b32.xlu0 %v2935_v18, %s4650_s21  ;;  %v4176_v27 = vpop.f32.mrb[21].mxu0  ;;  %s554_s21 = scalar_lea.vmem [#allocation2], %s3592_s27  ;;  %s4586_s27 = sshll.u32 %s4672_s28, 4  ;;  %s4587_s27 = int_to_ptr.vmem [resolvable:$false] %s4586_s27 }
0x144c   : > { %s3517_s22 = sshll.u32 %s554_s21, 4  ;;  %s4588_s0 = scalar_lea.vmem %s4587_s27, 256  ;;  %s5572_s22 = int_to_ptr.vmem [resolvable:$true] %s3517_s22 }
0x144d   : > { %s4582_s19 = scalar_lea.vmem %s5572_s22, 128  ;;  %p4589_p0 = scmp.lt.s32.totalorder %s5572_s22, %s4587_s27 }
0x144e   : > { %p4583_p11 = scmp.ne.s32.totalorder %s5572_s22, %s4582_s19  ;;  %p4590_p1 = scmp.lt.s32.totalorder %s4588_s0, %s4582_s19 }
0x144f   : > { %v3134_v29 = vpop.f32.mrb[22].mxu0 }
0x1450   : > { %3147 = vrot.lane.b32.xlu1 %v3134_v29, %s4651_s18  ;;  %v4186_v30 = vpop.f32.mrb[23].mxu0  ;;  %p4584_p12 = pnand %p4583_p11, %p4801_p5  ;;  %p4591_p2 = por %p4590_p1, %p4589_p0 }
0x1452   : > { %p4585_p13 = pneg %p4584_p12 }
0x1454   : > { %p4592_p3 = pnand %p4591_p2, %p4585_p13 }
0x14b8   : > { %v3140_v32 = vpop.permute.xlu1 %3139 }
0x14b9   : > { %v3150_v35 = vsel %vm928_vm1, %v5437_v31, %v3140_v32 }
0x14bd   : > { %v3144_v34 = vpop.permute.xlu0 %3143 }
0x14be   : > { %v3151_v36 = vsel %vm930_vm2, %v3150_v35, %v3144_v34 }
0x14c2   : > { %v3148_v37 = vpop.permute.xlu1 %3147 }
0x14c3   : > { %v3152_v41 = vsel %vm932_vm3, %v3151_v36, %v3148_v37 }
0x14c4   : > { %4196 = vmatmul.mubr.msk.f32.vlgmr.msra.gmra.mrb[26].mxu1 %vm971_vm5, %v3152_v41 }
0x14c5   : > { %4227 = vmatprep.mubr.msk.f32.mxu1 %vm4647_vm0, %v4648_v11  ;;  %4376 = vmatpush3.bf16.msra.mxu1 %v4375_v6 }
0x14c6   : > { %4377 = vmatprep.subr.bf16.mxu1 %v4646_v3 }
0x14c9   : > { %4379 = vmatpush3.bf16.msra.mxu1 %v4378_v8 }
0x14ca   : > { %4380 = vmatprep.subr.bf16.mxu1 %v4646_v3 }
0x14cd   : > { %4382 = vmatpush3.bf16.msra.mxu1 %v4381_v12 }
0x14ce   : > { %4383 = vmatprep.subr.bf16.mxu1 %v4646_v3 }
0x14d1   : > { %4385 = vmatpush3.bf16.msra.mxu1 %v4384_v16 }
0x14d2   : > { %4225 = vmatprep.subr.mxu1 %v4648_v11 }
0x14d5   : > { %4226 = vmatpush3.msra.mxu1 %v3742_v47 }
0x1597   : > { %v3235_v42 = vpop.f32.mrb[26].mxu1 }
0x1598   : > { %v3236_v44 = vadd.f32 %v3721_v0, %v3235_v42  ;;  %v4197_v45 = vpop.f32.mrb[27].mxu1 }
0x159a   : > { %v3239_v48 = vadd.f32 %v3236_v44, %v5349_v43  ;;  %v3726_v43 = vld [vmem:[%s5625_s12 + $0x30] sm:$0xff] }
0x159b   : > { %v4372_v33 = vpack.c.bf16 %v3727_v28, %v3726_v43 }
0x159c   : > { %v3242_v31 = vsel %vm971_vm5, %v3239_v48, 0.0 }
0x159d   : > { %3243 = vadd.xlane.f32.xlu0 %v3242_v31  ;;  %4373 = vmatpush3.bf16.msra.mxu0 %v4372_v33 }
0x162a   : > { %v3244_v50 = vpop.xlane.xlu0 %3243 }
0x162b   : > { %v3245_v51 = vmul.f32 0.03125, %v3244_v50 }
0x162d   : > { %v3246_v17 = vsub.f32 %v3239_v48, %v3245_v51 }
0x162f   : > { %v3247_v52 = vmul.f32 %v3246_v17, %v3246_v17 }
0x1631   : > { %v3248_v53 = vsel %vm971_vm5, %v3247_v52, 0.0 }
0x1632   : > { %3249 = vadd.xlane.f32.xlu1 %v3248_v53 }
0x16bf   : > { %v3250_v57 = vpop.xlane.xlu1 %3249 }
0x16c0   : > { %v3251_v58 = vmul.f32 0.03125, %v3250_v57 }
0x16c2   : > { %v3252_v59 = vadd.f32 1e-05, %v3251_v58 }
0x16c4   : > { %4572 = vrsqrt.f32 %v3252_v59 }
0x16ce   : > { %v4573_v61 = vpop.eup %4572 }
0x16cf   : > { %v3254_v62 = vmul.f32 %v4573_v61, %v3246_v17 }
0x16d1   : > { %v3259_v1 = vmul.f32 %v3258_v39, %v3254_v62 }
0x16d3   : > { %v5514_v46 = vadd.f32 %v3263_v63, %v3259_v1 }
0x16d5   : > { %4207 = vmatmul.mubr.msk.f32.vlgmr.msra.gmra.mrb[24].mxu0 %vm971_vm5, %v5514_v46 }
0x17a8   : > { %v3347_v20 = vpop.f32.mrb[24].mxu0 }
0x17a9   : > { %v3348_v13 = vadd.f32 %v3729_v19, %v3347_v20  ;;  %v4208_v49 = vpop.f32.mrb[25].mxu0 }
0x17ab   : > { %v3352_v21 = vmul.f32 0.70710677, %v3348_v13  ;;  %v3379_v29 = vmin.f32 %v3348_v13, 0.0  ;;  %v3351_v17 = vmul.f32 0.5, %v3348_v13  ;;  %vm3378_vm12 = vcmp.gt.f32.partialorder %v3348_v13, 0.0 }
0x17ad   : > { %v3353_v22 = vand.u32 2147483647, %v3352_v21  ;;  %v3367_v3 = vsub.f32 0.0, %v3352_v21  ;;  %v3380_v34 = vmul.f32 1.442695, %v3379_v29  ;;  %vm3373_vm11 = vcmp.ge.f32.partialorder %v3352_v21, 0.0 }
0x17af   : > { %v3354_v23 = vmul.f32 0.3275911, %v3353_v22  ;;  %v3368_v11 = vmul.f32 %v3367_v3, %v3352_v21 }
0x17b1   : > { %v3355_v24 = vadd.f32 1.0, %v3354_v23  ;;  %v3369_v27 = vmul.f32 1.442695, %v3368_v11 }
0x17b3   : > { %4574 = vrcp.f32 %v3355_v24 }
0x17b4   : > { %4576 = vpow2.f32 %v3369_v27 }
0x17b5   : > { %4578 = vpow2.f32 %v3380_v34 }
0x17bd   : > { %v4575_v25 = vpop.eup %4574 }
0x17be   : > { %v3358_v26 = vmul.f32 1.0614054, %v4575_v25  ;;  %v4577_v42 = vpop.eup %4576 }
0x17bf   : > { %v4579_v48 = vpop.eup %4578 }
0x17c0   : > { %v3731_v18 = vadd.f32 -1.4531521, %v3358_v26  ;;  %v3733_v51 = vadd.f32 -1.0, %v4579_v48 }
0x17c2   : > { %v3360_v30 = vmul.f32 %v4575_v25, %v3731_v18  ;;  %v3383_v54 = vsel %vm3378_vm12, %v3348_v13, %v3733_v51 }
0x17c4   : > { %v3361_v32 = vadd.f32 1.4214138, %v3360_v30 }
0x17c6   : > { %v3362_v35 = vmul.f32 %v4575_v25, %v3361_v32 }
0x17c8   : > { %v3732_v36 = vadd.f32 -0.28449672, %v3362_v35 }
0x17ca   : > { %v3364_v37 = vmul.f32 %v4575_v25, %v3732_v36 }
0x17cc   : > { %v3365_v41 = vadd.f32 0.2548296, %v3364_v37 }
0x17ce   : > { %v3366_v0 = vmul.f32 %v4575_v25, %v3365_v41 }
0x17d0   : > { %v3371_v44 = vmul.f32 %v4577_v42, %v3366_v0 }
0x17d2   : > { %v3372_v45 = vsub.f32 1.0, %v3371_v44 }
0x17d4   : > { %v3374_v31 = vsub.f32 0.0, %v3372_v45 }
0x17d6   : > { %v3375_v50 = vsel %vm3373_vm11, %v3372_v45, %v3374_v31 }
0x17d7   : > { %v3376_v52 = vadd.f32 1.0, %v3375_v50 }
0x17d9   : > { %v3377_v53 = vmul.f32 %v3376_v52, %v3351_v17 }
0x17db   : > { %v3384_v55 = vsel %vm2130_vm8, %v3377_v53, %v3383_v54 }
0x17dc   : > { %4228 = vmatmul.mubr.msk.f32.vlgmr.msra.gmra.mrb[28].mxu1 %vm2148_vm10, %v3384_v55 }
0x18af   : > { %v3472_v43 = vpop.f32.mrb[28].mxu1 }
0x18b0   : > { %v3473_v28 = vadd.f32 %v3744_v56, %v3472_v43  ;;  %v4229_v33 = vpop.f32.mrb[29].mxu1 }
0x18b2   : > { %v3476_v57 = vadd.f32 %v3473_v28, %v5514_v46  ;;  %v3746_v46 = vld [vmem:[%s5629_s16 + $0x2] sm:$0x3] }
0x18b3   : > { %v3495_v4 = vrot.slane %v3746_v46, %v5092_v38  ;;  %v3500_v7 = vrot.slane %v3746_v46, %v5097_v40 }
0x18b4   : > { %v3479_v58 = vsel %vm971_vm5, %v3476_v57, 0.0 }
0x18b5   : > { %3480 = vadd.xlane.f32.xlu0 %v3479_v58 }
0x1942   : > { %v3481_v59 = vpop.xlane.xlu0 %3480 }
0x1943   : > { %v3482_v60 = vmul.f32 0.03125, %v3481_v59 }
0x1945   : > { %v3483_v39 = vsub.f32 %v3476_v57, %v3482_v60 }
0x1947   : > { %v3484_v61 = vmul.f32 %v3483_v39, %v3483_v39 }
0x1949   : > { %v3485_v62 = vsel %vm971_vm5, %v3484_v61, 0.0 }
0x194a   : > { %3486 = vadd.xlane.f32.xlu0 %v3485_v62 }
0x19d7   : > { %v3487_v63 = vpop.xlane.xlu0 %3486 }
0x19d8   : > { %v3488_v1 = vmul.f32 0.03125, %v3487_v63 }
0x19da   : > { %v3489_v2 = vadd.f32 1e-05, %v3488_v1 }
0x19dc   : > { %4580 = vrsqrt.f32 %v3489_v2 }
0x19e6   : > { %v4581_v5 = vpop.eup %4580 }
0x19e7   : > { %v3491_v6 = vmul.f32 %v4581_v5, %v3483_v39 }
0x19e9   : > { %v3496_v8 = vmul.f32 %v3495_v4, %v3491_v6 }
0x19eb   : > { %v3501_v9 = vadd.f32 %v3500_v7, %v3496_v8 }
0x19ed   : > { %3502 = vst.msk [vmem:[%s554_s21] sm:$0xff] %vm971_vm5, %v3501_v9 }
0x19ee   : > { %4595 = shalt.err (!%p4592_p3)
}
0x19ef   : > { %s4596_s24 = scalar_lea.hbm %s5570_s26, 128  ;;  %s4600_s21 = scalar_lea.hbm %s5682_s20, 256 }
0x19f0   : > { %p4597_p4 = scmp.ne.s32.totalorder %s5570_s26, %s4596_s24  ;;  %p4601_p9 = scmp.lt.u32.totalorder %s5570_s26, %s5682_s20 }
0x19f1   : > { %p4602_p10 = scmp.lt.u32.totalorder %s4600_s21, %s4596_s24  ;;  %p4604_p12 = scmp.lt.u32.totalorder %s4596_s24, %s5570_s26 }
0x19f2   : > { %p4598_p7 = pnand %p4597_p4, %p4801_p5 }
0x19f3   : > { %p4603_p11 = por %p4602_p10, %p4601_p9 }
0x19f4   : > { %p4599_p8 = pneg %p4598_p7 }
0x19f5   : > { %p4605_p13 = por %p4604_p12, %p4603_p11 }
0x19f7   : > { %p4606_p0 = pnand %p4605_p13, %p4599_p8 }
0x19f9   : > { %4609 = shalt.err (!%p4606_p0)
}
0x19fa   : > { %4386 = dma.vmem_to_hbm [thread:$0]  (%p4801_p5), %s5572_s22, 128, %s5570_s26, %s3504_s23  }
0x19fb PF: > { %s5683_s19 = sld [smem:[#allocation7_spill]]  ;;  %s5684_s28 = sld [smem:[#allocation5_spill]] }
0x1a01   : > { %p4392_p1 = scmp.ge.s32.totalorder %s5683_s19, 2  ;;  %s3529_s0 = sand.u32 1, %s5684_s28  }
0x1a02   : > { %s3530_s29 = scalar_lea.sflag [#allocation3], %s3529_s0 }
0x1a03   : > { %p4389_p2 = pnand %p4392_p1, %p4805_p6 }
0x1a05   : > { %4627 = dma.done.wait (!%p4389_p2), %s3530_s29, 128  }
0x1a06   : > { %4629 = vsyncadd (!%p4389_p2), %s3530_s29, 4294967168  ;;  %s5686_s27 = sld [smem:[#allocation8_spill]]  ;;  %s5687_s30 = sld [smem:[#allocation6_spill]] }
0x1a07   : > { %s5688_s26 = sld [smem:[#allocation9_spill]]  ;;  %s5689_s24 = smov %s4636_s25 }
0x1a0c   : > { %p27_p3 = scmp.ge.s32.totalorder %s5686_s27, 4   ;;  %s5690_s25 = smov %s5687_s30 }
0x1a0e   :  { %29 = sbr.rel (!%p27_p3) target bundleno = 7 (0x7), region = 140 }
0x1a15   :  { %3535 = vsyncpa [#allocation3], 1 }
0x1a16   :  { %3537 = vsyncpa [#allocation3 + $0x1], 1 }

</bundles_post_ra>
